<compile_context>
chip_gen: v7x
topology: tpu7x:2x2x1
jax: 0.10.0
libtpu: 0.0.40
codegen_flags: <defaults>
</compile_context>

<pallas_src>
import functools

import jax
import jax.numpy as jnp
from jax.experimental import pallas as pl
from jax.experimental.pallas import tpu as pltpu


def _round_up(x, m):
    return (x + m - 1) // m * m


def _pick_tile(total, cap, unit):
    """Largest tile <= cap that divides `total` (total is a multiple of `unit`)."""
    if total <= cap:
        return total
    t = cap - cap % unit
    while total % t:
        t -= unit
    return t


# ---------------------------------------------------------------------------
# Pallas kernels: tiled  y = (relu?)(x @ W + b)
# ---------------------------------------------------------------------------
def _mm_single_kernel(x_ref, w_ref, b_ref, o_ref, *, relu):
    # Whole K in one tile: compute + epilogue directly, no accumulation pass.
    y = jnp.dot(x_ref[...], w_ref[...],
                preferred_element_type=jnp.float32) + b_ref[...]
    if relu:
        y = jnp.maximum(y, 0.0)
    o_ref[...] = y


def _mm_acc_kernel(x_ref, w_ref, b_ref, o_ref, *, nk, relu):
    # Accumulate directly into the resident f32 output block (no scratch).
    k = pl.program_id(2)

    @pl.when(k == 0)
    def _():
        o_ref[...] = jnp.zeros_like(o_ref)

    o_ref[...] += jnp.dot(x_ref[...], w_ref[...],
                          preferred_element_type=jnp.float32)

    # Epilogue must only fire once all K partial sums are in (k == nk - 1).
    @pl.when(k == nk - 1)
    def _():
        y = o_ref[...] + b_ref[...]
        if relu:
            y = jnp.maximum(y, 0.0)
        o_ref[...] = y


def matmul_bias_act(x, wp, bp, n_out, *, relu=False):
    """y[:M, :n_out] = (relu?)(x @ W + b) via a tiled Pallas TPU matmul.

    `wp` is the pre-padded (Kp, Np) bf16 weight and `bp` the (1, Np) f32 bias,
    both built once in init_params. Only the activation is padded here.
    """
    M, K = x.shape
    Kp, Np = wp.shape
    Mp = _round_up(M, 8)

    xb = x.astype(jnp.bfloat16)                       # bf16 MXU operands
    if (Mp, Kp) != (M, K):
        xb = jnp.pad(xb, ((0, Mp - M), (0, Kp - K)))

    tm = _pick_tile(Mp, 256, 8)
    tn = _pick_tile(Np, 256, 128)                     # fc: full N = 256
    tk = _pick_tile(Kp, 2048, 128)                    # fc: 2048 -> 8 k-steps
    nk = Kp // tk

    if nk == 1:
        grid = (Mp // tm, Np // tn)
        kernel = functools.partial(_mm_single_kernel, relu=relu)
        in_specs = [
            pl.BlockSpec((tm, Kp), lambda i, j: (i, 0)),
            pl.BlockSpec((Kp, tn), lambda i, j: (0, j)),
            pl.BlockSpec((1, tn), lambda i, j: (0, j)),
        ]
        out_specs = pl.BlockSpec((tm, tn), lambda i, j: (i, j))
        dims = ("parallel", "parallel")
    else:
        grid = (Mp // tm, Np // tn, nk)
        kernel = functools.partial(_mm_acc_kernel, nk=nk, relu=relu)
        in_specs = [
            pl.BlockSpec((tm, tk), lambda i, j, k: (i, k)),
            pl.BlockSpec((tk, tn), lambda i, j, k: (k, j)),
            pl.BlockSpec((1, tn), lambda i, j, k: (0, j)),
        ]
        out_specs = pl.BlockSpec((tm, tn), lambda i, j, k: (i, j))
        dims = ("parallel", "parallel", "arbitrary")

    out = pl.pallas_call(
        kernel,
        out_shape=jax.ShapeDtypeStruct((Mp, Np), jnp.float32),
        grid_spec=pltpu.PrefetchScalarGridSpec(
            num_scalar_prefetch=0,
            grid=grid,
            in_specs=in_specs,
            out_specs=out_specs,
        ),
        compiler_params=pltpu.CompilerParams(dimension_semantics=dims),
    )(xb, wp, bp)
    return out[:M, :n_out]


# ---------------------------------------------------------------------------
# Conv2d (stride 1) = fused patch extraction + Pallas matmul kernel
# ---------------------------------------------------------------------------
def conv2d_bias_relu(x_nhwc, layer, ksize, pad, cout):
    B, H, W, C = x_nhwc.shape
    # Single fused XLA op; output features are channel-major (c, kh, kw),
    # matching the row order of the packed conv weight.
    # TODO(synk): at large B/H/W, move the kh*kw tap offsets into the kernel's
    # BlockSpec index_map to avoid materializing the patch tensor at all.
    patches = jax.lax.conv_general_dilated_patches(
        x_nhwc, (ksize, ksize), (1, 1), [(pad, pad), (pad, pad)],
        dimension_numbers=("NHWC", "HWIO", "NHWC"))
    col = patches.reshape(B * H * W, C * ksize * ksize)
    y = matmul_bias_act(col, layer["w"], layer["b"], cout, relu=True)
    return y.reshape(B, H, W, cout)


# ---------------------------------------------------------------------------
# Parameter init / packing (all padding & layout work happens ONCE, here)
# ---------------------------------------------------------------------------
def _pack_linear(w, b):
    K, N = w.shape
    Kp, Np = _round_up(K, 128), _round_up(N, 128)
    wp = jnp.zeros((Kp, Np), jnp.bfloat16).at[:K, :N].set(w.astype(jnp.bfloat16))
    bp = jnp.zeros((1, Np), jnp.float32).at[0, :N].set(b.astype(jnp.float32))
    return {"w": wp, "b": bp}


def init_params(key, size, c_screen, c_minimap, out_spatial, out_dims):
    ks = jax.random.split(key, 8)

    def conv_w(k, kh, kw, cin, cout):
        fan = kh * kw * cin
        w = jax.random.normal(k, (cin, kh, kw, cout), jnp.float32) / jnp.sqrt(fan)
        # Rows ordered (cin, kh, kw) to match conv_general_dilated_patches.
        return w.reshape(cin * kh * kw, cout)

    def lin_w(k, din, dout):
        return jax.random.normal(k, (din, dout), jnp.float32) / jnp.sqrt(din)

    n_nonsp = sum(out_dims)
    flat = 64 * size * size
    z = lambda n: jnp.zeros((n,), jnp.float32)

    # spatial_policy_conv is 1x1: fold the "* 3" output scale into w and b.
    sp_w = lin_w(ks[4], 64, out_spatial) * 3.0
    sp_b = z(out_spatial)                       # 0 * 3 == 0

    # Fuse value_fc (N=1) and nonspatial_policy_fc into one head: [nonsp | value].
    head_w = jnp.concatenate([lin_w(ks[6], 256, n_nonsp), lin_w(ks[7], 256, 1)],
                             axis=1)
    head_b = z(n_nonsp + 1)

    return {
        "sc1": _pack_linear(conv_w(ks[0], 5, 5, c_screen, 16), z(16)),
        "sc2": _pack_linear(conv_w(ks[1], 3, 3, 16, 32), z(32)),
        "mc1": _pack_linear(conv_w(ks[2], 5, 5, c_minimap, 16), z(16)),
        "mc2": _pack_linear(conv_w(ks[3], 3, 3, 16, 32), z(32)),
        # fc weight rows are stored in NHWC (h, w, c) flatten order; importing a
        # PyTorch fc weight would require permuting its input rows from the
        # NCHW (c, h, w) order — the permutation is baked in here, once.
        "fc":  _pack_linear(lin_w(ks[5], flat, 256), z(256)),
        "sp":  _pack_linear(sp_w, sp_b),
        "head": _pack_linear(head_w, head_b),
    }


# ---------------------------------------------------------------------------
# Forward pass
# ---------------------------------------------------------------------------
def make_forward(out_dims, out_spatial):
    n_nonsp = sum(out_dims)

    @jax.jit
    def forward(params, screen_x_nchw, minimap_x_nchw):
        # NCHW (PyTorch) -> NHWC, bf16 activations for the MXU.
        s = jnp.transpose(screen_x_nchw, (0, 2, 3, 1)).astype(jnp.bfloat16)
        m = jnp.transpose(minimap_x_nchw, (0, 2, 3, 1)).astype(jnp.bfloat16)

        s = conv2d_bias_relu(s, params["sc1"], 5, 2, 16)
        s = conv2d_bias_relu(s, params["sc2"], 3, 1, 32)
        m = conv2d_bias_relu(m, params["mc1"], 5, 2, 16)
        m = conv2d_bias_relu(m, params["mc2"], 3, 1, 32)

        xcat = jnp.concatenate([s, m], axis=-1)             # (B, H, W, 64)
        B, H, W, C = xcat.shape

        # fc on the NHWC flatten; the (c,h,w)->(h,w,c) permutation lives in fc_w.
        hid = matmul_bias_act(xcat.reshape(B, H * W * C),
                              params["fc"]["w"], params["fc"]["b"],
                              256, relu=True)                # (B, 256)

        # Fused nonspatial-policy + value heads (one small matmul on `hid`).
        heads = matmul_bias_act(hid, params["head"]["w"], params["head"]["b"],
                                n_nonsp + 1)                 # (B, n_nonsp + 1)
        nonsp = heads[:, :n_nonsp]
        value = heads[:, n_nonsp:n_nonsp + 1]                # (B, 1)

        # Spatial policy: 1x1 conv == channel matmul; *3 already folded in.
        sp = matmul_bias_act(xcat.reshape(B * H * W, C),
                             params["sp"]["w"], params["sp"]["b"], out_spatial)
        sp = sp.reshape(B, H, W, out_spatial)

        # _transform_policy: per-channel spatial chunks (flattened h,w),
        # nonspatial split by out_dims, interleaved as in the PyTorch module.
        spatial_list = [sp[:, :, :, si].reshape(B, H * W)
                        for si in range(out_spatial)]
        nonsp_list, idx = [], 0
        for d in out_dims:
            nonsp_list.append(nonsp[:, idx:idx + d])
            idx += d
        policy = nonsp_list[0:1] + spatial_list + nonsp_list[1:]
        return policy, value

    return forward


if __name__ == "__main__":
    batch = 2
    screen_minimap_size = 16
    in_channels_screen = 4
    in_channels_minimap = 3
    out_channels_spatial = 2
    out_dims_nonspatial = (5, 3)

    key = jax.random.PRNGKey(0)
    k_param, k_screen, k_minimap = jax.random.split(key, 3)

    params = init_params(k_param, screen_minimap_size, in_channels_screen,
                         in_channels_minimap, out_channels_spatial,
                         out_dims_nonspatial)

    screen_x = jax.random.normal(
        k_screen,
        (batch, in_channels_screen, screen_minimap_size, screen_minimap_size),
        jnp.float32)
    minimap_x = jax.random.normal(
        k_minimap,
        (batch, in_channels_minimap, screen_minimap_size, screen_minimap_size),
        jnp.float32)

    forward = make_forward(out_dims_nonspatial, out_channels_spatial)
    policy, value = forward(params, screen_x, minimap_x)
    jax.block_until_ready((policy, value))

    # Sanity checks on output structure.
    assert value.shape == (batch, 1)
    assert len(policy) == out_channels_spatial + len(out_dims_nonspatial)
    assert policy[0].shape == (batch, out_dims_nonspatial[0])
    assert policy[1].shape == (batch, screen_minimap_size * screen_minimap_size)
    assert policy[-1].shape == (batch, out_dims_nonspatial[-1])

    print("KERNEL_OK")
</pallas_src>

<mosaic_0001>
module attributes {stable_mosaic.version = 11 : i64} {
  func.func @_mm_single_kernel(%arg0: i32, %arg1: i32, %arg2: memref<256x128xbf16, #tpu.memory_space<vmem>>, %arg3: memref<128x128xbf16, #tpu.memory_space<vmem>>, %arg4: memref<1x128xf32, #tpu.memory_space<vmem>>, %arg5: memref<256x128xf32, #tpu.memory_space<vmem>>) attributes {dimension_semantics = [#tpu.dimension_semantics<parallel>, #tpu.dimension_semantics<parallel>], iteration_bounds = array<i64: 2, 1>, scalar_prefetch = 0 : i64, scratch_operands = 0 : i64, tpu.core_type = #tpu.core_type<tc>, window_params = [{transform_indices = @transform_0, window_bounds = array<i64: 256, 128>}, {transform_indices = @transform_1, window_bounds = array<i64: 128, 128>}, {transform_indices = @transform_2, window_bounds = array<i64: 1, 128>}, {transform_indices = @transform_3, window_bounds = array<i64: 256, 128>}]} {
    %c0 = arith.constant 0 : index
    %c0_0 = arith.constant 0 : index
    %0 = vector.load %arg2[%c0, %c0_0] : memref<256x128xbf16, #tpu.memory_space<vmem>>, vector<256x128xbf16>
    %c0_1 = arith.constant 0 : index
    %c0_2 = arith.constant 0 : index
    %1 = vector.load %arg3[%c0_1, %c0_2] : memref<128x128xbf16, #tpu.memory_space<vmem>>, vector<128x128xbf16>
    %cst = arith.constant dense<0.000000e+00> : vector<256x128xf32>
    %2 = tpu.matmul %0, %1, %cst {dimension_numbers = #tpu.dot_dimension_numbers<[1], [0], [0], [1], [0, 0, 1, 1], [], []>} : vector<256x128xbf16>, vector<128x128xbf16>, vector<256x128xf32> -> vector<256x128xf32>
    %c0_3 = arith.constant 0 : index
    %c0_4 = arith.constant 0 : index
    %3 = vector.load %arg4[%c0_3, %c0_4] : memref<1x128xf32, #tpu.memory_space<vmem>>, vector<1x128xf32>
    %4 = vector.broadcast %3 : vector<1x128xf32> to vector<256x128xf32>
    %5 = arith.addf %2, %4 : vector<256x128xf32>
    %cst_5 = arith.constant 0.000000e+00 : f32
    %6 = vector.broadcast %cst_5 : f32 to vector<256x128xf32>
    %7 = arith.maximumf %5, %6 : vector<256x128xf32>
    %c0_6 = arith.constant 0 : index
    %c0_7 = arith.constant 0 : index
    %8 = vector.load %arg5[%c0_6, %c0_7] : memref<256x128xf32, #tpu.memory_space<vmem>>, vector<256x128xf32>
    tpu.vector_store %arg5[%c0_6, %c0_7], %7 {strides = array<i32>} : memref<256x128xf32, #tpu.memory_space<vmem>>, vector<256x128xf32>,
    return
  }
  func.func @transform_0(%arg0: i32, %arg1: i32) -> (i32, i32) {
    %c0_i32 = arith.constant 0 : i32
    %c0_i32_0 = arith.constant 0 : i32
    return %arg0, %c0_i32 : i32, i32
  }
  func.func @transform_1(%arg0: i32, %arg1: i32) -> (i32, i32) {
    %c0_i32 = arith.constant 0 : i32
    %c0_i32_0 = arith.constant 0 : i32
    return %c0_i32, %arg1 : i32, i32
  }
  func.func @transform_2(%arg0: i32, %arg1: i32) -> (i32, i32) {
    %c0_i32 = arith.constant 0 : i32
    %c0_i32_0 = arith.constant 0 : i32
    return %c0_i32, %arg1 : i32, i32
  }
  func.func @transform_3(%arg0: i32, %arg1: i32) -> (i32, i32) {
    %c0_i32 = arith.constant 0 : i32
    return %arg0, %arg1 : i32, i32
  }
}

module attributes {stable_mosaic.version = 11 : i64} {
  func.func @_mm_single_kernel(%arg0: i32, %arg1: i32, %arg2: memref<256x256xbf16, #tpu.memory_space<vmem>>, %arg3: memref<256x128xbf16, #tpu.memory_space<vmem>>, %arg4: memref<1x128xf32, #tpu.memory_space<vmem>>, %arg5: memref<256x128xf32, #tpu.memory_space<vmem>>) attributes {dimension_semantics = [#tpu.dimension_semantics<parallel>, #tpu.dimension_semantics<parallel>], iteration_bounds = array<i64: 2, 1>, scalar_prefetch = 0 : i64, scratch_operands = 0 : i64, tpu.core_type = #tpu.core_type<tc>, window_params = [{transform_indices = @transform_0, window_bounds = array<i64: 256, 256>}, {transform_indices = @transform_1, window_bounds = array<i64: 256, 128>}, {transform_indices = @transform_2, window_bounds = array<i64: 1, 128>}, {transform_indices = @transform_3, window_bounds = array<i64: 256, 128>}]} {
    %c0 = arith.constant 0 : index
    %c0_0 = arith.constant 0 : index
    %0 = vector.load %arg2[%c0, %c0_0] : memref<256x256xbf16, #tpu.memory_space<vmem>>, vector<256x256xbf16>
    %c0_1 = arith.constant 0 : index
    %c0_2 = arith.constant 0 : index
    %1 = vector.load %arg3[%c0_1, %c0_2] : memref<256x128xbf16, #tpu.memory_space<vmem>>, vector<256x128xbf16>
    %cst = arith.constant dense<0.000000e+00> : vector<256x128xf32>
    %2 = tpu.matmul %0, %1, %cst {dimension_numbers = #tpu.dot_dimension_numbers<[1], [0], [0], [1], [0, 0, 1, 1], [], []>} : vector<256x256xbf16>, vector<256x128xbf16>, vector<256x128xf32> -> vector<256x128xf32>
    %c0_3 = arith.constant 0 : index
    %c0_4 = arith.constant 0 : index
    %3 = vector.load %arg4[%c0_3, %c0_4] : memref<1x128xf32, #tpu.memory_space<vmem>>, vector<1x128xf32>
    %4 = vector.broadcast %3 : vector<1x128xf32> to vector<256x128xf32>
    %5 = arith.addf %2, %4 : vector<256x128xf32>
    %cst_5 = arith.constant 0.000000e+00 : f32
    %6 = vector.broadcast %cst_5 : f32 to vector<256x128xf32>
    %7 = arith.maximumf %5, %6 : vector<256x128xf32>
    %c0_6 = arith.constant 0 : index
    %c0_7 = arith.constant 0 : index
    %8 = vector.load %arg5[%c0_6, %c0_7] : memref<256x128xf32, #tpu.memory_space<vmem>>, vector<256x128xf32>
    tpu.vector_store %arg5[%c0_6, %c0_7], %7 {strides = array<i32>} : memref<256x128xf32, #tpu.memory_space<vmem>>, vector<256x128xf32>,
    return
  }
  func.func @transform_0(%arg0: i32, %arg1: i32) -> (i32, i32) {
    %c0_i32 = arith.constant 0 : i32
    %c0_i32_0 = arith.constant 0 : i32
    return %arg0, %c0_i32 : i32, i32
  }
  func.func @transform_1(%arg0: i32, %arg1: i32) -> (i32, i32) {
    %c0_i32 = arith.constant 0 : i32
    %c0_i32_0 = arith.constant 0 : i32
    return %c0_i32, %arg1 : i32, i32
  }
  func.func @transform_2(%arg0: i32, %arg1: i32) -> (i32, i32) {
    %c0_i32 = arith.constant 0 : i32
    %c0_i32_0 = arith.constant 0 : i32
    return %c0_i32, %arg1 : i32, i32
  }
  func.func @transform_3(%arg0: i32, %arg1: i32) -> (i32, i32) {
    %c0_i32 = arith.constant 0 : i32
    return %arg0, %arg1 : i32, i32
  }
}

module attributes {stable_mosaic.version = 11 : i64} {
  func.func @_mm_single_kernel(%arg0: i32, %arg1: i32, %arg2: memref<256x128xbf16, #tpu.memory_space<vmem>>, %arg3: memref<128x128xbf16, #tpu.memory_space<vmem>>, %arg4: memref<1x128xf32, #tpu.memory_space<vmem>>, %arg5: memref<256x128xf32, #tpu.memory_space<vmem>>) attributes {dimension_semantics = [#tpu.dimension_semantics<parallel>, #tpu.dimension_semantics<parallel>], iteration_bounds = array<i64: 2, 1>, scalar_prefetch = 0 : i64, scratch_operands = 0 : i64, tpu.core_type = #tpu.core_type<tc>, window_params = [{transform_indices = @transform_0, window_bounds = array<i64: 256, 128>}, {transform_indices = @transform_1, window_bounds = array<i64: 128, 128>}, {transform_indices = @transform_2, window_bounds = array<i64: 1, 128>}, {transform_indices = @transform_3, window_bounds = array<i64: 256, 128>}]} {
    %c0 = arith.constant 0 : index
    %c0_0 = arith.constant 0 : index
    %0 = vector.load %arg2[%c0, %c0_0] : memref<256x128xbf16, #tpu.memory_space<vmem>>, vector<256x128xbf16>
    %c0_1 = arith.constant 0 : index
    %c0_2 = arith.constant 0 : index
    %1 = vector.load %arg3[%c0_1, %c0_2] : memref<128x128xbf16, #tpu.memory_space<vmem>>, vector<128x128xbf16>
    %cst = arith.constant dense<0.000000e+00> : vector<256x128xf32>
    %2 = tpu.matmul %0, %1, %cst {dimension_numbers = #tpu.dot_dimension_numbers<[1], [0], [0], [1], [0, 0, 1, 1], [], []>} : vector<256x128xbf16>, vector<128x128xbf16>, vector<256x128xf32> -> vector<256x128xf32>
    %c0_3 = arith.constant 0 : index
    %c0_4 = arith.constant 0 : index
    %3 = vector.load %arg4[%c0_3, %c0_4] : memref<1x128xf32, #tpu.memory_space<vmem>>, vector<1x128xf32>
    %4 = vector.broadcast %3 : vector<1x128xf32> to vector<256x128xf32>
    %5 = arith.addf %2, %4 : vector<256x128xf32>
    %cst_5 = arith.constant 0.000000e+00 : f32
    %6 = vector.broadcast %cst_5 : f32 to vector<256x128xf32>
    %7 = arith.maximumf %5, %6 : vector<256x128xf32>
    %c0_6 = arith.constant 0 : index
    %c0_7 = arith.constant 0 : index
    %8 = vector.load %arg5[%c0_6, %c0_7] : memref<256x128xf32, #tpu.memory_space<vmem>>, vector<256x128xf32>
    tpu.vector_store %arg5[%c0_6, %c0_7], %7 {strides = array<i32>} : memref<256x128xf32, #tpu.memory_space<vmem>>, vector<256x128xf32>,
    return
  }
  func.func @transform_0(%arg0: i32, %arg1: i32) -> (i32, i32) {
    %c0_i32 = arith.constant 0 : i32
    %c0_i32_0 = arith.constant 0 : i32
    return %arg0, %c0_i32 : i32, i32
  }
  func.func @transform_1(%arg0: i32, %arg1: i32) -> (i32, i32) {
    %c0_i32 = arith.constant 0 : i32
    %c0_i32_0 = arith.constant 0 : i32
    return %c0_i32, %arg1 : i32, i32
  }
  func.func @transform_2(%arg0: i32, %arg1: i32) -> (i32, i32) {
    %c0_i32 = arith.constant 0 : i32
    %c0_i32_0 = arith.constant 0 : i32
    return %c0_i32, %arg1 : i32, i32
  }
  func.func @transform_3(%arg0: i32, %arg1: i32) -> (i32, i32) {
    %c0_i32 = arith.constant 0 : i32
    return %arg0, %arg1 : i32, i32
  }
}

module attributes {stable_mosaic.version = 11 : i64} {
  func.func @_mm_single_kernel(%arg0: i32, %arg1: i32, %arg2: memref<256x256xbf16, #tpu.memory_space<vmem>>, %arg3: memref<256x128xbf16, #tpu.memory_space<vmem>>, %arg4: memref<1x128xf32, #tpu.memory_space<vmem>>, %arg5: memref<256x128xf32, #tpu.memory_space<vmem>>) attributes {dimension_semantics = [#tpu.dimension_semantics<parallel>, #tpu.dimension_semantics<parallel>], iteration_bounds = array<i64: 2, 1>, scalar_prefetch = 0 : i64, scratch_operands = 0 : i64, tpu.core_type = #tpu.core_type<tc>, window_params = [{transform_indices = @transform_0, window_bounds = array<i64: 256, 256>}, {transform_indices = @transform_1, window_bounds = array<i64: 256, 128>}, {transform_indices = @transform_2, window_bounds = array<i64: 1, 128>}, {transform_indices = @transform_3, window_bounds = array<i64: 256, 128>}]} {
    %c0 = arith.constant 0 : index
    %c0_0 = arith.constant 0 : index
    %0 = vector.load %arg2[%c0, %c0_0] : memref<256x256xbf16, #tpu.memory_space<vmem>>, vector<256x256xbf16>
    %c0_1 = arith.constant 0 : index
    %c0_2 = arith.constant 0 : index
    %1 = vector.load %arg3[%c0_1, %c0_2] : memref<256x128xbf16, #tpu.memory_space<vmem>>, vector<256x128xbf16>
    %cst = arith.constant dense<0.000000e+00> : vector<256x128xf32>
    %2 = tpu.matmul %0, %1, %cst {dimension_numbers = #tpu.dot_dimension_numbers<[1], [0], [0], [1], [0, 0, 1, 1], [], []>} : vector<256x256xbf16>, vector<256x128xbf16>, vector<256x128xf32> -> vector<256x128xf32>
    %c0_3 = arith.constant 0 : index
    %c0_4 = arith.constant 0 : index
    %3 = vector.load %arg4[%c0_3, %c0_4] : memref<1x128xf32, #tpu.memory_space<vmem>>, vector<1x128xf32>
    %4 = vector.broadcast %3 : vector<1x128xf32> to vector<256x128xf32>
    %5 = arith.addf %2, %4 : vector<256x128xf32>
    %cst_5 = arith.constant 0.000000e+00 : f32
    %6 = vector.broadcast %cst_5 : f32 to vector<256x128xf32>
    %7 = arith.maximumf %5, %6 : vector<256x128xf32>
    %c0_6 = arith.constant 0 : index
    %c0_7 = arith.constant 0 : index
    %8 = vector.load %arg5[%c0_6, %c0_7] : memref<256x128xf32, #tpu.memory_space<vmem>>, vector<256x128xf32>
    tpu.vector_store %arg5[%c0_6, %c0_7], %7 {strides = array<i32>} : memref<256x128xf32, #tpu.memory_space<vmem>>, vector<256x128xf32>,
    return
  }
  func.func @transform_0(%arg0: i32, %arg1: i32) -> (i32, i32) {
    %c0_i32 = arith.constant 0 : i32
    %c0_i32_0 = arith.constant 0 : i32
    return %arg0, %c0_i32 : i32, i32
  }
  func.func @transform_1(%arg0: i32, %arg1: i32) -> (i32, i32) {
    %c0_i32 = arith.constant 0 : i32
    %c0_i32_0 = arith.constant 0 : i32
    return %c0_i32, %arg1 : i32, i32
  }
  func.func @transform_2(%arg0: i32, %arg1: i32) -> (i32, i32) {
    %c0_i32 = arith.constant 0 : i32
    %c0_i32_0 = arith.constant 0 : i32
    return %c0_i32, %arg1 : i32, i32
  }
  func.func @transform_3(%arg0: i32, %arg1: i32) -> (i32, i32) {
    %c0_i32 = arith.constant 0 : i32
    return %arg0, %arg1 : i32, i32
  }
}

module attributes {stable_mosaic.version = 11 : i64} {
  func.func @_mm_acc_kernel(%arg0: i32, %arg1: i32, %arg2: i32, %arg3: memref<8x2048xbf16, #tpu.memory_space<vmem>>, %arg4: memref<2048x256xbf16, #tpu.memory_space<vmem>>, %arg5: memref<1x256xf32, #tpu.memory_space<vmem>>, %arg6: memref<8x256xf32, #tpu.memory_space<vmem>>) attributes {dimension_semantics = [#tpu.dimension_semantics<parallel>, #tpu.dimension_semantics<parallel>, #tpu.dimension_semantics<arbitrary>], iteration_bounds = array<i64: 1, 1, 8>, scalar_prefetch = 0 : i64, scratch_operands = 0 : i64, tpu.core_type = #tpu.core_type<tc>, window_params = [{transform_indices = @transform_0, window_bounds = array<i64: 8, 2048>}, {transform_indices = @transform_1, window_bounds = array<i64: 2048, 256>}, {transform_indices = @transform_2, window_bounds = array<i64: 1, 256>}, {transform_indices = @transform_3, window_bounds = array<i64: 8, 256>}]} {
    %c0_i32 = arith.constant 0 : i32
    %0 = arith.cmpi eq, %arg2, %c0_i32 : i32
    %1 = arith.extui %0 : i1 to i32
    %c0_i32_0 = arith.constant 0 : i32
    %2 = arith.cmpi ne, %1, %c0_i32_0 : i32
    scf.if %2 {
      %cst_9 = arith.constant 0.000000e+00 : f32
      %12 = vector.broadcast %cst_9 : f32 to vector<8x256xf32>
      %c0_10 = arith.constant 0 : index
      %c0_11 = arith.constant 0 : index
      %13 = vector.load %arg6[%c0_10, %c0_11] : memref<8x256xf32, #tpu.memory_space<vmem>>, vector<8x256xf32>
      tpu.vector_store %arg6[%c0_10, %c0_11], %12 {strides = array<i32>} : memref<8x256xf32, #tpu.memory_space<vmem>>, vector<8x256xf32>,
    } else {
    }
    %c0 = arith.constant 0 : index
    %c0_1 = arith.constant 0 : index
    %3 = vector.load %arg6[%c0, %c0_1] : memref<8x256xf32, #tpu.memory_space<vmem>>, vector<8x256xf32>
    %c0_2 = arith.constant 0 : index
    %c0_3 = arith.constant 0 : index
    %4 = vector.load %arg3[%c0_2, %c0_3] : memref<8x2048xbf16, #tpu.memory_space<vmem>>, vector<8x2048xbf16>
    %c0_4 = arith.constant 0 : index
    %c0_5 = arith.constant 0 : index
    %5 = vector.load %arg4[%c0_4, %c0_5] : memref<2048x256xbf16, #tpu.memory_space<vmem>>, vector<2048x256xbf16>
    %cst = arith.constant dense<0.000000e+00> : vector<8x256xf32>
    %6 = tpu.matmul %4, %5, %cst {dimension_numbers = #tpu.dot_dimension_numbers<[1], [0], [0], [1], [0, 0, 1, 1], [], []>} : vector<8x2048xbf16>, vector<2048x256xbf16>, vector<8x256xf32> -> vector<8x256xf32>
    %7 = arith.addf %3, %6 : vector<8x256xf32>
    %c0_6 = arith.constant 0 : index
    %c0_7 = arith.constant 0 : index
    %8 = vector.load %arg6[%c0_6, %c0_7] : memref<8x256xf32, #tpu.memory_space<vmem>>, vector<8x256xf32>
    tpu.vector_store %arg6[%c0_6, %c0_7], %7 {strides = array<i32>} : memref<8x256xf32, #tpu.memory_space<vmem>>, vector<8x256xf32>,
    %c7_i32 = arith.constant 7 : i32
    %9 = arith.cmpi eq, %arg2, %c7_i32 : i32
    %10 = arith.extui %9 : i1 to i32
    %c0_i32_8 = arith.constant 0 : i32
    %11 = arith.cmpi ne, %10, %c0_i32_8 : i32
    scf.if %11 {
      %c0_9 = arith.constant 0 : index
      %c0_10 = arith.constant 0 : index
      %12 = vector.load %arg6[%c0_9, %c0_10] : memref<8x256xf32, #tpu.memory_space<vmem>>, vector<8x256xf32>
      %c0_11 = arith.constant 0 : index
      %c0_12 = arith.constant 0 : index
      %13 = vector.load %arg5[%c0_11, %c0_12] : memref<1x256xf32, #tpu.memory_space<vmem>>, vector<1x256xf32>
      %14 = vector.broadcast %13 : vector<1x256xf32> to vector<8x256xf32>
      %15 = arith.addf %12, %14 : vector<8x256xf32>
      %cst_13 = arith.constant 0.000000e+00 : f32
      %16 = vector.broadcast %cst_13 : f32 to vector<8x256xf32>
      %17 = arith.maximumf %15, %16 : vector<8x256xf32>
      %c0_14 = arith.constant 0 : index
      %c0_15 = arith.constant 0 : index
      %18 = vector.load %arg6[%c0_14, %c0_15] : memref<8x256xf32, #tpu.memory_space<vmem>>, vector<8x256xf32>
      tpu.vector_store %arg6[%c0_14, %c0_15], %17 {strides = array<i32>} : memref<8x256xf32, #tpu.memory_space<vmem>>, vector<8x256xf32>,
    } else {
    }
    return
  }
  func.func @transform_0(%arg0: i32, %arg1: i32, %arg2: i32) -> (i32, i32) {
    %c0_i32 = arith.constant 0 : i32
    return %arg0, %arg2 : i32, i32
  }
  func.func @transform_1(%arg0: i32, %arg1: i32, %arg2: i32) -> (i32, i32) {
    %c0_i32 = arith.constant 0 : i32
    return %arg2, %arg1 : i32, i32
  }
  func.func @transform_2(%arg0: i32, %arg1: i32, %arg2: i32) -> (i32, i32) {
    %c0_i32 = arith.constant 0 : i32
    %c0_i32_0 = arith.constant 0 : i32
    return %c0_i32, %arg1 : i32, i32
  }
  func.func @transform_3(%arg0: i32, %arg1: i32, %arg2: i32) -> (i32, i32) {
    %c0_i32 = arith.constant 0 : i32
    return %arg0, %arg1 : i32, i32
  }
}

module attributes {stable_mosaic.version = 11 : i64} {
  func.func @_mm_single_kernel(%arg0: i32, %arg1: i32, %arg2: memref<8x256xbf16, #tpu.memory_space<vmem>>, %arg3: memref<256x128xbf16, #tpu.memory_space<vmem>>, %arg4: memref<1x128xf32, #tpu.memory_space<vmem>>, %arg5: memref<8x128xf32, #tpu.memory_space<vmem>>) attributes {dimension_semantics = [#tpu.dimension_semantics<parallel>, #tpu.dimension_semantics<parallel>], iteration_bounds = array<i64: 1, 1>, scalar_prefetch = 0 : i64, scratch_operands = 0 : i64, tpu.core_type = #tpu.core_type<tc>, window_params = [{transform_indices = @transform_0, window_bounds = array<i64: 8, 256>}, {transform_indices = @transform_1, window_bounds = array<i64: 256, 128>}, {transform_indices = @transform_2, window_bounds = array<i64: 1, 128>}, {transform_indices = @transform_3, window_bounds = array<i64: 8, 128>}]} {
    %c0 = arith.constant 0 : index
    %c0_0 = arith.constant 0 : index
    %0 = vector.load %arg2[%c0, %c0_0] : memref<8x256xbf16, #tpu.memory_space<vmem>>, vector<8x256xbf16>
    %c0_1 = arith.constant 0 : index
    %c0_2 = arith.constant 0 : index
    %1 = vector.load %arg3[%c0_1, %c0_2] : memref<256x128xbf16, #tpu.memory_space<vmem>>, vector<256x128xbf16>
    %cst = arith.constant dense<0.000000e+00> : vector<8x128xf32>
    %2 = tpu.matmul %0, %1, %cst {dimension_numbers = #tpu.dot_dimension_numbers<[1], [0], [0], [1], [0, 0, 1, 1], [], []>} : vector<8x256xbf16>, vector<256x128xbf16>, vector<8x128xf32> -> vector<8x128xf32>
    %c0_3 = arith.constant 0 : index
    %c0_4 = arith.constant 0 : index
    %3 = vector.load %arg4[%c0_3, %c0_4] : memref<1x128xf32, #tpu.memory_space<vmem>>, vector<1x128xf32>
    %4 = vector.broadcast %3 : vector<1x128xf32> to vector<8x128xf32>
    %5 = arith.addf %2, %4 : vector<8x128xf32>
    %c0_5 = arith.constant 0 : index
    %c0_6 = arith.constant 0 : index
    %6 = vector.load %arg5[%c0_5, %c0_6] : memref<8x128xf32, #tpu.memory_space<vmem>>, vector<8x128xf32>
    tpu.vector_store %arg5[%c0_5, %c0_6], %5 {strides = array<i32>} : memref<8x128xf32, #tpu.memory_space<vmem>>, vector<8x128xf32>,
    return
  }
  func.func @transform_0(%arg0: i32, %arg1: i32) -> (i32, i32) {
    %c0_i32 = arith.constant 0 : i32
    %c0_i32_0 = arith.constant 0 : i32
    return %arg0, %c0_i32 : i32, i32
  }
  func.func @transform_1(%arg0: i32, %arg1: i32) -> (i32, i32) {
    %c0_i32 = arith.constant 0 : i32
    %c0_i32_0 = arith.constant 0 : i32
    return %c0_i32, %arg1 : i32, i32
  }
  func.func @transform_2(%arg0: i32, %arg1: i32) -> (i32, i32) {
    %c0_i32 = arith.constant 0 : i32
    %c0_i32_0 = arith.constant 0 : i32
    return %c0_i32, %arg1 : i32, i32
  }
  func.func @transform_3(%arg0: i32, %arg1: i32) -> (i32, i32) {
    %c0_i32 = arith.constant 0 : i32
    return %arg0, %arg1 : i32, i32
  }
}

module attributes {stable_mosaic.version = 11 : i64} {
  func.func @_mm_single_kernel(%arg0: i32, %arg1: i32, %arg2: memref<256x128xbf16, #tpu.memory_space<vmem>>, %arg3: memref<128x128xbf16, #tpu.memory_space<vmem>>, %arg4: memref<1x128xf32, #tpu.memory_space<vmem>>, %arg5: memref<256x128xf32, #tpu.memory_space<vmem>>) attributes {dimension_semantics = [#tpu.dimension_semantics<parallel>, #tpu.dimension_semantics<parallel>], iteration_bounds = array<i64: 2, 1>, scalar_prefetch = 0 : i64, scratch_operands = 0 : i64, tpu.core_type = #tpu.core_type<tc>, window_params = [{transform_indices = @transform_0, window_bounds = array<i64: 256, 128>}, {transform_indices = @transform_1, window_bounds = array<i64: 128, 128>}, {transform_indices = @transform_2, window_bounds = array<i64: 1, 128>}, {transform_indices = @transform_3, window_bounds = array<i64: 256, 128>}]} {
    %c0 = arith.constant 0 : index
    %c0_0 = arith.constant 0 : index
    %0 = vector.load %arg2[%c0, %c0_0] : memref<256x128xbf16, #tpu.memory_space<vmem>>, vector<256x128xbf16>
    %c0_1 = arith.constant 0 : index
    %c0_2 = arith.constant 0 : index
    %1 = vector.load %arg3[%c0_1, %c0_2] : memref<128x128xbf16, #tpu.memory_space<vmem>>, vector<128x128xbf16>
    %cst = arith.constant dense<0.000000e+00> : vector<256x128xf32>
    %2 = tpu.matmul %0, %1, %cst {dimension_numbers = #tpu.dot_dimension_numbers<[1], [0], [0], [1], [0, 0, 1, 1], [], []>} : vector<256x128xbf16>, vector<128x128xbf16>, vector<256x128xf32> -> vector<256x128xf32>
    %c0_3 = arith.constant 0 : index
    %c0_4 = arith.constant 0 : index
    %3 = vector.load %arg4[%c0_3, %c0_4] : memref<1x128xf32, #tpu.memory_space<vmem>>, vector<1x128xf32>
    %4 = vector.broadcast %3 : vector<1x128xf32> to vector<256x128xf32>
    %5 = arith.addf %2, %4 : vector<256x128xf32>
    %c0_5 = arith.constant 0 : index
    %c0_6 = arith.constant 0 : index
    %6 = vector.load %arg5[%c0_5, %c0_6] : memref<256x128xf32, #tpu.memory_space<vmem>>, vector<256x128xf32>
    tpu.vector_store %arg5[%c0_5, %c0_6], %5 {strides = array<i32>} : memref<256x128xf32, #tpu.memory_space<vmem>>, vector<256x128xf32>,
    return
  }
  func.func @transform_0(%arg0: i32, %arg1: i32) -> (i32, i32) {
    %c0_i32 = arith.constant 0 : i32
    %c0_i32_0 = arith.constant 0 : i32
    return %arg0, %c0_i32 : i32, i32
  }
  func.func @transform_1(%arg0: i32, %arg1: i32) -> (i32, i32) {
    %c0_i32 = arith.constant 0 : i32
    %c0_i32_0 = arith.constant 0 : i32
    return %c0_i32, %arg1 : i32, i32
  }
  func.func @transform_2(%arg0: i32, %arg1: i32) -> (i32, i32) {
    %c0_i32 = arith.constant 0 : i32
    %c0_i32_0 = arith.constant 0 : i32
    return %c0_i32, %arg1 : i32, i32
  }
  func.func @transform_3(%arg0: i32, %arg1: i32) -> (i32, i32) {
    %c0_i32 = arith.constant 0 : i32
    return %arg0, %arg1 : i32, i32
  }
}

</mosaic_0001>

<bundles_post_ra>
// kernel: forward.7
= control target key start
LH: loop header
LB: loop body
LE: loop exit
PB: predicated region body
PF: predicated region fallthrough
CT: control target
= control target key end

     0   :  { %8 = vsyncpa [#allocation3], 0  ;;  %s1276_s0 = inlined_call_operand.vmem [shape: bf16[512,128], index: 0, kind: input, shape index: {}]   ;;  %s1277_s1 = inlined_call_operand.hbm [shape: bf16[128,128], index: 1, kind: input, shape index: {}]   ;;  %s1278_s2 = inlined_call_operand.hbm [shape: f32[1,128], index: 2, kind: input, shape index: {}]   ;;  %s1279_s3 = inlined_call_operand.vmem [shape: f32[512,128], index: 3, kind: output, shape index: {}]  }
   0x1   :  { %9 = vsyncpa [#allocation5], 0  ;;  %s1073_s12 = smov 0   ;;  %s1075_s13 = smov 0  }
   0x2   :  { %s1077_s14 = smov 0  }
   0x3 LB: > { %s762_s15 = sadd.s32 4294967295, %s1047_s14   ;;  %s27_s16 = sadd.s32 1, %s1043_s13  ;;  %s1047_s14 = sphi %s1077_s14, %s15_s14   ;;  %s1043_s13 = sphi %s1075_s13, %s1289_s13   ;;  %s1039_s12 = sphi %s1073_s12, %s1288_s12  }
   0x4   : > { %p29_p0 = scmp.ge.s32.totalorder %s27_s16, 2  ;;  %p764_p1 = scmp.ge.s32.totalorder %s1047_s14, 1 }
   0x5   : > { %p138_p2 = scmp.lt.s32.totalorder %s1047_s14, 3  ;;  %p1098_p4 = scmp.eq.s32.totalorder %s762_s15, 0 }
   0x6   : > { %s1291_s16 = smov (%p29_p0, %s27_s16), 0  ;;  %s1049_s19 = smov [#allocation2]  }
   0x7   : > { %p1094_p3 = pnand %p764_p1, %p138_p2  ;;  %s152_s20 = sshll.u32 %s1049_s19, 4  ;;  %s153_s20 = int_to_ptr.vmem [resolvable:$true] %s152_s20 }
   0x8   : > { %s1284_s18 = scalar_select %p1098_p4, 1, 0 }
   0x9   : > { %s1283_s17 = scalar_select %p1094_p3, 1, 0 }
   0xa   : > { %p898_p5 = pneg %p1094_p3  ;;  %s1050_s22 = smov [#allocation4]  }
   0xb   : > { %s168_s23 = sshll.u32 %s1050_s22, 4  ;;  %s961_s26 = scalar_lea.hbm %s1277_s1, 1024  ;;  %s1110_s23 = int_to_ptr.vmem [resolvable:$true] %s168_s23 }
   0xc   : > { %p1106_p6 = pnand %p1098_p4, %p898_p5  ;;  %p962_p7 = scmp.ne.s32.totalorder %s1277_s1, %s961_s26 }
   0xd   : > { %p968_p11 = scmp.lt.u32.totalorder %s961_s26, %s1277_s1 }
   0xe   : > { %p963_p8 = pneg %p1106_p6 }
  0x10   : > { %p964_p9 = pnand %p963_p8, %p962_p7 }
  0x12   : > { %p965_p10 = pneg %p964_p9 }
  0x14   : > { %p970_p12 = pnand %p968_p11, %p965_p10 }
  0x16   : > { %973 = shalt.err (!%p970_p12)
}
  0x17   : > { %s974_s4 = scalar_lea.vmem %s153_s20, 1024  ;;  %p982_p2 = scmp.lt.s32.totalorder %s153_s20, %s153_s20 }
  0x18   : > { %p975_p13 = scmp.ne.s32.totalorder %s153_s20, %s974_s4  ;;  %p983_p5 = scmp.lt.s32.totalorder %s974_s4, %s974_s4 }
  0x1a   : > { %p977_p0 = pnand %p975_p13, %p963_p8  ;;  %p984_p4 = por %p983_p5, %p982_p2 }
  0x1c   : > { %p978_p1 = pneg %p977_p0 }
  0x1e   : > { %p985_p3 = pnand %p984_p4, %p978_p1 }
  0x20   : > { %988 = shalt.err (!%p985_p3)
}
  0x21   : > { %s1051_s5 = smov 64   ;;  %s1052_s6 = smov 4  }
  0x22   : > { %901 = dma.hbm_to_vmem [thread:$0]  (!%p1106_p6), %s1277_s1, 1024, %s153_s20, [#allocation3], %s1051_s5, %s1051_s5, %s1052_s6  }
  0x23   : > { %s989_s11 = scalar_lea.hbm %s1278_s2, 16 }
  0x24   : > { %p990_p7 = scmp.ne.s32.totalorder %s1278_s2, %s989_s11  ;;  %p996_p9 = scmp.lt.u32.totalorder %s989_s11, %s1278_s2 }
  0x26   : > { %p992_p3 = pnand %p990_p7, %p963_p8 }
  0x28   : > { %p993_p4 = pneg %p992_p3 }
  0x2a   : > { %p998_p10 = pnand %p996_p9, %p993_p4 }
  0x2c   : > { %1001 = shalt.err (!%p998_p10)
}
  0x2d   : > { %s1002_s20 = scalar_lea.vmem %s1110_s23, 16  ;;  %s1009_s25 = scalar_lea.vmem %s1110_s23, 32 }
  0x2e   : > { %p1003_p11 = scmp.ne.s32.totalorder %s1110_s23, %s1002_s20  ;;  %p1010_p0 = scmp.lt.s32.totalorder %s1110_s23, %s1110_s23 }
  0x2f   : > { %p1011_p1 = scmp.lt.s32.totalorder %s1009_s25, %s1002_s20 }
  0x30   : > { %p1005_p12 = pnand %p1003_p11, %p963_p8 }
  0x31   : > { %p1012_p2 = por %p1011_p1, %p1010_p0 }
  0x32   : > { %p1006_p13 = pneg %p1005_p12 }
  0x34   : > { %p1013_p5 = pnand %p1012_p2, %p1006_p13 }
  0x36   : > { %1016 = shalt.err (!%p1013_p5)
}
  0x37   : > { %904 = dma.hbm_to_vmem [thread:$0]  (!%p1106_p6), %s1278_s2, 16, %s1110_s23, [#allocation5]  }
  0x38   : > { %p1286_p7 = scmp.ne.s32.totalorder %s1283_s17, 0 }
  0x39   : > { %p1287_p8 = scmp.ne.s32.totalorder (!%p1286_p7), %s1284_s18, 0 }
  0x3a   : > { %190 = sbr.rel (%p1286_p7) target bundleno = 345 (0x159), region = 32 }
  0x41   : > { %1030 = dma.done.wait (%p1287_p8), [#allocation3], 1024  }
  0x42   : > { %1032 = vsyncadd (%p1287_p8), [#allocation3], 4294966272 }
  0x43   : > { %1034 = dma.done.wait (%p1287_p8), [#allocation5], 16  }
  0x44   : > { %1036 = vsyncadd (%p1287_p8), [#allocation5], 4294967280  ;;  %s771_s21 = sshll.u32 %s1039_s12, 5  ;;  %v937_v0 = vld [vmem:[#allocation2] sm:$0xff]   ;;  %v938_v1 = vld [vmem:[#allocation2 + $0x8] sm:$0xff]  }
  0x45   : > { %p222_p3 = scmp.lt.s32.totalorder %s771_s21, 63  ;;  %826 = vmatprep.subr.bf16.mxu0 %v937_v0  ;;  %874 = vmatprep.subr.bf16.mxu1 %v937_v0  ;;  %v939_v2 = vld [vmem:[#allocation2 + $0x10] sm:$0xff]   ;;  %v940_v3 = vld [vmem:[#allocation2 + $0x18] sm:$0xff]   ;;  %v941_v6 = vld [vmem:[#allocation2 + $0x20] sm:$0xff]  }
  0x46   : > { %827 = vmatpush3.bf16.msra.mxu0 %v937_v0  ;;  %882 = vmatpush3.bf16.msra.mxu1 %v937_v0  ;;  %v942_v7 = vld [vmem:[#allocation2 + $0x28] sm:$0xff]   ;;  %v943_v8 = vld [vmem:[#allocation2 + $0x30] sm:$0xff]   ;;  %v944_v9 = vld [vmem:[#allocation2 + $0x38] sm:$0xff]  }
  0x47   : > { %s1293_s21 = smov (!%p222_p3, %s771_s21), 63  ;;  %828 = vmatprep.subr.bf16.mxu0 %v938_v1  ;;  %875 = vmatprep.subr.bf16.mxu1 %v938_v1  ;;  %v1195_v24 = vld [vmem:[#allocation4] ss:$0 sm:$0xff] }
  0x48   : > { %s772_s17 = sshll.u32 %s1293_s21, 2  ;;  %s774_s12 = sshll.u32 %s1293_s21, 3 }
  0x49   : > { %s1177_s18 = scalar_lea.vmem %s1276_s0, %s772_s17  ;;  %s1203_s4 = scalar_lea.vmem %s1279_s3, %s774_s12 }
  0x4a   : > { %829 = vmatpush3.bf16.msra.mxu0 %v938_v1  ;;  %883 = vmatpush3.bf16.msra.mxu1 %v938_v1  ;;  %v945_v4 = vld [vmem:[%s1177_s18] sm:$0xff]   ;;  %v947_v10 = vld [vmem:[%s1177_s18 + $0x8] sm:$0xff]   ;;  %v949_v12 = vld [vmem:[%s1177_s18 + $0x10] sm:$0xff]  }
  0x4b   : > { %830 = vmatprep.subr.bf16.mxu0 %v939_v2  ;;  %876 = vmatprep.subr.bf16.mxu1 %v939_v2  ;;  %v946_v5 = vld [vmem:[%s1177_s18 + $0x40] sm:$0xff]   ;;  %v948_v11 = vld [vmem:[%s1177_s18 + $0x48] sm:$0xff]   ;;  %v950_v13 = vld [vmem:[%s1177_s18 + $0x50] sm:$0xff]  }
  0x4c   : > { %842 = vmatprep.mubr.bf16.mxu0 %v945_v4  ;;  %858 = vmatprep.mubr.bf16.mxu1 %v946_v5  ;;  %v951_v14 = vld [vmem:[%s1177_s18 + $0x18] sm:$0xff]   ;;  %v953_v16 = vld [vmem:[%s1177_s18 + $0x20] sm:$0xff]   ;;  %v955_v18 = vld [vmem:[%s1177_s18 + $0x28] sm:$0xff]  }
  0x4d   : > { %v952_v15 = vld [vmem:[%s1177_s18 + $0x58] sm:$0xff]   ;;  %v954_v17 = vld [vmem:[%s1177_s18 + $0x60] sm:$0xff]   ;;  %v956_v19 = vld [vmem:[%s1177_s18 + $0x68] sm:$0xff]  }
  0x4e   : > { %831 = vmatpush3.bf16.msra.mxu0 %v939_v2  ;;  %884 = vmatpush3.bf16.msra.mxu1 %v939_v2  ;;  %v957_v20 = vld [vmem:[%s1177_s18 + $0x30] sm:$0xff]   ;;  %v959_v22 = vld [vmem:[%s1177_s18 + $0x38] sm:$0xff]  }
  0x4f   : > { %832 = vmatprep.subr.bf16.mxu0 %v940_v3  ;;  %877 = vmatprep.subr.bf16.mxu1 %v940_v3  ;;  %v958_v21 = vld [vmem:[%s1177_s18 + $0x70] sm:$0xff]   ;;  %v960_v23 = vld [vmem:[%s1177_s18 + $0x78] sm:$0xff]  }
  0x52   : > { %833 = vmatpush3.bf16.msra.mxu0 %v940_v3  ;;  %885 = vmatpush3.bf16.msra.mxu1 %v940_v3 }
  0x53   : > { %834 = vmatprep.subr.bf16.mxu0 %v941_v6  ;;  %878 = vmatprep.subr.bf16.mxu1 %v941_v6 }
  0x56   : > { %835 = vmatpush3.bf16.msra.mxu0 %v941_v6  ;;  %886 = vmatpush3.bf16.msra.mxu1 %v941_v6 }
  0x57   : > { %836 = vmatprep.subr.bf16.mxu0 %v942_v7  ;;  %879 = vmatprep.subr.bf16.mxu1 %v942_v7 }
  0x5a   : > { %837 = vmatpush3.bf16.msra.mxu0 %v942_v7  ;;  %887 = vmatpush3.bf16.msra.mxu1 %v942_v7 }
  0x5b   : > { %838 = vmatprep.subr.bf16.mxu0 %v943_v8  ;;  %880 = vmatprep.subr.bf16.mxu1 %v943_v8 }
  0x5e   : > { %839 = vmatpush3.bf16.msra.mxu0 %v943_v8  ;;  %888 = vmatpush3.bf16.msra.mxu1 %v943_v8 }
  0x5f   : > { %840 = vmatprep.subr.bf16.mxu0 %v944_v9  ;;  %881 = vmatprep.subr.bf16.mxu1 %v944_v9 }
  0x62   : > { %841 = vmatpush3.bf16.msra.mxu0 %v944_v9  ;;  %889 = vmatpush3.bf16.msra.mxu1 %v944_v9 }
  0x65   : > { %843 = vmatmul.mubr.bf16.vlgmr.msra.gmra.mrb[0].mxu0 %v947_v10  ;;  %859 = vmatmul.mubr.bf16.vlgmr.msra.gmra.mrb[0].mxu1 %v948_v11 }
  0x66   : > { %846 = vmatprep.mubr.bf16.mxu0 %v949_v12  ;;  %862 = vmatprep.mubr.bf16.mxu1 %v950_v13 }
  0x6d   : > { %847 = vmatmul.mubr.bf16.gmra.mrb[4].mxu0 %v951_v14  ;;  %863 = vmatmul.mubr.bf16.gmra.mrb[4].mxu1 %v952_v15 }
  0x6e   : > { %850 = vmatprep.mubr.bf16.mxu0 %v953_v16  ;;  %866 = vmatprep.mubr.bf16.mxu1 %v954_v17 }
  0x75   : > { %851 = vmatmul.mubr.bf16.gmra.mrb[8].mxu0 %v955_v18  ;;  %867 = vmatmul.mubr.bf16.gmra.mrb[8].mxu1 %v956_v19 }
  0x76   : > { %854 = vmatprep.mubr.bf16.mxu0 %v957_v20  ;;  %870 = vmatprep.mubr.bf16.mxu1 %v958_v21 }
  0x7d   : > { %855 = vmatmul.mubr.bf16.gmra.mrb[12].mxu0 %v959_v22  ;;  %871 = vmatmul.mubr.bf16.gmra.mrb[12].mxu1 %v960_v23 }
 0x138   : > { %v844_v25 = vpop.f32.mrb[0].mxu0  ;;  %v860_v26 = vpop.f32.mrb[0].mxu1 }
 0x139   : > { %v479_v27 = vadd.f32 %v844_v25, %v1195_v24  ;;  %v543_v28 = vadd.f32 %v860_v26, %v1195_v24  ;;  %v470_v29 = vpop.f32.mrb[1].mxu0  ;;  %v534_v30 = vpop.f32.mrb[1].mxu1 }
 0x13a   : > { %v471_v31 = vadd.f32 %v1195_v24, %v470_v29  ;;  %v535_v32 = vadd.f32 %v1195_v24, %v534_v30  ;;  %v845_v33 = vpop.f32.mrb[2].mxu0  ;;  %v861_v34 = vpop.f32.mrb[2].mxu1 }
 0x13b   : > { %v599_v35 = vmax.f32 %v479_v27, 0.0  ;;  %v615_v36 = vmax.f32 %v543_v28, 0.0  ;;  %v482_v37 = vadd.f32 %v845_v33, %v1195_v24  ;;  %v546_v38 = vadd.f32 %v861_v34, %v1195_v24  ;;  %v473_v39 = vpop.f32.mrb[3].mxu0  ;;  %v537_v40 = vpop.f32.mrb[3].mxu1 }
 0x13c   : > { %v597_v41 = vmax.f32 %v471_v31, 0.0  ;;  %v613_v42 = vmax.f32 %v535_v32, 0.0  ;;  %v474_v43 = vadd.f32 %v1195_v24, %v473_v39  ;;  %v538_v44 = vadd.f32 %v1195_v24, %v537_v40 }
 0x13d   : > { %631 = vst [vmem:[%s1203_s4 + $0x10] sm:$0xff] %v599_v35  ;;  %647 = vst [vmem:[%s1203_s4 + $0x90] sm:$0xff] %v615_v36  ;;  %v600_v45 = vmax.f32 %v482_v37, 0.0  ;;  %v616_v46 = vmax.f32 %v546_v38, 0.0 }
 0x13e   : > { %629 = vst [vmem:[%s1203_s4] sm:$0xff] %v597_v41  ;;  %645 = vst [vmem:[%s1203_s4 + $0x80] sm:$0xff] %v613_v42  ;;  %v598_v47 = vmax.f32 %v474_v43, 0.0  ;;  %v614_v48 = vmax.f32 %v538_v44, 0.0 }
 0x13f   : > { %632 = vst [vmem:[%s1203_s4 + $0x18] sm:$0xff] %v600_v45  ;;  %648 = vst [vmem:[%s1203_s4 + $0x98] sm:$0xff] %v616_v46 }
 0x140   : > { %630 = vst [vmem:[%s1203_s4 + $0x8] sm:$0xff] %v598_v47  ;;  %646 = vst [vmem:[%s1203_s4 + $0x88] sm:$0xff] %v614_v48  ;;  %v848_v49 = vpop.f32.mrb[4].mxu0  ;;  %v864_v50 = vpop.f32.mrb[4].mxu1 }
 0x141   : > { %v495_v51 = vadd.f32 %v848_v49, %v1195_v24  ;;  %v559_v52 = vadd.f32 %v864_v50, %v1195_v24  ;;  %v486_v53 = vpop.f32.mrb[5].mxu0  ;;  %v550_v54 = vpop.f32.mrb[5].mxu1 }
 0x142   : > { %v487_v55 = vadd.f32 %v1195_v24, %v486_v53  ;;  %v551_v56 = vadd.f32 %v1195_v24, %v550_v54  ;;  %v849_v57 = vpop.f32.mrb[6].mxu0  ;;  %v865_v58 = vpop.f32.mrb[6].mxu1 }
 0x143   : > { %v603_v59 = vmax.f32 %v495_v51, 0.0  ;;  %v619_v60 = vmax.f32 %v559_v52, 0.0  ;;  %v498_v61 = vadd.f32 %v849_v57, %v1195_v24  ;;  %v562_v62 = vadd.f32 %v865_v58, %v1195_v24  ;;  %v489_v63 = vpop.f32.mrb[7].mxu0  ;;  %v553_v0 = vpop.f32.mrb[7].mxu1 }
 0x144   : > { %v601_v1 = vmax.f32 %v487_v55, 0.0  ;;  %v617_v2 = vmax.f32 %v551_v56, 0.0  ;;  %v490_v3 = vadd.f32 %v1195_v24, %v489_v63  ;;  %v554_v4 = vadd.f32 %v1195_v24, %v553_v0 }
 0x145   : > { %635 = vst [vmem:[%s1203_s4 + $0x30] sm:$0xff] %v603_v59  ;;  %651 = vst [vmem:[%s1203_s4 + $0xb0] sm:$0xff] %v619_v60  ;;  %v604_v5 = vmax.f32 %v498_v61, 0.0  ;;  %v620_v6 = vmax.f32 %v562_v62, 0.0 }
 0x146   : > { %633 = vst [vmem:[%s1203_s4 + $0x20] sm:$0xff] %v601_v1  ;;  %649 = vst [vmem:[%s1203_s4 + $0xa0] sm:$0xff] %v617_v2  ;;  %v602_v7 = vmax.f32 %v490_v3, 0.0  ;;  %v618_v8 = vmax.f32 %v554_v4, 0.0 }
 0x147   : > { %636 = vst [vmem:[%s1203_s4 + $0x38] sm:$0xff] %v604_v5  ;;  %652 = vst [vmem:[%s1203_s4 + $0xb8] sm:$0xff] %v620_v6 }
 0x148   : > { %634 = vst [vmem:[%s1203_s4 + $0x28] sm:$0xff] %v602_v7  ;;  %650 = vst [vmem:[%s1203_s4 + $0xa8] sm:$0xff] %v618_v8  ;;  %v852_v9 = vpop.f32.mrb[8].mxu0  ;;  %v868_v10 = vpop.f32.mrb[8].mxu1 }
 0x149   : > { %v511_v11 = vadd.f32 %v852_v9, %v1195_v24  ;;  %v575_v12 = vadd.f32 %v868_v10, %v1195_v24  ;;  %v502_v13 = vpop.f32.mrb[9].mxu0  ;;  %v566_v14 = vpop.f32.mrb[9].mxu1 }
 0x14a   : > { %v503_v15 = vadd.f32 %v1195_v24, %v502_v13  ;;  %v567_v16 = vadd.f32 %v1195_v24, %v566_v14  ;;  %v853_v17 = vpop.f32.mrb[10].mxu0  ;;  %v869_v18 = vpop.f32.mrb[10].mxu1 }
 0x14b   : > { %v607_v19 = vmax.f32 %v511_v11, 0.0  ;;  %v623_v20 = vmax.f32 %v575_v12, 0.0  ;;  %v514_v21 = vadd.f32 %v853_v17, %v1195_v24  ;;  %v578_v22 = vadd.f32 %v869_v18, %v1195_v24  ;;  %v505_v23 = vpop.f32.mrb[11].mxu0  ;;  %v569_v25 = vpop.f32.mrb[11].mxu1 }
 0x14c   : > { %v605_v26 = vmax.f32 %v503_v15, 0.0  ;;  %v621_v27 = vmax.f32 %v567_v16, 0.0  ;;  %v506_v28 = vadd.f32 %v1195_v24, %v505_v23  ;;  %v570_v29 = vadd.f32 %v1195_v24, %v569_v25 }
 0x14d   : > { %639 = vst [vmem:[%s1203_s4 + $0x50] sm:$0xff] %v607_v19  ;;  %655 = vst [vmem:[%s1203_s4 + $0xd0] sm:$0xff] %v623_v20  ;;  %v608_v30 = vmax.f32 %v514_v21, 0.0  ;;  %v624_v31 = vmax.f32 %v578_v22, 0.0 }
 0x14e   : > { %637 = vst [vmem:[%s1203_s4 + $0x40] sm:$0xff] %v605_v26  ;;  %653 = vst [vmem:[%s1203_s4 + $0xc0] sm:$0xff] %v621_v27  ;;  %v606_v32 = vmax.f32 %v506_v28, 0.0  ;;  %v622_v33 = vmax.f32 %v570_v29, 0.0 }
 0x14f   : > { %640 = vst [vmem:[%s1203_s4 + $0x58] sm:$0xff] %v608_v30  ;;  %656 = vst [vmem:[%s1203_s4 + $0xd8] sm:$0xff] %v624_v31 }
 0x150   : > { %638 = vst [vmem:[%s1203_s4 + $0x48] sm:$0xff] %v606_v32  ;;  %654 = vst [vmem:[%s1203_s4 + $0xc8] sm:$0xff] %v622_v33  ;;  %v856_v34 = vpop.f32.mrb[12].mxu0  ;;  %v872_v35 = vpop.f32.mrb[12].mxu1 }
 0x151   : > { %v527_v36 = vadd.f32 %v856_v34, %v1195_v24  ;;  %v591_v37 = vadd.f32 %v872_v35, %v1195_v24  ;;  %v518_v38 = vpop.f32.mrb[13].mxu0  ;;  %v582_v39 = vpop.f32.mrb[13].mxu1 }
 0x152   : > { %v519_v40 = vadd.f32 %v1195_v24, %v518_v38  ;;  %v583_v41 = vadd.f32 %v1195_v24, %v582_v39  ;;  %v857_v42 = vpop.f32.mrb[14].mxu0  ;;  %v873_v43 = vpop.f32.mrb[14].mxu1 }
 0x153   : > { %v611_v44 = vmax.f32 %v527_v36, 0.0  ;;  %v627_v45 = vmax.f32 %v591_v37, 0.0  ;;  %v530_v46 = vadd.f32 %v857_v42, %v1195_v24  ;;  %v594_v47 = vadd.f32 %v873_v43, %v1195_v24  ;;  %v521_v48 = vpop.f32.mrb[15].mxu0  ;;  %v585_v49 = vpop.f32.mrb[15].mxu1 }
 0x154   : > { %v609_v50 = vmax.f32 %v519_v40, 0.0  ;;  %v625_v51 = vmax.f32 %v583_v41, 0.0  ;;  %v522_v52 = vadd.f32 %v1195_v24, %v521_v48  ;;  %v586_v53 = vadd.f32 %v1195_v24, %v585_v49 }
 0x155   : > { %643 = vst [vmem:[%s1203_s4 + $0x70] sm:$0xff] %v611_v44  ;;  %659 = vst [vmem:[%s1203_s4 + $0xf0] sm:$0xff] %v627_v45  ;;  %v612_v54 = vmax.f32 %v530_v46, 0.0  ;;  %v628_v55 = vmax.f32 %v594_v47, 0.0 }
 0x156   : > { %641 = vst [vmem:[%s1203_s4 + $0x60] sm:$0xff] %v609_v50  ;;  %657 = vst [vmem:[%s1203_s4 + $0xe0] sm:$0xff] %v625_v51  ;;  %v610_v56 = vmax.f32 %v522_v52, 0.0  ;;  %v626_v57 = vmax.f32 %v586_v53, 0.0 }
 0x157   : > { %644 = vst [vmem:[%s1203_s4 + $0x78] sm:$0xff] %v612_v54  ;;  %660 = vst [vmem:[%s1203_s4 + $0xf8] sm:$0xff] %v628_v55 }
 0x158   : > { %642 = vst [vmem:[%s1203_s4 + $0x68] sm:$0xff] %v610_v56  ;;  %658 = vst [vmem:[%s1203_s4 + $0xe8] sm:$0xff] %v626_v57 }
 0x159 PF: > { %s15_s14 = sadd.s32 1, %s1047_s14   ;;  %s1288_s12 = smov %s1043_s13 }
 0x15a   : > { %p12_p6 = scmp.ge.s32.totalorder %s15_s14, 4   ;;  %s1289_s13 = smov %s1291_s16 }
 0x15c   :  { %14 = sbr.rel (!%p12_p6) target bundleno = 3 (0x3), region = 73 }
 0x163   :  { %689 = vsyncpa [#allocation3], 1 }
 0x164   :  { %691 = vsyncpa [#allocation3 + $0x1], 1 }
 0x165   :  { %692 = vsyncpa [#allocation5], 1 }

// kernel: forward.8
= control target key start
LH: loop header
LB: loop body
LE: loop exit
PB: predicated region body
PF: predicated region fallthrough
CT: control target
= control target key end

     0   :  { %8 = vsyncpa [#allocation3], 0  ;;  %s1532_s0 = inlined_call_operand.vmem [shape: bf16[512,256], index: 0, kind: input, shape index: {}]   ;;  %s1533_s1 = inlined_call_operand.hbm [shape: bf16[256,128], index: 1, kind: input, shape index: {}]   ;;  %s1534_s2 = inlined_call_operand.hbm [shape: f32[1,128], index: 2, kind: input, shape index: {}]   ;;  %s1535_s3 = inlined_call_operand.vmem [shape: f32[512,128], index: 3, kind: output, shape index: {}]  }
   0x1   :  { %9 = vsyncpa [#allocation5], 0  ;;  %s1310_s12 = smov 0   ;;  %s1312_s13 = smov 0  }
   0x2   :  { %s1314_s14 = smov 0  }
   0x3 LB: > { %s893_s15 = sadd.s32 4294967295, %s1284_s14   ;;  %s27_s16 = sadd.s32 1, %s1280_s13  ;;  %s1284_s14 = sphi %s1314_s14, %s15_s14   ;;  %s1280_s13 = sphi %s1312_s13, %s1545_s13   ;;  %s1276_s12 = sphi %s1310_s12, %s1544_s12  }
   0x4   : > { %p29_p0 = scmp.ge.s32.totalorder %s27_s16, 2  ;;  %p895_p1 = scmp.ge.s32.totalorder %s1284_s14, 1 }
   0x5   : > { %p138_p2 = scmp.lt.s32.totalorder %s1284_s14, 3  ;;  %p1335_p4 = scmp.eq.s32.totalorder %s893_s15, 0 }
   0x6   : > { %s1547_s16 = smov (%p29_p0, %s27_s16), 0  ;;  %s1286_s19 = smov [#allocation2]  }
   0x7   : > { %p1331_p3 = pnand %p895_p1, %p138_p2  ;;  %s152_s20 = sshll.u32 %s1286_s19, 4  ;;  %s153_s20 = int_to_ptr.vmem [resolvable:$true] %s152_s20 }
   0x8   : > { %s1540_s18 = scalar_select %p1335_p4, 1, 0 }
   0x9   : > { %s1539_s17 = scalar_select %p1331_p3, 1, 0 }
   0xa   : > { %p1095_p5 = pneg %p1331_p3  ;;  %s1287_s22 = smov [#allocation4]  }
   0xb   : > { %s168_s23 = sshll.u32 %s1287_s22, 4  ;;  %s1198_s26 = scalar_lea.hbm %s1533_s1, 2048  ;;  %s1347_s23 = int_to_ptr.vmem [resolvable:$true] %s168_s23 }
   0xc   : > { %p1343_p6 = pnand %p1335_p4, %p1095_p5  ;;  %p1199_p7 = scmp.ne.s32.totalorder %s1533_s1, %s1198_s26 }
   0xd   : > { %p1205_p11 = scmp.lt.u32.totalorder %s1198_s26, %s1533_s1 }
   0xe   : > { %p1200_p8 = pneg %p1343_p6 }
  0x10   : > { %p1201_p9 = pnand %p1200_p8, %p1199_p7 }
  0x12   : > { %p1202_p10 = pneg %p1201_p9 }
  0x14   : > { %p1207_p12 = pnand %p1205_p11, %p1202_p10 }
  0x16   : > { %1210 = shalt.err (!%p1207_p12)
}
  0x17   : > { %s1211_s4 = scalar_lea.vmem %s153_s20, 2048  ;;  %p1219_p2 = scmp.lt.s32.totalorder %s153_s20, %s153_s20 }
  0x18   : > { %p1212_p13 = scmp.ne.s32.totalorder %s153_s20, %s1211_s4  ;;  %p1220_p5 = scmp.lt.s32.totalorder %s1211_s4, %s1211_s4 }
  0x1a   : > { %p1214_p0 = pnand %p1212_p13, %p1200_p8  ;;  %p1221_p4 = por %p1220_p5, %p1219_p2 }
  0x1c   : > { %p1215_p1 = pneg %p1214_p0 }
  0x1e   : > { %p1222_p3 = pnand %p1221_p4, %p1215_p1 }
  0x20   : > { %1225 = shalt.err (!%p1222_p3)
}
  0x21   : > { %s1288_s5 = smov 64   ;;  %s1289_s6 = smov 4  }
  0x22   : > { %1098 = dma.hbm_to_vmem [thread:$0]  (!%p1343_p6), %s1533_s1, 2048, %s153_s20, [#allocation3], %s1288_s5, %s1288_s5, %s1289_s6  }
  0x23   : > { %s1226_s11 = scalar_lea.hbm %s1534_s2, 16 }
  0x24   : > { %p1227_p7 = scmp.ne.s32.totalorder %s1534_s2, %s1226_s11  ;;  %p1233_p9 = scmp.lt.u32.totalorder %s1226_s11, %s1534_s2 }
  0x26   : > { %p1229_p3 = pnand %p1227_p7, %p1200_p8 }
  0x28   : > { %p1230_p4 = pneg %p1229_p3 }
  0x2a   : > { %p1235_p10 = pnand %p1233_p9, %p1230_p4 }
  0x2c   : > { %1238 = shalt.err (!%p1235_p10)
}
  0x2d   : > { %s1239_s20 = scalar_lea.vmem %s1347_s23, 16  ;;  %s1246_s25 = scalar_lea.vmem %s1347_s23, 32 }
  0x2e   : > { %p1240_p11 = scmp.ne.s32.totalorder %s1347_s23, %s1239_s20  ;;  %p1247_p0 = scmp.lt.s32.totalorder %s1347_s23, %s1347_s23 }
  0x2f   : > { %p1248_p1 = scmp.lt.s32.totalorder %s1246_s25, %s1239_s20 }
  0x30   : > { %p1242_p12 = pnand %p1240_p11, %p1200_p8 }
  0x31   : > { %p1249_p2 = por %p1248_p1, %p1247_p0 }
  0x32   : > { %p1243_p13 = pneg %p1242_p12 }
  0x34   : > { %p1250_p5 = pnand %p1249_p2, %p1243_p13 }
  0x36   : > { %1253 = shalt.err (!%p1250_p5)
}
  0x37   : > { %1101 = dma.hbm_to_vmem [thread:$0]  (!%p1343_p6), %s1534_s2, 16, %s1347_s23, [#allocation5]  }
  0x38   : > { %p1542_p7 = scmp.ne.s32.totalorder %s1539_s17, 0 }
  0x39   : > { %p1543_p8 = scmp.ne.s32.totalorder (!%p1542_p7), %s1540_s18, 0 }
  0x3a   : > { %191 = sbr.rel (%p1542_p7) target bundleno = 379 (0x17b), region = 32 }
  0x41   : > { %1267 = dma.done.wait (%p1543_p8), [#allocation3], 2048  }
  0x42   : > { %1269 = vsyncadd (%p1543_p8), [#allocation3], 4294965248 }
  0x43   : > { %1271 = dma.done.wait (%p1543_p8), [#allocation5], 16  }
  0x44   : > { %1273 = vsyncadd (%p1543_p8), [#allocation5], 4294967280  ;;  %v1134_v0 = vld [vmem:[#allocation2 + $0x40] sm:$0xff]   ;;  %s902_s21 = sshll.u32 %s1276_s12, 5  ;;  %v1136_v2 = vld [vmem:[#allocation2 + $0x48] sm:$0xff]  }
  0x45   : > { %v1135_v1 = vld [vmem:[#allocation2] sm:$0xff]   ;;  %959 = vmatprep.subr.bf16.mxu0 %v1134_v0  ;;  %1071 = vmatprep.subr.bf16.mxu1 %v1134_v0  ;;  %v1137_v3 = vld [vmem:[#allocation2 + $0x8] sm:$0xff]   ;;  %p224_p6 = scmp.lt.s32.totalorder %s902_s21, 63  ;;  %v1138_v4 = vld [vmem:[#allocation2 + $0x50] sm:$0xff]  }
  0x46   : > { %960 = vmatpush3.bf16.msra.mxu0 %v1135_v1  ;;  %1079 = vmatpush3.bf16.msra.mxu1 %v1135_v1  ;;  %v1139_v5 = vld [vmem:[#allocation2 + $0x10] sm:$0xff]   ;;  %v1140_v6 = vld [vmem:[#allocation2 + $0x58] sm:$0xff]   ;;  %v1142_v8 = vld [vmem:[#allocation2 + $0x60] sm:$0xff]  }
  0x47   : > { %961 = vmatprep.subr.bf16.mxu0 %v1136_v2  ;;  %1072 = vmatprep.subr.bf16.mxu1 %v1136_v2  ;;  %s1549_s21 = smov (!%p224_p6, %s902_s21), 63  ;;  %v1141_v7 = vld [vmem:[#allocation2 + $0x18] sm:$0xff]   ;;  %v1143_v9 = vld [vmem:[#allocation2 + $0x20] sm:$0xff]   ;;  %v1144_v10 = vld [vmem:[#allocation2 + $0x68] sm:$0xff]  }
  0x48   : > { %s958_s12 = sshll.u32 %s1549_s21, 3  ;;  %v1145_v13 = vld [vmem:[#allocation2 + $0x28] sm:$0xff]   ;;  %v1146_v14 = vld [vmem:[#allocation2 + $0x70] sm:$0xff]   ;;  %v1148_v16 = vld [vmem:[#allocation2 + $0x78] sm:$0xff]  }
  0x49   : > { %s1416_s23 = scalar_lea.vmem %s1532_s0, %s958_s12  ;;  %v1147_v15 = vld [vmem:[#allocation2 + $0x30] sm:$0xff]   ;;  %v1149_v17 = vld [vmem:[#allocation2 + $0x38] sm:$0xff]   ;;  %v1450_v50 = vld [vmem:[#allocation4] ss:$0 sm:$0xff]  ;;  %s1459_s30 = scalar_lea.vmem %s1535_s3, %s958_s12 }
  0x4a   : > { %962 = vmatpush3.bf16.msra.mxu0 %v1137_v3  ;;  %1080 = vmatpush3.bf16.msra.mxu1 %v1137_v3  ;;  %v1152_v11 = vld [vmem:[%s1416_s23 + $0x4] ss:$8 sps:$4 sm:$0xff]   ;;  %v1150_v18 = vld [vmem:[%s1416_s23] ss:$8 sps:$4 sm:$0xff]   ;;  %v1156_v20 = vld [vmem:[%s1416_s23 + $0x14] ss:$8 sps:$4 sm:$0xff]  }
  0x4b   : > { %963 = vmatprep.subr.bf16.mxu0 %v1138_v4  ;;  %1073 = vmatprep.subr.bf16.mxu1 %v1138_v4  ;;  %v1155_v12 = vld [vmem:[%s1416_s23 + $0x84] ss:$8 sps:$4 sm:$0xff]   ;;  %v1153_v19 = vld [vmem:[%s1416_s23 + $0x80] ss:$8 sps:$4 sm:$0xff]   ;;  %v1158_v21 = vld [vmem:[%s1416_s23 + $0x94] ss:$8 sps:$4 sm:$0xff]  }
  0x4c   : > { %599 = vmatprep.mubr.bf16.mxu0 %v1152_v11  ;;  %663 = vmatprep.mubr.bf16.mxu1 %v1155_v12  ;;  %v1160_v22 = vld [vmem:[%s1416_s23 + $0x10] ss:$8 sps:$4 sm:$0xff]   ;;  %v1162_v24 = vld [vmem:[%s1416_s23 + $0x24] ss:$8 sps:$4 sm:$0xff]   ;;  %v1166_v26 = vld [vmem:[%s1416_s23 + $0x20] ss:$8 sps:$4 sm:$0xff]  }
  0x4d   : > { %v1161_v23 = vld [vmem:[%s1416_s23 + $0x90] ss:$8 sps:$4 sm:$0xff]   ;;  %v1164_v25 = vld [vmem:[%s1416_s23 + $0xa4] ss:$8 sps:$4 sm:$0xff]   ;;  %v1167_v27 = vld [vmem:[%s1416_s23 + $0xa0] ss:$8 sps:$4 sm:$0xff]  }
  0x4e   : > { %964 = vmatpush3.bf16.msra.mxu0 %v1139_v5  ;;  %1081 = vmatpush3.bf16.msra.mxu1 %v1139_v5  ;;  %v1168_v28 = vld [vmem:[%s1416_s23 + $0x34] ss:$8 sps:$4 sm:$0xff]   ;;  %v1172_v30 = vld [vmem:[%s1416_s23 + $0x30] ss:$8 sps:$4 sm:$0xff]   ;;  %v1174_v32 = vld [vmem:[%s1416_s23 + $0x44] ss:$8 sps:$4 sm:$0xff]  }
  0x4f   : > { %965 = vmatprep.subr.bf16.mxu0 %v1140_v6  ;;  %1074 = vmatprep.subr.bf16.mxu1 %v1140_v6  ;;  %v1170_v29 = vld [vmem:[%s1416_s23 + $0xb4] ss:$8 sps:$4 sm:$0xff]   ;;  %v1173_v31 = vld [vmem:[%s1416_s23 + $0xb0] ss:$8 sps:$4 sm:$0xff]   ;;  %v1176_v33 = vld [vmem:[%s1416_s23 + $0xc4] ss:$8 sps:$4 sm:$0xff]  }
  0x50   : > { %v1178_v34 = vld [vmem:[%s1416_s23 + $0x40] ss:$8 sps:$4 sm:$0xff]   ;;  %v1180_v36 = vld [vmem:[%s1416_s23 + $0x54] ss:$8 sps:$4 sm:$0xff]   ;;  %v1184_v38 = vld [vmem:[%s1416_s23 + $0x50] ss:$8 sps:$4 sm:$0xff]  }
  0x51   : > { %v1179_v35 = vld [vmem:[%s1416_s23 + $0xc0] ss:$8 sps:$4 sm:$0xff]   ;;  %v1182_v37 = vld [vmem:[%s1416_s23 + $0xd4] ss:$8 sps:$4 sm:$0xff]   ;;  %v1185_v39 = vld [vmem:[%s1416_s23 + $0xd0] ss:$8 sps:$4 sm:$0xff]  }
  0x52   : > { %966 = vmatpush3.bf16.msra.mxu0 %v1141_v7  ;;  %1082 = vmatpush3.bf16.msra.mxu1 %v1141_v7  ;;  %v1186_v40 = vld [vmem:[%s1416_s23 + $0x64] ss:$8 sps:$4 sm:$0xff]   ;;  %v1190_v42 = vld [vmem:[%s1416_s23 + $0x60] ss:$8 sps:$4 sm:$0xff]   ;;  %v1192_v44 = vld [vmem:[%s1416_s23 + $0x74] ss:$8 sps:$4 sm:$0xff]  }
  0x53   : > { %967 = vmatprep.subr.bf16.mxu0 %v1142_v8  ;;  %1075 = vmatprep.subr.bf16.mxu1 %v1142_v8  ;;  %v1188_v41 = vld [vmem:[%s1416_s23 + $0xe4] ss:$8 sps:$4 sm:$0xff]   ;;  %v1191_v43 = vld [vmem:[%s1416_s23 + $0xe0] ss:$8 sps:$4 sm:$0xff]   ;;  %v1194_v45 = vld [vmem:[%s1416_s23 + $0xf4] ss:$8 sps:$4 sm:$0xff]  }
  0x54   : > { %v1196_v46 = vld [vmem:[%s1416_s23 + $0x70] ss:$8 sps:$4 sm:$0xff]  }
  0x55   : > { %v1197_v47 = vld [vmem:[%s1416_s23 + $0xf0] ss:$8 sps:$4 sm:$0xff]  }
  0x56   : > { %968 = vmatpush3.bf16.msra.mxu0 %v1143_v9  ;;  %1083 = vmatpush3.bf16.msra.mxu1 %v1143_v9 }
  0x57   : > { %969 = vmatprep.subr.bf16.mxu0 %v1144_v10  ;;  %1076 = vmatprep.subr.bf16.mxu1 %v1144_v10 }
  0x5a   : > { %970 = vmatpush3.bf16.msra.mxu0 %v1145_v13  ;;  %1084 = vmatpush3.bf16.msra.mxu1 %v1145_v13 }
  0x5b   : > { %971 = vmatprep.subr.bf16.mxu0 %v1146_v14  ;;  %1077 = vmatprep.subr.bf16.mxu1 %v1146_v14 }
  0x5e   : > { %972 = vmatpush3.bf16.msra.mxu0 %v1147_v15  ;;  %1085 = vmatpush3.bf16.msra.mxu1 %v1147_v15 }
  0x5f   : > { %973 = vmatprep.subr.bf16.mxu0 %v1148_v16  ;;  %1078 = vmatprep.subr.bf16.mxu1 %v1148_v16 }
  0x62   : > { %974 = vmatpush3.bf16.msra.mxu0 %v1149_v17  ;;  %1086 = vmatpush3.bf16.msra.mxu1 %v1149_v17 }
  0x65   : > { %600 = vmatmul.mubr.bf16.vlgmr.msra.gmra.mrb[0].mxu0 %v1150_v18  ;;  %664 = vmatmul.mubr.bf16.vlgmr.msra.gmra.mrb[0].mxu1 %v1153_v19 }
  0x66   : > { %607 = vmatprep.mubr.bf16.mxu0 %v1156_v20  ;;  %671 = vmatprep.mubr.bf16.mxu1 %v1158_v21 }
  0x6d   : > { %608 = vmatmul.mubr.bf16.gmra.mrb[4].mxu0 %v1160_v22  ;;  %672 = vmatmul.mubr.bf16.gmra.mrb[4].mxu1 %v1161_v23 }
  0x6e   : > { %615 = vmatprep.mubr.bf16.mxu0 %v1162_v24  ;;  %679 = vmatprep.mubr.bf16.mxu1 %v1164_v25 }
  0x75   : > { %616 = vmatmul.mubr.bf16.gmra.mrb[8].mxu0 %v1166_v26  ;;  %680 = vmatmul.mubr.bf16.gmra.mrb[8].mxu1 %v1167_v27 }
  0x76   : > { %623 = vmatprep.mubr.bf16.mxu0 %v1168_v28  ;;  %687 = vmatprep.mubr.bf16.mxu1 %v1170_v29 }
  0x7d   : > { %624 = vmatmul.mubr.bf16.gmra.mrb[12].mxu0 %v1172_v30  ;;  %688 = vmatmul.mubr.bf16.gmra.mrb[12].mxu1 %v1173_v31 }
  0x7e   : > { %631 = vmatprep.mubr.bf16.mxu0 %v1174_v32  ;;  %695 = vmatprep.mubr.bf16.mxu1 %v1176_v33 }
  0x85   : > { %632 = vmatmul.mubr.bf16.gmra.mrb[16].mxu0 %v1178_v34  ;;  %696 = vmatmul.mubr.bf16.gmra.mrb[16].mxu1 %v1179_v35 }
  0x86   : > { %639 = vmatprep.mubr.bf16.mxu0 %v1180_v36  ;;  %703 = vmatprep.mubr.bf16.mxu1 %v1182_v37 }
  0x8d   : > { %640 = vmatmul.mubr.bf16.gmra.mrb[20].mxu0 %v1184_v38  ;;  %704 = vmatmul.mubr.bf16.gmra.mrb[20].mxu1 %v1185_v39 }
  0x8e   : > { %647 = vmatprep.mubr.bf16.mxu0 %v1186_v40  ;;  %711 = vmatprep.mubr.bf16.mxu1 %v1188_v41 }
  0x95   : > { %648 = vmatmul.mubr.bf16.gmra.mrb[24].mxu0 %v1190_v42  ;;  %712 = vmatmul.mubr.bf16.gmra.mrb[24].mxu1 %v1191_v43 }
  0x96   : > { %655 = vmatprep.mubr.bf16.mxu0 %v1192_v44  ;;  %719 = vmatprep.mubr.bf16.mxu1 %v1194_v45 }
  0x9d   : > { %656 = vmatmul.mubr.bf16.gmra.mrb[28].mxu0 %v1196_v46  ;;  %720 = vmatmul.mubr.bf16.gmra.mrb[28].mxu1 %v1197_v47 }
 0x138   : > { %v975_v48 = vpop.f32.mrb[0].mxu0  ;;  %v1023_v49 = vpop.f32.mrb[0].mxu1 }
 0x139   : > { %v976_v51 = vpop.f32.mrb[1].mxu0  ;;  %v1024_v52 = vpop.f32.mrb[1].mxu1 }
 0x13a   : > { %v977_v53 = vadd.f32 %v976_v51, %v975_v48  ;;  %v1025_v54 = vadd.f32 %v1024_v52, %v1023_v49  ;;  %v978_v55 = vpop.f32.mrb[2].mxu0  ;;  %v1026_v56 = vpop.f32.mrb[2].mxu1 }
 0x13b   : > { %v979_v57 = vpop.f32.mrb[3].mxu0  ;;  %v1027_v58 = vpop.f32.mrb[3].mxu1 }
 0x13c   : > { %v602_v59 = vadd.f32 %v977_v53, %v1450_v50  ;;  %v666_v60 = vadd.f32 %v1025_v54, %v1450_v50  ;;  %v980_v61 = vadd.f32 %v979_v57, %v978_v55  ;;  %v1028_v62 = vadd.f32 %v1027_v58, %v1026_v56 }
 0x13e   : > { %v728_v63 = vmax.f32 %v602_v59, 0.0  ;;  %v744_v0 = vmax.f32 %v666_v60, 0.0  ;;  %v605_v1 = vadd.f32 %v980_v61, %v1450_v50  ;;  %v669_v2 = vadd.f32 %v1028_v62, %v1450_v50 }
 0x140   : > { %760 = vst [vmem:[%s1459_s30] sm:$0xff] %v728_v63  ;;  %776 = vst [vmem:[%s1459_s30 + $0x80] sm:$0xff] %v744_v0  ;;  %v729_v3 = vmax.f32 %v605_v1, 0.0  ;;  %v745_v4 = vmax.f32 %v669_v2, 0.0  ;;  %v981_v5 = vpop.f32.mrb[4].mxu0  ;;  %v1029_v6 = vpop.f32.mrb[4].mxu1 }
 0x141   : > { %v982_v7 = vpop.f32.mrb[5].mxu0  ;;  %v1030_v8 = vpop.f32.mrb[5].mxu1 }
 0x142   : > { %761 = vst [vmem:[%s1459_s30 + $0x8] sm:$0xff] %v729_v3  ;;  %777 = vst [vmem:[%s1459_s30 + $0x88] sm:$0xff] %v745_v4  ;;  %v983_v9 = vadd.f32 %v982_v7, %v981_v5  ;;  %v1031_v10 = vadd.f32 %v1030_v8, %v1029_v6  ;;  %v984_v11 = vpop.f32.mrb[6].mxu0  ;;  %v1032_v12 = vpop.f32.mrb[6].mxu1 }
 0x143   : > { %v985_v13 = vpop.f32.mrb[7].mxu0  ;;  %v1033_v14 = vpop.f32.mrb[7].mxu1 }
 0x144   : > { %v610_v15 = vadd.f32 %v983_v9, %v1450_v50  ;;  %v674_v16 = vadd.f32 %v1031_v10, %v1450_v50  ;;  %v986_v17 = vadd.f32 %v985_v13, %v984_v11  ;;  %v1034_v18 = vadd.f32 %v1033_v14, %v1032_v12 }
 0x146   : > { %v730_v19 = vmax.f32 %v610_v15, 0.0  ;;  %v746_v20 = vmax.f32 %v674_v16, 0.0  ;;  %v613_v21 = vadd.f32 %v986_v17, %v1450_v50  ;;  %v677_v22 = vadd.f32 %v1034_v18, %v1450_v50 }
 0x148   : > { %762 = vst [vmem:[%s1459_s30 + $0x10] sm:$0xff] %v730_v19  ;;  %778 = vst [vmem:[%s1459_s30 + $0x90] sm:$0xff] %v746_v20  ;;  %v731_v23 = vmax.f32 %v613_v21, 0.0  ;;  %v747_v24 = vmax.f32 %v677_v22, 0.0  ;;  %v987_v25 = vpop.f32.mrb[8].mxu0  ;;  %v1035_v26 = vpop.f32.mrb[8].mxu1 }
 0x149   : > { %v988_v27 = vpop.f32.mrb[9].mxu0  ;;  %v1036_v28 = vpop.f32.mrb[9].mxu1 }
 0x14a   : > { %763 = vst [vmem:[%s1459_s30 + $0x18] sm:$0xff] %v731_v23  ;;  %779 = vst [vmem:[%s1459_s30 + $0x98] sm:$0xff] %v747_v24  ;;  %v989_v29 = vadd.f32 %v988_v27, %v987_v25  ;;  %v1037_v30 = vadd.f32 %v1036_v28, %v1035_v26  ;;  %v990_v31 = vpop.f32.mrb[10].mxu0  ;;  %v1038_v32 = vpop.f32.mrb[10].mxu1 }
 0x14b   : > { %v991_v33 = vpop.f32.mrb[11].mxu0  ;;  %v1039_v34 = vpop.f32.mrb[11].mxu1 }
 0x14c   : > { %v618_v35 = vadd.f32 %v989_v29, %v1450_v50  ;;  %v682_v36 = vadd.f32 %v1037_v30, %v1450_v50  ;;  %v992_v37 = vadd.f32 %v991_v33, %v990_v31  ;;  %v1040_v38 = vadd.f32 %v1039_v34, %v1038_v32 }
 0x14e   : > { %v732_v39 = vmax.f32 %v618_v35, 0.0  ;;  %v748_v40 = vmax.f32 %v682_v36, 0.0  ;;  %v621_v41 = vadd.f32 %v992_v37, %v1450_v50  ;;  %v685_v42 = vadd.f32 %v1040_v38, %v1450_v50 }
 0x150   : > { %764 = vst [vmem:[%s1459_s30 + $0x20] sm:$0xff] %v732_v39  ;;  %780 = vst [vmem:[%s1459_s30 + $0xa0] sm:$0xff] %v748_v40  ;;  %v733_v43 = vmax.f32 %v621_v41, 0.0  ;;  %v749_v44 = vmax.f32 %v685_v42, 0.0  ;;  %v993_v45 = vpop.f32.mrb[12].mxu0  ;;  %v1041_v46 = vpop.f32.mrb[12].mxu1 }
 0x151   : > { %v994_v47 = vpop.f32.mrb[13].mxu0  ;;  %v1042_v48 = vpop.f32.mrb[13].mxu1 }
 0x152   : > { %765 = vst [vmem:[%s1459_s30 + $0x28] sm:$0xff] %v733_v43  ;;  %781 = vst [vmem:[%s1459_s30 + $0xa8] sm:$0xff] %v749_v44  ;;  %v995_v49 = vadd.f32 %v994_v47, %v993_v45  ;;  %v1043_v51 = vadd.f32 %v1042_v48, %v1041_v46  ;;  %v996_v52 = vpop.f32.mrb[14].mxu0  ;;  %v1044_v53 = vpop.f32.mrb[14].mxu1 }
 0x153   : > { %v997_v54 = vpop.f32.mrb[15].mxu0  ;;  %v1045_v55 = vpop.f32.mrb[15].mxu1 }
 0x154   : > { %v626_v56 = vadd.f32 %v995_v49, %v1450_v50  ;;  %v690_v57 = vadd.f32 %v1043_v51, %v1450_v50  ;;  %v998_v58 = vadd.f32 %v997_v54, %v996_v52  ;;  %v1046_v59 = vadd.f32 %v1045_v55, %v1044_v53 }
 0x156   : > { %v734_v60 = vmax.f32 %v626_v56, 0.0  ;;  %v750_v61 = vmax.f32 %v690_v57, 0.0  ;;  %v629_v62 = vadd.f32 %v998_v58, %v1450_v50  ;;  %v693_v63 = vadd.f32 %v1046_v59, %v1450_v50 }
 0x158   : > { %766 = vst [vmem:[%s1459_s30 + $0x30] sm:$0xff] %v734_v60  ;;  %782 = vst [vmem:[%s1459_s30 + $0xb0] sm:$0xff] %v750_v61  ;;  %v735_v0 = vmax.f32 %v629_v62, 0.0  ;;  %v751_v1 = vmax.f32 %v693_v63, 0.0  ;;  %v999_v2 = vpop.f32.mrb[16].mxu0  ;;  %v1047_v3 = vpop.f32.mrb[16].mxu1 }
 0x159   : > { %v1000_v4 = vpop.f32.mrb[17].mxu0  ;;  %v1048_v5 = vpop.f32.mrb[17].mxu1 }
 0x15a   : > { %767 = vst [vmem:[%s1459_s30 + $0x38] sm:$0xff] %v735_v0  ;;  %783 = vst [vmem:[%s1459_s30 + $0xb8] sm:$0xff] %v751_v1  ;;  %v1001_v6 = vadd.f32 %v1000_v4, %v999_v2  ;;  %v1049_v7 = vadd.f32 %v1048_v5, %v1047_v3  ;;  %v1002_v8 = vpop.f32.mrb[18].mxu0  ;;  %v1050_v9 = vpop.f32.mrb[18].mxu1 }
 0x15b   : > { %v1003_v10 = vpop.f32.mrb[19].mxu0  ;;  %v1051_v11 = vpop.f32.mrb[19].mxu1 }
 0x15c   : > { %v634_v12 = vadd.f32 %v1001_v6, %v1450_v50  ;;  %v698_v13 = vadd.f32 %v1049_v7, %v1450_v50  ;;  %v1004_v14 = vadd.f32 %v1003_v10, %v1002_v8  ;;  %v1052_v15 = vadd.f32 %v1051_v11, %v1050_v9 }
 0x15e   : > { %v736_v16 = vmax.f32 %v634_v12, 0.0  ;;  %v752_v17 = vmax.f32 %v698_v13, 0.0  ;;  %v637_v18 = vadd.f32 %v1004_v14, %v1450_v50  ;;  %v701_v19 = vadd.f32 %v1052_v15, %v1450_v50 }
 0x160   : > { %768 = vst [vmem:[%s1459_s30 + $0x40] sm:$0xff] %v736_v16  ;;  %784 = vst [vmem:[%s1459_s30 + $0xc0] sm:$0xff] %v752_v17  ;;  %v737_v20 = vmax.f32 %v637_v18, 0.0  ;;  %v753_v21 = vmax.f32 %v701_v19, 0.0  ;;  %v1005_v22 = vpop.f32.mrb[20].mxu0  ;;  %v1053_v23 = vpop.f32.mrb[20].mxu1 }
 0x161   : > { %v1006_v24 = vpop.f32.mrb[21].mxu0  ;;  %v1054_v25 = vpop.f32.mrb[21].mxu1 }
 0x162   : > { %769 = vst [vmem:[%s1459_s30 + $0x48] sm:$0xff] %v737_v20  ;;  %785 = vst [vmem:[%s1459_s30 + $0xc8] sm:$0xff] %v753_v21  ;;  %v1007_v26 = vadd.f32 %v1006_v24, %v1005_v22  ;;  %v1055_v27 = vadd.f32 %v1054_v25, %v1053_v23  ;;  %v1008_v28 = vpop.f32.mrb[22].mxu0  ;;  %v1056_v29 = vpop.f32.mrb[22].mxu1 }
 0x163   : > { %v1009_v30 = vpop.f32.mrb[23].mxu0  ;;  %v1057_v31 = vpop.f32.mrb[23].mxu1 }
 0x164   : > { %v642_v32 = vadd.f32 %v1007_v26, %v1450_v50  ;;  %v706_v33 = vadd.f32 %v1055_v27, %v1450_v50  ;;  %v1010_v34 = vadd.f32 %v1009_v30, %v1008_v28  ;;  %v1058_v35 = vadd.f32 %v1057_v31, %v1056_v29 }
 0x166   : > { %v738_v36 = vmax.f32 %v642_v32, 0.0  ;;  %v754_v37 = vmax.f32 %v706_v33, 0.0  ;;  %v645_v38 = vadd.f32 %v1010_v34, %v1450_v50  ;;  %v709_v39 = vadd.f32 %v1058_v35, %v1450_v50 }
 0x168   : > { %770 = vst [vmem:[%s1459_s30 + $0x50] sm:$0xff] %v738_v36  ;;  %786 = vst [vmem:[%s1459_s30 + $0xd0] sm:$0xff] %v754_v37  ;;  %v739_v40 = vmax.f32 %v645_v38, 0.0  ;;  %v755_v41 = vmax.f32 %v709_v39, 0.0  ;;  %v1011_v42 = vpop.f32.mrb[24].mxu0  ;;  %v1059_v43 = vpop.f32.mrb[24].mxu1 }
 0x169   : > { %v1012_v44 = vpop.f32.mrb[25].mxu0  ;;  %v1060_v45 = vpop.f32.mrb[25].mxu1 }
 0x16a   : > { %771 = vst [vmem:[%s1459_s30 + $0x58] sm:$0xff] %v739_v40  ;;  %787 = vst [vmem:[%s1459_s30 + $0xd8] sm:$0xff] %v755_v41  ;;  %v1013_v46 = vadd.f32 %v1012_v44, %v1011_v42  ;;  %v1061_v47 = vadd.f32 %v1060_v45, %v1059_v43  ;;  %v1014_v48 = vpop.f32.mrb[26].mxu0  ;;  %v1062_v49 = vpop.f32.mrb[26].mxu1 }
 0x16b   : > { %v1015_v51 = vpop.f32.mrb[27].mxu0  ;;  %v1063_v52 = vpop.f32.mrb[27].mxu1 }
 0x16c   : > { %v650_v53 = vadd.f32 %v1013_v46, %v1450_v50  ;;  %v714_v54 = vadd.f32 %v1061_v47, %v1450_v50  ;;  %v1016_v55 = vadd.f32 %v1015_v51, %v1014_v48  ;;  %v1064_v56 = vadd.f32 %v1063_v52, %v1062_v49 }
 0x16e   : > { %v740_v57 = vmax.f32 %v650_v53, 0.0  ;;  %v756_v58 = vmax.f32 %v714_v54, 0.0  ;;  %v653_v59 = vadd.f32 %v1016_v55, %v1450_v50  ;;  %v717_v60 = vadd.f32 %v1064_v56, %v1450_v50 }
 0x170   : > { %772 = vst [vmem:[%s1459_s30 + $0x60] sm:$0xff] %v740_v57  ;;  %788 = vst [vmem:[%s1459_s30 + $0xe0] sm:$0xff] %v756_v58  ;;  %v741_v61 = vmax.f32 %v653_v59, 0.0  ;;  %v757_v62 = vmax.f32 %v717_v60, 0.0  ;;  %v1017_v63 = vpop.f32.mrb[28].mxu0  ;;  %v1065_v0 = vpop.f32.mrb[28].mxu1 }
 0x171   : > { %v1018_v1 = vpop.f32.mrb[29].mxu0  ;;  %v1066_v2 = vpop.f32.mrb[29].mxu1 }
 0x172   : > { %773 = vst [vmem:[%s1459_s30 + $0x68] sm:$0xff] %v741_v61  ;;  %789 = vst [vmem:[%s1459_s30 + $0xe8] sm:$0xff] %v757_v62  ;;  %v1019_v3 = vadd.f32 %v1018_v1, %v1017_v63  ;;  %v1067_v4 = vadd.f32 %v1066_v2, %v1065_v0  ;;  %v1020_v5 = vpop.f32.mrb[30].mxu0  ;;  %v1068_v6 = vpop.f32.mrb[30].mxu1 }
 0x173   : > { %v1021_v7 = vpop.f32.mrb[31].mxu0  ;;  %v1069_v8 = vpop.f32.mrb[31].mxu1 }
 0x174   : > { %v658_v9 = vadd.f32 %v1019_v3, %v1450_v50  ;;  %v722_v10 = vadd.f32 %v1067_v4, %v1450_v50  ;;  %v1022_v11 = vadd.f32 %v1021_v7, %v1020_v5  ;;  %v1070_v12 = vadd.f32 %v1069_v8, %v1068_v6 }
 0x176   : > { %v742_v13 = vmax.f32 %v658_v9, 0.0  ;;  %v758_v14 = vmax.f32 %v722_v10, 0.0  ;;  %v661_v15 = vadd.f32 %v1022_v11, %v1450_v50  ;;  %v725_v16 = vadd.f32 %v1070_v12, %v1450_v50 }
 0x178   : > { %774 = vst [vmem:[%s1459_s30 + $0x70] sm:$0xff] %v742_v13  ;;  %790 = vst [vmem:[%s1459_s30 + $0xf0] sm:$0xff] %v758_v14  ;;  %v743_v17 = vmax.f32 %v661_v15, 0.0  ;;  %v759_v18 = vmax.f32 %v725_v16, 0.0 }
 0x17a   : > { %775 = vst [vmem:[%s1459_s30 + $0x78] sm:$0xff] %v743_v17  ;;  %791 = vst [vmem:[%s1459_s30 + $0xf8] sm:$0xff] %v759_v18 }
 0x17b PF: > { %s15_s14 = sadd.s32 1, %s1284_s14   ;;  %s1544_s12 = smov %s1280_s13 }
 0x17c   : > { %p12_p3 = scmp.ge.s32.totalorder %s15_s14, 4   ;;  %s1545_s13 = smov %s1547_s16 }
 0x17e   :  { %14 = sbr.rel (!%p12_p3) target bundleno = 3 (0x3), region = 73 }
 0x185   :  { %820 = vsyncpa [#allocation3], 1 }
 0x186   :  { %822 = vsyncpa [#allocation3 + $0x1], 1 }
 0x187   :  { %823 = vsyncpa [#allocation5], 1 }

// kernel: forward.9
= control target key start
LH: loop header
LB: loop body
LE: loop exit
PB: predicated region body
PF: predicated region fallthrough
CT: control target
= control target key end

     0   :  { %s970_s12 = smov 0   ;;  %s972_s13 = smov 0   ;;  %s1120_s0 = inlined_call_operand.vmem [shape: bf16[512,128], index: 0, kind: input, shape index: {}]   ;;  %s1121_s1 = inlined_call_operand.vmem [shape: bf16[128,128], index: 1, kind: input, shape index: {}]   ;;  %s1122_s2 = inlined_call_operand.vmem [shape: f32[1,128], index: 2, kind: input, shape index: {}]   ;;  %s1123_s3 = inlined_call_operand.vmem [shape: f32[512,128], index: 3, kind: output, shape index: {}]  }
   0x1   :  { %s974_s14 = smov 0  }
   0x2 LB: > { %s25_s15 = sadd.s32 1, %s944_s13  ;;  %p758_p0 = scmp.ge.s32.totalorder %s948_s14, 1  ;;  %s948_s14 = sphi %s974_s14, %s13_s14   ;;  %s944_s13 = sphi %s972_s13, %s1125_s13   ;;  %s940_s12 = sphi %s970_s12, %s1124_s12  }
   0x3   : > { %p27_p1 = scmp.ge.s32.totalorder %s25_s15, 2  ;;  %p169_p2 = scmp.lt.s32.totalorder %s948_s14, 3 }
   0x5   : > { %s1127_s15 = smov (%p27_p1, %s25_s15), 0  ;;  %p170_p3 = pnand %p758_p0, %p169_p2 }
   0x6   : > { %v902_v0 = vld [vmem:[%s1121_s1] sm:$0xff] (!%p170_p3)   ;;  %s759_s18 = sshll.u32 (!%p170_p3), %s940_s12, 5  ;;  %v903_v1 = vld [vmem:[%s1121_s1 + $0x8] sm:$0xff] (!%p170_p3)   ;;  %v904_v2 = vld [vmem:[%s1121_s1 + $0x10] sm:$0xff] (!%p170_p3)  }
   0x7   : > { %173 = sbr.rel (%p170_p3) target bundleno = 283 (0x11b), region = 32  ;;  %p204_p4 = scmp.lt.s32.totalorder (!%p170_p3), %s759_s18, 63  ;;  %814 = vmatprep.subr.bf16.mxu0 (!%p170_p3), %v902_v0  ;;  %862 = vmatprep.subr.bf16.mxu1 (!%p170_p3), %v902_v0  ;;  %v905_v3 = vld [vmem:[%s1121_s1 + $0x18] sm:$0xff] (!%p170_p3)   ;;  %v906_v6 = vld [vmem:[%s1121_s1 + $0x20] sm:$0xff] (!%p170_p3)   ;;  %v907_v7 = vld [vmem:[%s1121_s1 + $0x28] sm:$0xff] (!%p170_p3)  }
   0x8   : > { %815 = vmatpush3.bf16.msra.mxu0 (!%p170_p3), %v902_v0  ;;  %870 = vmatpush3.bf16.msra.mxu1 (!%p170_p3), %v902_v0  ;;  %v908_v8 = vld [vmem:[%s1121_s1 + $0x30] sm:$0xff] (!%p170_p3)   ;;  %v909_v9 = vld [vmem:[%s1121_s1 + $0x38] sm:$0xff] (!%p170_p3)   ;;  %v1039_v24 = vld [vmem:[%s1122_s2] ss:$0 sm:$0xff] (!%p170_p3) }
   0x9   : > { %816 = vmatprep.subr.bf16.mxu0 (!%p170_p3), %v903_v1  ;;  %863 = vmatprep.subr.bf16.mxu1 (!%p170_p3), %v903_v1 }
   0xc   : > { %817 = vmatpush3.bf16.msra.mxu0 (!%p170_p3), %v903_v1  ;;  %871 = vmatpush3.bf16.msra.mxu1 (!%p170_p3), %v903_v1 }
   0xd   : > { %818 = vmatprep.subr.bf16.mxu0 (!%p170_p3), %v904_v2  ;;  %864 = vmatprep.subr.bf16.mxu1 (!%p170_p3), %v904_v2 }
   0xe   : > { %s1129_s18 = smov (!%p204_p4, %s759_s18), 63 }
   0xf   : > { %s760_s23 = sshll.u32 %s1129_s18, 2  ;;  %s762_s12 = sshll.u32 %s1129_s18, 3 }
  0x10   : > { %s1003_s26 = scalar_lea.vmem %s1120_s0, %s760_s23  ;;  %819 = vmatpush3.bf16.msra.mxu0 %v904_v2  ;;  %872 = vmatpush3.bf16.msra.mxu1 %v904_v2  ;;  %s1047_s19 = scalar_lea.vmem %s1123_s3, %s762_s12 }
  0x11   : > { %v910_v4 = vld [vmem:[%s1003_s26] sm:$0xff]   ;;  %820 = vmatprep.subr.bf16.mxu0 %v905_v3  ;;  %865 = vmatprep.subr.bf16.mxu1 %v905_v3  ;;  %v912_v10 = vld [vmem:[%s1003_s26 + $0x8] sm:$0xff]   ;;  %v914_v12 = vld [vmem:[%s1003_s26 + $0x10] sm:$0xff]  }
  0x12   : > { %v911_v5 = vld [vmem:[%s1003_s26 + $0x40] sm:$0xff]   ;;  %830 = vmatprep.mubr.bf16.mxu0 %v910_v4  ;;  %v913_v11 = vld [vmem:[%s1003_s26 + $0x48] sm:$0xff]   ;;  %v915_v13 = vld [vmem:[%s1003_s26 + $0x50] sm:$0xff]  }
  0x13   : > { %846 = vmatprep.mubr.bf16.mxu1 %v911_v5  ;;  %v916_v14 = vld [vmem:[%s1003_s26 + $0x18] sm:$0xff]   ;;  %v918_v16 = vld [vmem:[%s1003_s26 + $0x20] sm:$0xff]   ;;  %v920_v18 = vld [vmem:[%s1003_s26 + $0x28] sm:$0xff]  }
  0x14   : > { %821 = vmatpush3.bf16.msra.mxu0 %v905_v3  ;;  %873 = vmatpush3.bf16.msra.mxu1 %v905_v3  ;;  %v917_v15 = vld [vmem:[%s1003_s26 + $0x58] sm:$0xff]   ;;  %v919_v17 = vld [vmem:[%s1003_s26 + $0x60] sm:$0xff]   ;;  %v921_v19 = vld [vmem:[%s1003_s26 + $0x68] sm:$0xff]  }
  0x15   : > { %822 = vmatprep.subr.bf16.mxu0 %v906_v6  ;;  %866 = vmatprep.subr.bf16.mxu1 %v906_v6  ;;  %v922_v20 = vld [vmem:[%s1003_s26 + $0x30] sm:$0xff]   ;;  %v924_v22 = vld [vmem:[%s1003_s26 + $0x38] sm:$0xff]  }
  0x16   : > { %v923_v21 = vld [vmem:[%s1003_s26 + $0x70] sm:$0xff]   ;;  %v925_v23 = vld [vmem:[%s1003_s26 + $0x78] sm:$0xff]  }
  0x18   : > { %823 = vmatpush3.bf16.msra.mxu0 %v906_v6  ;;  %874 = vmatpush3.bf16.msra.mxu1 %v906_v6 }
  0x19   : > { %824 = vmatprep.subr.bf16.mxu0 %v907_v7  ;;  %867 = vmatprep.subr.bf16.mxu1 %v907_v7 }
  0x1c   : > { %825 = vmatpush3.bf16.msra.mxu0 %v907_v7  ;;  %875 = vmatpush3.bf16.msra.mxu1 %v907_v7 }
  0x1d   : > { %826 = vmatprep.subr.bf16.mxu0 %v908_v8  ;;  %868 = vmatprep.subr.bf16.mxu1 %v908_v8 }
  0x20   : > { %827 = vmatpush3.bf16.msra.mxu0 %v908_v8  ;;  %876 = vmatpush3.bf16.msra.mxu1 %v908_v8 }
  0x21   : > { %828 = vmatprep.subr.bf16.mxu0 %v909_v9  ;;  %869 = vmatprep.subr.bf16.mxu1 %v909_v9 }
  0x24   : > { %829 = vmatpush3.bf16.msra.mxu0 %v909_v9  ;;  %877 = vmatpush3.bf16.msra.mxu1 %v909_v9 }
  0x27   : > { %831 = vmatmul.mubr.bf16.vlgmr.msra.gmra.mrb[0].mxu0 %v912_v10  ;;  %847 = vmatmul.mubr.bf16.vlgmr.msra.gmra.mrb[0].mxu1 %v913_v11 }
  0x28   : > { %834 = vmatprep.mubr.bf16.mxu0 %v914_v12  ;;  %850 = vmatprep.mubr.bf16.mxu1 %v915_v13 }
  0x2f   : > { %835 = vmatmul.mubr.bf16.gmra.mrb[4].mxu0 %v916_v14  ;;  %851 = vmatmul.mubr.bf16.gmra.mrb[4].mxu1 %v917_v15 }
  0x30   : > { %838 = vmatprep.mubr.bf16.mxu0 %v918_v16  ;;  %854 = vmatprep.mubr.bf16.mxu1 %v919_v17 }
  0x37   : > { %839 = vmatmul.mubr.bf16.gmra.mrb[8].mxu0 %v920_v18  ;;  %855 = vmatmul.mubr.bf16.gmra.mrb[8].mxu1 %v921_v19 }
  0x38   : > { %842 = vmatprep.mubr.bf16.mxu0 %v922_v20  ;;  %858 = vmatprep.mubr.bf16.mxu1 %v923_v21 }
  0x3f   : > { %843 = vmatmul.mubr.bf16.gmra.mrb[12].mxu0 %v924_v22  ;;  %859 = vmatmul.mubr.bf16.gmra.mrb[12].mxu1 %v925_v23 }
  0xfa   : > { %v832_v25 = vpop.f32.mrb[0].mxu0  ;;  %v848_v26 = vpop.f32.mrb[0].mxu1 }
  0xfb   : > { %v468_v27 = vadd.f32 %v832_v25, %v1039_v24  ;;  %v532_v28 = vadd.f32 %v848_v26, %v1039_v24  ;;  %v459_v29 = vpop.f32.mrb[1].mxu0  ;;  %v523_v30 = vpop.f32.mrb[1].mxu1 }
  0xfc   : > { %v460_v31 = vadd.f32 %v1039_v24, %v459_v29  ;;  %v524_v32 = vadd.f32 %v1039_v24, %v523_v30  ;;  %v833_v33 = vpop.f32.mrb[2].mxu0  ;;  %v849_v34 = vpop.f32.mrb[2].mxu1 }
  0xfd   : > { %v588_v35 = vmax.f32 %v468_v27, 0.0  ;;  %v604_v36 = vmax.f32 %v532_v28, 0.0  ;;  %v471_v37 = vadd.f32 %v833_v33, %v1039_v24  ;;  %v535_v38 = vadd.f32 %v849_v34, %v1039_v24  ;;  %v462_v39 = vpop.f32.mrb[3].mxu0  ;;  %v526_v40 = vpop.f32.mrb[3].mxu1 }
  0xfe   : > { %v586_v41 = vmax.f32 %v460_v31, 0.0  ;;  %v602_v42 = vmax.f32 %v524_v32, 0.0  ;;  %v463_v43 = vadd.f32 %v1039_v24, %v462_v39  ;;  %v527_v44 = vadd.f32 %v1039_v24, %v526_v40 }
  0xff   : > { %620 = vst [vmem:[%s1047_s19 + $0x10] sm:$0xff] %v588_v35  ;;  %636 = vst [vmem:[%s1047_s19 + $0x90] sm:$0xff] %v604_v36  ;;  %v589_v45 = vmax.f32 %v471_v37, 0.0  ;;  %v605_v46 = vmax.f32 %v535_v38, 0.0 }
 0x100   : > { %618 = vst [vmem:[%s1047_s19] sm:$0xff] %v586_v41  ;;  %634 = vst [vmem:[%s1047_s19 + $0x80] sm:$0xff] %v602_v42  ;;  %v587_v47 = vmax.f32 %v463_v43, 0.0  ;;  %v603_v48 = vmax.f32 %v527_v44, 0.0 }
 0x101   : > { %621 = vst [vmem:[%s1047_s19 + $0x18] sm:$0xff] %v589_v45  ;;  %637 = vst [vmem:[%s1047_s19 + $0x98] sm:$0xff] %v605_v46 }
 0x102   : > { %619 = vst [vmem:[%s1047_s19 + $0x8] sm:$0xff] %v587_v47  ;;  %635 = vst [vmem:[%s1047_s19 + $0x88] sm:$0xff] %v603_v48  ;;  %v836_v49 = vpop.f32.mrb[4].mxu0  ;;  %v852_v50 = vpop.f32.mrb[4].mxu1 }
 0x103   : > { %v484_v51 = vadd.f32 %v836_v49, %v1039_v24  ;;  %v548_v52 = vadd.f32 %v852_v50, %v1039_v24  ;;  %v475_v53 = vpop.f32.mrb[5].mxu0  ;;  %v539_v54 = vpop.f32.mrb[5].mxu1 }
 0x104   : > { %v476_v55 = vadd.f32 %v1039_v24, %v475_v53  ;;  %v540_v56 = vadd.f32 %v1039_v24, %v539_v54  ;;  %v837_v57 = vpop.f32.mrb[6].mxu0  ;;  %v853_v58 = vpop.f32.mrb[6].mxu1 }
 0x105   : > { %v592_v59 = vmax.f32 %v484_v51, 0.0  ;;  %v608_v60 = vmax.f32 %v548_v52, 0.0  ;;  %v487_v61 = vadd.f32 %v837_v57, %v1039_v24  ;;  %v551_v62 = vadd.f32 %v853_v58, %v1039_v24  ;;  %v478_v63 = vpop.f32.mrb[7].mxu0  ;;  %v542_v0 = vpop.f32.mrb[7].mxu1 }
 0x106   : > { %v590_v1 = vmax.f32 %v476_v55, 0.0  ;;  %v606_v2 = vmax.f32 %v540_v56, 0.0  ;;  %v479_v3 = vadd.f32 %v1039_v24, %v478_v63  ;;  %v543_v4 = vadd.f32 %v1039_v24, %v542_v0 }
 0x107   : > { %624 = vst [vmem:[%s1047_s19 + $0x30] sm:$0xff] %v592_v59  ;;  %640 = vst [vmem:[%s1047_s19 + $0xb0] sm:$0xff] %v608_v60  ;;  %v593_v5 = vmax.f32 %v487_v61, 0.0  ;;  %v609_v6 = vmax.f32 %v551_v62, 0.0 }
 0x108   : > { %622 = vst [vmem:[%s1047_s19 + $0x20] sm:$0xff] %v590_v1  ;;  %638 = vst [vmem:[%s1047_s19 + $0xa0] sm:$0xff] %v606_v2  ;;  %v591_v7 = vmax.f32 %v479_v3, 0.0  ;;  %v607_v8 = vmax.f32 %v543_v4, 0.0 }
 0x109   : > { %625 = vst [vmem:[%s1047_s19 + $0x38] sm:$0xff] %v593_v5  ;;  %641 = vst [vmem:[%s1047_s19 + $0xb8] sm:$0xff] %v609_v6 }
 0x10a   : > { %623 = vst [vmem:[%s1047_s19 + $0x28] sm:$0xff] %v591_v7  ;;  %639 = vst [vmem:[%s1047_s19 + $0xa8] sm:$0xff] %v607_v8  ;;  %v840_v9 = vpop.f32.mrb[8].mxu0  ;;  %v856_v10 = vpop.f32.mrb[8].mxu1 }
 0x10b   : > { %v500_v11 = vadd.f32 %v840_v9, %v1039_v24  ;;  %v564_v12 = vadd.f32 %v856_v10, %v1039_v24  ;;  %v491_v13 = vpop.f32.mrb[9].mxu0  ;;  %v555_v14 = vpop.f32.mrb[9].mxu1 }
 0x10c   : > { %v492_v15 = vadd.f32 %v1039_v24, %v491_v13  ;;  %v556_v16 = vadd.f32 %v1039_v24, %v555_v14  ;;  %v841_v17 = vpop.f32.mrb[10].mxu0  ;;  %v857_v18 = vpop.f32.mrb[10].mxu1 }
 0x10d   : > { %v596_v19 = vmax.f32 %v500_v11, 0.0  ;;  %v612_v20 = vmax.f32 %v564_v12, 0.0  ;;  %v503_v21 = vadd.f32 %v841_v17, %v1039_v24  ;;  %v567_v22 = vadd.f32 %v857_v18, %v1039_v24  ;;  %v494_v23 = vpop.f32.mrb[11].mxu0  ;;  %v558_v25 = vpop.f32.mrb[11].mxu1 }
 0x10e   : > { %v594_v26 = vmax.f32 %v492_v15, 0.0  ;;  %v610_v27 = vmax.f32 %v556_v16, 0.0  ;;  %v495_v28 = vadd.f32 %v1039_v24, %v494_v23  ;;  %v559_v29 = vadd.f32 %v1039_v24, %v558_v25 }
 0x10f   : > { %628 = vst [vmem:[%s1047_s19 + $0x50] sm:$0xff] %v596_v19  ;;  %644 = vst [vmem:[%s1047_s19 + $0xd0] sm:$0xff] %v612_v20  ;;  %v597_v30 = vmax.f32 %v503_v21, 0.0  ;;  %v613_v31 = vmax.f32 %v567_v22, 0.0 }
 0x110   : > { %626 = vst [vmem:[%s1047_s19 + $0x40] sm:$0xff] %v594_v26  ;;  %642 = vst [vmem:[%s1047_s19 + $0xc0] sm:$0xff] %v610_v27  ;;  %v595_v32 = vmax.f32 %v495_v28, 0.0  ;;  %v611_v33 = vmax.f32 %v559_v29, 0.0 }
 0x111   : > { %629 = vst [vmem:[%s1047_s19 + $0x58] sm:$0xff] %v597_v30  ;;  %645 = vst [vmem:[%s1047_s19 + $0xd8] sm:$0xff] %v613_v31 }
 0x112   : > { %627 = vst [vmem:[%s1047_s19 + $0x48] sm:$0xff] %v595_v32  ;;  %643 = vst [vmem:[%s1047_s19 + $0xc8] sm:$0xff] %v611_v33  ;;  %v844_v34 = vpop.f32.mrb[12].mxu0  ;;  %v860_v35 = vpop.f32.mrb[12].mxu1 }
 0x113   : > { %v516_v36 = vadd.f32 %v844_v34, %v1039_v24  ;;  %v580_v37 = vadd.f32 %v860_v35, %v1039_v24  ;;  %v507_v38 = vpop.f32.mrb[13].mxu0  ;;  %v571_v39 = vpop.f32.mrb[13].mxu1 }
 0x114   : > { %v508_v40 = vadd.f32 %v1039_v24, %v507_v38  ;;  %v572_v41 = vadd.f32 %v1039_v24, %v571_v39  ;;  %v845_v42 = vpop.f32.mrb[14].mxu0  ;;  %v861_v43 = vpop.f32.mrb[14].mxu1 }
 0x115   : > { %v600_v44 = vmax.f32 %v516_v36, 0.0  ;;  %v616_v45 = vmax.f32 %v580_v37, 0.0  ;;  %v519_v46 = vadd.f32 %v845_v42, %v1039_v24  ;;  %v583_v47 = vadd.f32 %v861_v43, %v1039_v24  ;;  %v510_v48 = vpop.f32.mrb[15].mxu0  ;;  %v574_v49 = vpop.f32.mrb[15].mxu1 }
 0x116   : > { %v598_v50 = vmax.f32 %v508_v40, 0.0  ;;  %v614_v51 = vmax.f32 %v572_v41, 0.0  ;;  %v511_v52 = vadd.f32 %v1039_v24, %v510_v48  ;;  %v575_v53 = vadd.f32 %v1039_v24, %v574_v49 }
 0x117   : > { %632 = vst [vmem:[%s1047_s19 + $0x70] sm:$0xff] %v600_v44  ;;  %648 = vst [vmem:[%s1047_s19 + $0xf0] sm:$0xff] %v616_v45  ;;  %v601_v54 = vmax.f32 %v519_v46, 0.0  ;;  %v617_v55 = vmax.f32 %v583_v47, 0.0 }
 0x118   : > { %630 = vst [vmem:[%s1047_s19 + $0x60] sm:$0xff] %v598_v50  ;;  %646 = vst [vmem:[%s1047_s19 + $0xe0] sm:$0xff] %v614_v51  ;;  %v599_v56 = vmax.f32 %v511_v52, 0.0  ;;  %v615_v57 = vmax.f32 %v575_v53, 0.0 }
 0x119   : > { %633 = vst [vmem:[%s1047_s19 + $0x78] sm:$0xff] %v601_v54  ;;  %649 = vst [vmem:[%s1047_s19 + $0xf8] sm:$0xff] %v617_v55 }
 0x11a   : > { %631 = vst [vmem:[%s1047_s19 + $0x68] sm:$0xff] %v599_v56  ;;  %647 = vst [vmem:[%s1047_s19 + $0xe8] sm:$0xff] %v615_v57 }
 0x11b PF: > { %s13_s14 = sadd.s32 1, %s948_s14   ;;  %s1124_s12 = smov %s944_s13 }
 0x11c   : > { %p10_p5 = scmp.ge.s32.totalorder %s13_s14, 4   ;;  %s1125_s13 = smov %s1127_s15 }
 0x11e   :  { %12 = sbr.rel (!%p10_p5) target bundleno = 2 (0x2), region = 68 }

// kernel: forward.10
= control target key start
LH: loop header
LB: loop body
LE: loop exit
PB: predicated region body
PF: predicated region fallthrough
CT: control target
= control target key end

     0   :  { %s1207_s12 = smov 0   ;;  %s1209_s13 = smov 0   ;;  %s1400_s0 = inlined_call_operand.vmem [shape: bf16[512,256], index: 0, kind: input, shape index: {}]   ;;  %s1401_s1 = inlined_call_operand.vmem [shape: bf16[256,128], index: 1, kind: input, shape index: {}]   ;;  %s1402_s2 = inlined_call_operand.vmem [shape: f32[1,128], index: 2, kind: input, shape index: {}]   ;;  %s1403_s3 = inlined_call_operand.vmem [shape: f32[512,128], index: 3, kind: output, shape index: {}]  }
   0x1   :  { %s1211_s14 = smov 0  }
   0x2 LB: > { %s25_s15 = sadd.s32 1, %s1181_s13  ;;  %p889_p0 = scmp.ge.s32.totalorder %s1185_s14, 1  ;;  %s1185_s14 = sphi %s1211_s14, %s13_s14   ;;  %s1181_s13 = sphi %s1209_s13, %s1405_s13   ;;  %s1177_s12 = sphi %s1207_s12, %s1404_s12  }
   0x3   : > { %p27_p1 = scmp.ge.s32.totalorder %s25_s15, 2  ;;  %p170_p2 = scmp.lt.s32.totalorder %s1185_s14, 3 }
   0x5   : > { %s1407_s15 = smov (%p27_p1, %s25_s15), 0  ;;  %p171_p3 = pnand %p889_p0, %p170_p2 }
   0x6   : > { %v1099_v0 = vld [vmem:[%s1401_s1 + $0x40] sm:$0xff] (!%p171_p3)   ;;  %s890_s18 = sshll.u32 (!%p171_p3), %s1177_s12, 5  ;;  %v1101_v2 = vld [vmem:[%s1401_s1 + $0x48] sm:$0xff] (!%p171_p3)   ;;  %v1103_v4 = vld [vmem:[%s1401_s1 + $0x50] sm:$0xff] (!%p171_p3)  }
   0x7   : > { %174 = sbr.rel (%p171_p3) target bundleno = 317 (0x13d), region = 32  ;;  %v1100_v1 = vld [vmem:[%s1401_s1] sm:$0xff] (!%p171_p3)   ;;  %947 = vmatprep.subr.bf16.mxu0 (!%p171_p3), %v1099_v0  ;;  %1059 = vmatprep.subr.bf16.mxu1 (!%p171_p3), %v1099_v0  ;;  %v1102_v3 = vld [vmem:[%s1401_s1 + $0x8] sm:$0xff] (!%p171_p3)   ;;  %p206_p4 = scmp.lt.s32.totalorder (!%p171_p3), %s890_s18, 63  ;;  %v1104_v5 = vld [vmem:[%s1401_s1 + $0x10] sm:$0xff] (!%p171_p3)  }
   0x8   : > { %948 = vmatpush3.bf16.msra.mxu0 (!%p171_p3), %v1100_v1  ;;  %1067 = vmatpush3.bf16.msra.mxu1 (!%p171_p3), %v1100_v1  ;;  %v1105_v6 = vld [vmem:[%s1401_s1 + $0x58] sm:$0xff] (!%p171_p3)   ;;  %v1107_v8 = vld [vmem:[%s1401_s1 + $0x60] sm:$0xff] (!%p171_p3)   ;;  %v1109_v10 = vld [vmem:[%s1401_s1 + $0x68] sm:$0xff] (!%p171_p3)  }
   0x9   : > { %949 = vmatprep.subr.bf16.mxu0 (!%p171_p3), %v1101_v2  ;;  %1060 = vmatprep.subr.bf16.mxu1 (!%p171_p3), %v1101_v2  ;;  %v1106_v7 = vld [vmem:[%s1401_s1 + $0x18] sm:$0xff] (!%p171_p3)   ;;  %v1108_v9 = vld [vmem:[%s1401_s1 + $0x20] sm:$0xff] (!%p171_p3)   ;;  %v1110_v13 = vld [vmem:[%s1401_s1 + $0x28] sm:$0xff] (!%p171_p3)  }
   0xa   : > { %v1111_v14 = vld [vmem:[%s1401_s1 + $0x70] sm:$0xff] (!%p171_p3)   ;;  %v1113_v16 = vld [vmem:[%s1401_s1 + $0x78] sm:$0xff] (!%p171_p3)   ;;  %v1318_v50 = vld [vmem:[%s1402_s2] ss:$0 sm:$0xff] (!%p171_p3) }
   0xb   : > { %v1112_v15 = vld [vmem:[%s1401_s1 + $0x30] sm:$0xff] (!%p171_p3)   ;;  %v1114_v17 = vld [vmem:[%s1401_s1 + $0x38] sm:$0xff] (!%p171_p3)  }
   0xc   : > { %950 = vmatpush3.bf16.msra.mxu0 (!%p171_p3), %v1102_v3  ;;  %1068 = vmatpush3.bf16.msra.mxu1 (!%p171_p3), %v1102_v3 }
   0xd   : > { %951 = vmatprep.subr.bf16.mxu0 (!%p171_p3), %v1103_v4  ;;  %1061 = vmatprep.subr.bf16.mxu1 (!%p171_p3), %v1103_v4 }
   0xe   : > { %s1409_s18 = smov (!%p206_p4, %s890_s18), 63 }
   0xf   : > { %s946_s6 = sshll.u32 %s1409_s18, 3 }
  0x10   : > { %952 = vmatpush3.bf16.msra.mxu0 %v1104_v5  ;;  %1069 = vmatpush3.bf16.msra.mxu1 %v1104_v5  ;;  %s1260_s11 = scalar_lea.vmem %s1400_s0, %s946_s6  ;;  %s1327_s8 = scalar_lea.vmem %s1403_s3, %s946_s6 }
  0x11   : > { %953 = vmatprep.subr.bf16.mxu0 %v1105_v6  ;;  %1062 = vmatprep.subr.bf16.mxu1 %v1105_v6  ;;  %v1117_v11 = vld [vmem:[%s1260_s11 + $0x4] ss:$8 sps:$4 sm:$0xff]   ;;  %v1115_v18 = vld [vmem:[%s1260_s11] ss:$8 sps:$4 sm:$0xff]   ;;  %v1121_v20 = vld [vmem:[%s1260_s11 + $0x14] ss:$8 sps:$4 sm:$0xff]  }
  0x12   : > { %v1120_v12 = vld [vmem:[%s1260_s11 + $0x84] ss:$8 sps:$4 sm:$0xff]   ;;  %588 = vmatprep.mubr.bf16.mxu0 %v1117_v11  ;;  %v1118_v19 = vld [vmem:[%s1260_s11 + $0x80] ss:$8 sps:$4 sm:$0xff]   ;;  %v1123_v21 = vld [vmem:[%s1260_s11 + $0x94] ss:$8 sps:$4 sm:$0xff]  }
  0x13   : > { %652 = vmatprep.mubr.bf16.mxu1 %v1120_v12  ;;  %v1125_v22 = vld [vmem:[%s1260_s11 + $0x10] ss:$8 sps:$4 sm:$0xff]   ;;  %v1127_v24 = vld [vmem:[%s1260_s11 + $0x24] ss:$8 sps:$4 sm:$0xff]   ;;  %v1131_v26 = vld [vmem:[%s1260_s11 + $0x20] ss:$8 sps:$4 sm:$0xff]  }
  0x14   : > { %954 = vmatpush3.bf16.msra.mxu0 %v1106_v7  ;;  %1070 = vmatpush3.bf16.msra.mxu1 %v1106_v7  ;;  %v1126_v23 = vld [vmem:[%s1260_s11 + $0x90] ss:$8 sps:$4 sm:$0xff]   ;;  %v1129_v25 = vld [vmem:[%s1260_s11 + $0xa4] ss:$8 sps:$4 sm:$0xff]   ;;  %v1132_v27 = vld [vmem:[%s1260_s11 + $0xa0] ss:$8 sps:$4 sm:$0xff]  }
  0x15   : > { %955 = vmatprep.subr.bf16.mxu0 %v1107_v8  ;;  %1063 = vmatprep.subr.bf16.mxu1 %v1107_v8  ;;  %v1133_v28 = vld [vmem:[%s1260_s11 + $0x34] ss:$8 sps:$4 sm:$0xff]   ;;  %v1137_v30 = vld [vmem:[%s1260_s11 + $0x30] ss:$8 sps:$4 sm:$0xff]   ;;  %v1139_v32 = vld [vmem:[%s1260_s11 + $0x44] ss:$8 sps:$4 sm:$0xff]  }
  0x16   : > { %v1135_v29 = vld [vmem:[%s1260_s11 + $0xb4] ss:$8 sps:$4 sm:$0xff]   ;;  %v1138_v31 = vld [vmem:[%s1260_s11 + $0xb0] ss:$8 sps:$4 sm:$0xff]   ;;  %v1141_v33 = vld [vmem:[%s1260_s11 + $0xc4] ss:$8 sps:$4 sm:$0xff]  }
  0x17   : > { %v1143_v34 = vld [vmem:[%s1260_s11 + $0x40] ss:$8 sps:$4 sm:$0xff]   ;;  %v1145_v36 = vld [vmem:[%s1260_s11 + $0x54] ss:$8 sps:$4 sm:$0xff]   ;;  %v1149_v38 = vld [vmem:[%s1260_s11 + $0x50] ss:$8 sps:$4 sm:$0xff]  }
  0x18   : > { %956 = vmatpush3.bf16.msra.mxu0 %v1108_v9  ;;  %1071 = vmatpush3.bf16.msra.mxu1 %v1108_v9  ;;  %v1144_v35 = vld [vmem:[%s1260_s11 + $0xc0] ss:$8 sps:$4 sm:$0xff]   ;;  %v1147_v37 = vld [vmem:[%s1260_s11 + $0xd4] ss:$8 sps:$4 sm:$0xff]   ;;  %v1150_v39 = vld [vmem:[%s1260_s11 + $0xd0] ss:$8 sps:$4 sm:$0xff]  }
  0x19   : > { %957 = vmatprep.subr.bf16.mxu0 %v1109_v10  ;;  %1064 = vmatprep.subr.bf16.mxu1 %v1109_v10  ;;  %v1151_v40 = vld [vmem:[%s1260_s11 + $0x64] ss:$8 sps:$4 sm:$0xff]   ;;  %v1155_v42 = vld [vmem:[%s1260_s11 + $0x60] ss:$8 sps:$4 sm:$0xff]   ;;  %v1157_v44 = vld [vmem:[%s1260_s11 + $0x74] ss:$8 sps:$4 sm:$0xff]  }
  0x1a   : > { %v1153_v41 = vld [vmem:[%s1260_s11 + $0xe4] ss:$8 sps:$4 sm:$0xff]   ;;  %v1156_v43 = vld [vmem:[%s1260_s11 + $0xe0] ss:$8 sps:$4 sm:$0xff]   ;;  %v1159_v45 = vld [vmem:[%s1260_s11 + $0xf4] ss:$8 sps:$4 sm:$0xff]  }
  0x1b   : > { %v1161_v46 = vld [vmem:[%s1260_s11 + $0x70] ss:$8 sps:$4 sm:$0xff]  }
  0x1c   : > { %958 = vmatpush3.bf16.msra.mxu0 %v1110_v13  ;;  %1072 = vmatpush3.bf16.msra.mxu1 %v1110_v13  ;;  %v1162_v47 = vld [vmem:[%s1260_s11 + $0xf0] ss:$8 sps:$4 sm:$0xff]  }
  0x1d   : > { %959 = vmatprep.subr.bf16.mxu0 %v1111_v14  ;;  %1065 = vmatprep.subr.bf16.mxu1 %v1111_v14 }
  0x20   : > { %960 = vmatpush3.bf16.msra.mxu0 %v1112_v15  ;;  %1073 = vmatpush3.bf16.msra.mxu1 %v1112_v15 }
  0x21   : > { %961 = vmatprep.subr.bf16.mxu0 %v1113_v16  ;;  %1066 = vmatprep.subr.bf16.mxu1 %v1113_v16 }
  0x24   : > { %962 = vmatpush3.bf16.msra.mxu0 %v1114_v17  ;;  %1074 = vmatpush3.bf16.msra.mxu1 %v1114_v17 }
  0x27   : > { %589 = vmatmul.mubr.bf16.vlgmr.msra.gmra.mrb[0].mxu0 %v1115_v18  ;;  %653 = vmatmul.mubr.bf16.vlgmr.msra.gmra.mrb[0].mxu1 %v1118_v19 }
  0x28   : > { %596 = vmatprep.mubr.bf16.mxu0 %v1121_v20  ;;  %660 = vmatprep.mubr.bf16.mxu1 %v1123_v21 }
  0x2f   : > { %597 = vmatmul.mubr.bf16.gmra.mrb[4].mxu0 %v1125_v22  ;;  %661 = vmatmul.mubr.bf16.gmra.mrb[4].mxu1 %v1126_v23 }
  0x30   : > { %604 = vmatprep.mubr.bf16.mxu0 %v1127_v24  ;;  %668 = vmatprep.mubr.bf16.mxu1 %v1129_v25 }
  0x37   : > { %605 = vmatmul.mubr.bf16.gmra.mrb[8].mxu0 %v1131_v26  ;;  %669 = vmatmul.mubr.bf16.gmra.mrb[8].mxu1 %v1132_v27 }
  0x38   : > { %612 = vmatprep.mubr.bf16.mxu0 %v1133_v28  ;;  %676 = vmatprep.mubr.bf16.mxu1 %v1135_v29 }
  0x3f   : > { %613 = vmatmul.mubr.bf16.gmra.mrb[12].mxu0 %v1137_v30  ;;  %677 = vmatmul.mubr.bf16.gmra.mrb[12].mxu1 %v1138_v31 }
  0x40   : > { %620 = vmatprep.mubr.bf16.mxu0 %v1139_v32  ;;  %684 = vmatprep.mubr.bf16.mxu1 %v1141_v33 }
  0x47   : > { %621 = vmatmul.mubr.bf16.gmra.mrb[16].mxu0 %v1143_v34  ;;  %685 = vmatmul.mubr.bf16.gmra.mrb[16].mxu1 %v1144_v35 }
  0x48   : > { %628 = vmatprep.mubr.bf16.mxu0 %v1145_v36  ;;  %692 = vmatprep.mubr.bf16.mxu1 %v1147_v37 }
  0x4f   : > { %629 = vmatmul.mubr.bf16.gmra.mrb[20].mxu0 %v1149_v38  ;;  %693 = vmatmul.mubr.bf16.gmra.mrb[20].mxu1 %v1150_v39 }
  0x50   : > { %636 = vmatprep.mubr.bf16.mxu0 %v1151_v40  ;;  %700 = vmatprep.mubr.bf16.mxu1 %v1153_v41 }
  0x57   : > { %637 = vmatmul.mubr.bf16.gmra.mrb[24].mxu0 %v1155_v42  ;;  %701 = vmatmul.mubr.bf16.gmra.mrb[24].mxu1 %v1156_v43 }
  0x58   : > { %644 = vmatprep.mubr.bf16.mxu0 %v1157_v44  ;;  %708 = vmatprep.mubr.bf16.mxu1 %v1159_v45 }
  0x5f   : > { %645 = vmatmul.mubr.bf16.gmra.mrb[28].mxu0 %v1161_v46  ;;  %709 = vmatmul.mubr.bf16.gmra.mrb[28].mxu1 %v1162_v47 }
  0xfa   : > { %v963_v48 = vpop.f32.mrb[0].mxu0  ;;  %v1011_v49 = vpop.f32.mrb[0].mxu1 }
  0xfb   : > { %v964_v51 = vpop.f32.mrb[1].mxu0  ;;  %v1012_v52 = vpop.f32.mrb[1].mxu1 }
  0xfc   : > { %v965_v53 = vadd.f32 %v964_v51, %v963_v48  ;;  %v1013_v54 = vadd.f32 %v1012_v52, %v1011_v49  ;;  %v966_v55 = vpop.f32.mrb[2].mxu0  ;;  %v1014_v56 = vpop.f32.mrb[2].mxu1 }
  0xfd   : > { %v967_v57 = vpop.f32.mrb[3].mxu0  ;;  %v1015_v58 = vpop.f32.mrb[3].mxu1 }
  0xfe   : > { %v591_v59 = vadd.f32 %v965_v53, %v1318_v50  ;;  %v655_v60 = vadd.f32 %v1013_v54, %v1318_v50  ;;  %v968_v61 = vadd.f32 %v967_v57, %v966_v55  ;;  %v1016_v62 = vadd.f32 %v1015_v58, %v1014_v56 }
 0x100   : > { %v717_v63 = vmax.f32 %v591_v59, 0.0  ;;  %v733_v0 = vmax.f32 %v655_v60, 0.0  ;;  %v594_v1 = vadd.f32 %v968_v61, %v1318_v50  ;;  %v658_v2 = vadd.f32 %v1016_v62, %v1318_v50 }
 0x102   : > { %749 = vst [vmem:[%s1327_s8] sm:$0xff] %v717_v63  ;;  %765 = vst [vmem:[%s1327_s8 + $0x80] sm:$0xff] %v733_v0  ;;  %v718_v3 = vmax.f32 %v594_v1, 0.0  ;;  %v734_v4 = vmax.f32 %v658_v2, 0.0  ;;  %v969_v5 = vpop.f32.mrb[4].mxu0  ;;  %v1017_v6 = vpop.f32.mrb[4].mxu1 }
 0x103   : > { %v970_v7 = vpop.f32.mrb[5].mxu0  ;;  %v1018_v8 = vpop.f32.mrb[5].mxu1 }
 0x104   : > { %750 = vst [vmem:[%s1327_s8 + $0x8] sm:$0xff] %v718_v3  ;;  %766 = vst [vmem:[%s1327_s8 + $0x88] sm:$0xff] %v734_v4  ;;  %v971_v9 = vadd.f32 %v970_v7, %v969_v5  ;;  %v1019_v10 = vadd.f32 %v1018_v8, %v1017_v6  ;;  %v972_v11 = vpop.f32.mrb[6].mxu0  ;;  %v1020_v12 = vpop.f32.mrb[6].mxu1 }
 0x105   : > { %v973_v13 = vpop.f32.mrb[7].mxu0  ;;  %v1021_v14 = vpop.f32.mrb[7].mxu1 }
 0x106   : > { %v599_v15 = vadd.f32 %v971_v9, %v1318_v50  ;;  %v663_v16 = vadd.f32 %v1019_v10, %v1318_v50  ;;  %v974_v17 = vadd.f32 %v973_v13, %v972_v11  ;;  %v1022_v18 = vadd.f32 %v1021_v14, %v1020_v12 }
 0x108   : > { %v719_v19 = vmax.f32 %v599_v15, 0.0  ;;  %v735_v20 = vmax.f32 %v663_v16, 0.0  ;;  %v602_v21 = vadd.f32 %v974_v17, %v1318_v50  ;;  %v666_v22 = vadd.f32 %v1022_v18, %v1318_v50 }
 0x10a   : > { %751 = vst [vmem:[%s1327_s8 + $0x10] sm:$0xff] %v719_v19  ;;  %767 = vst [vmem:[%s1327_s8 + $0x90] sm:$0xff] %v735_v20  ;;  %v720_v23 = vmax.f32 %v602_v21, 0.0  ;;  %v736_v24 = vmax.f32 %v666_v22, 0.0  ;;  %v975_v25 = vpop.f32.mrb[8].mxu0  ;;  %v1023_v26 = vpop.f32.mrb[8].mxu1 }
 0x10b   : > { %v976_v27 = vpop.f32.mrb[9].mxu0  ;;  %v1024_v28 = vpop.f32.mrb[9].mxu1 }
 0x10c   : > { %752 = vst [vmem:[%s1327_s8 + $0x18] sm:$0xff] %v720_v23  ;;  %768 = vst [vmem:[%s1327_s8 + $0x98] sm:$0xff] %v736_v24  ;;  %v977_v29 = vadd.f32 %v976_v27, %v975_v25  ;;  %v1025_v30 = vadd.f32 %v1024_v28, %v1023_v26  ;;  %v978_v31 = vpop.f32.mrb[10].mxu0  ;;  %v1026_v32 = vpop.f32.mrb[10].mxu1 }
 0x10d   : > { %v979_v33 = vpop.f32.mrb[11].mxu0  ;;  %v1027_v34 = vpop.f32.mrb[11].mxu1 }
 0x10e   : > { %v607_v35 = vadd.f32 %v977_v29, %v1318_v50  ;;  %v671_v36 = vadd.f32 %v1025_v30, %v1318_v50  ;;  %v980_v37 = vadd.f32 %v979_v33, %v978_v31  ;;  %v1028_v38 = vadd.f32 %v1027_v34, %v1026_v32 }
 0x110   : > { %v721_v39 = vmax.f32 %v607_v35, 0.0  ;;  %v737_v40 = vmax.f32 %v671_v36, 0.0  ;;  %v610_v41 = vadd.f32 %v980_v37, %v1318_v50  ;;  %v674_v42 = vadd.f32 %v1028_v38, %v1318_v50 }
 0x112   : > { %753 = vst [vmem:[%s1327_s8 + $0x20] sm:$0xff] %v721_v39  ;;  %769 = vst [vmem:[%s1327_s8 + $0xa0] sm:$0xff] %v737_v40  ;;  %v722_v43 = vmax.f32 %v610_v41, 0.0  ;;  %v738_v44 = vmax.f32 %v674_v42, 0.0  ;;  %v981_v45 = vpop.f32.mrb[12].mxu0  ;;  %v1029_v46 = vpop.f32.mrb[12].mxu1 }
 0x113   : > { %v982_v47 = vpop.f32.mrb[13].mxu0  ;;  %v1030_v48 = vpop.f32.mrb[13].mxu1 }
 0x114   : > { %754 = vst [vmem:[%s1327_s8 + $0x28] sm:$0xff] %v722_v43  ;;  %770 = vst [vmem:[%s1327_s8 + $0xa8] sm:$0xff] %v738_v44  ;;  %v983_v49 = vadd.f32 %v982_v47, %v981_v45  ;;  %v1031_v51 = vadd.f32 %v1030_v48, %v1029_v46  ;;  %v984_v52 = vpop.f32.mrb[14].mxu0  ;;  %v1032_v53 = vpop.f32.mrb[14].mxu1 }
 0x115   : > { %v985_v54 = vpop.f32.mrb[15].mxu0  ;;  %v1033_v55 = vpop.f32.mrb[15].mxu1 }
 0x116   : > { %v615_v56 = vadd.f32 %v983_v49, %v1318_v50  ;;  %v679_v57 = vadd.f32 %v1031_v51, %v1318_v50  ;;  %v986_v58 = vadd.f32 %v985_v54, %v984_v52  ;;  %v1034_v59 = vadd.f32 %v1033_v55, %v1032_v53 }
 0x118   : > { %v723_v60 = vmax.f32 %v615_v56, 0.0  ;;  %v739_v61 = vmax.f32 %v679_v57, 0.0  ;;  %v618_v62 = vadd.f32 %v986_v58, %v1318_v50  ;;  %v682_v63 = vadd.f32 %v1034_v59, %v1318_v50 }
 0x11a   : > { %755 = vst [vmem:[%s1327_s8 + $0x30] sm:$0xff] %v723_v60  ;;  %771 = vst [vmem:[%s1327_s8 + $0xb0] sm:$0xff] %v739_v61  ;;  %v724_v0 = vmax.f32 %v618_v62, 0.0  ;;  %v740_v1 = vmax.f32 %v682_v63, 0.0  ;;  %v987_v2 = vpop.f32.mrb[16].mxu0  ;;  %v1035_v3 = vpop.f32.mrb[16].mxu1 }
 0x11b   : > { %v988_v4 = vpop.f32.mrb[17].mxu0  ;;  %v1036_v5 = vpop.f32.mrb[17].mxu1 }
 0x11c   : > { %756 = vst [vmem:[%s1327_s8 + $0x38] sm:$0xff] %v724_v0  ;;  %772 = vst [vmem:[%s1327_s8 + $0xb8] sm:$0xff] %v740_v1  ;;  %v989_v6 = vadd.f32 %v988_v4, %v987_v2  ;;  %v1037_v7 = vadd.f32 %v1036_v5, %v1035_v3  ;;  %v990_v8 = vpop.f32.mrb[18].mxu0  ;;  %v1038_v9 = vpop.f32.mrb[18].mxu1 }
 0x11d   : > { %v991_v10 = vpop.f32.mrb[19].mxu0  ;;  %v1039_v11 = vpop.f32.mrb[19].mxu1 }
 0x11e   : > { %v623_v12 = vadd.f32 %v989_v6, %v1318_v50  ;;  %v687_v13 = vadd.f32 %v1037_v7, %v1318_v50  ;;  %v992_v14 = vadd.f32 %v991_v10, %v990_v8  ;;  %v1040_v15 = vadd.f32 %v1039_v11, %v1038_v9 }
 0x120   : > { %v725_v16 = vmax.f32 %v623_v12, 0.0  ;;  %v741_v17 = vmax.f32 %v687_v13, 0.0  ;;  %v626_v18 = vadd.f32 %v992_v14, %v1318_v50  ;;  %v690_v19 = vadd.f32 %v1040_v15, %v1318_v50 }
 0x122   : > { %757 = vst [vmem:[%s1327_s8 + $0x40] sm:$0xff] %v725_v16  ;;  %773 = vst [vmem:[%s1327_s8 + $0xc0] sm:$0xff] %v741_v17  ;;  %v726_v20 = vmax.f32 %v626_v18, 0.0  ;;  %v742_v21 = vmax.f32 %v690_v19, 0.0  ;;  %v993_v22 = vpop.f32.mrb[20].mxu0  ;;  %v1041_v23 = vpop.f32.mrb[20].mxu1 }
 0x123   : > { %v994_v24 = vpop.f32.mrb[21].mxu0  ;;  %v1042_v25 = vpop.f32.mrb[21].mxu1 }
 0x124   : > { %758 = vst [vmem:[%s1327_s8 + $0x48] sm:$0xff] %v726_v20  ;;  %774 = vst [vmem:[%s1327_s8 + $0xc8] sm:$0xff] %v742_v21  ;;  %v995_v26 = vadd.f32 %v994_v24, %v993_v22  ;;  %v1043_v27 = vadd.f32 %v1042_v25, %v1041_v23  ;;  %v996_v28 = vpop.f32.mrb[22].mxu0  ;;  %v1044_v29 = vpop.f32.mrb[22].mxu1 }
 0x125   : > { %v997_v30 = vpop.f32.mrb[23].mxu0  ;;  %v1045_v31 = vpop.f32.mrb[23].mxu1 }
 0x126   : > { %v631_v32 = vadd.f32 %v995_v26, %v1318_v50  ;;  %v695_v33 = vadd.f32 %v1043_v27, %v1318_v50  ;;  %v998_v34 = vadd.f32 %v997_v30, %v996_v28  ;;  %v1046_v35 = vadd.f32 %v1045_v31, %v1044_v29 }
 0x128   : > { %v727_v36 = vmax.f32 %v631_v32, 0.0  ;;  %v743_v37 = vmax.f32 %v695_v33, 0.0  ;;  %v634_v38 = vadd.f32 %v998_v34, %v1318_v50  ;;  %v698_v39 = vadd.f32 %v1046_v35, %v1318_v50 }
 0x12a   : > { %759 = vst [vmem:[%s1327_s8 + $0x50] sm:$0xff] %v727_v36  ;;  %775 = vst [vmem:[%s1327_s8 + $0xd0] sm:$0xff] %v743_v37  ;;  %v728_v40 = vmax.f32 %v634_v38, 0.0  ;;  %v744_v41 = vmax.f32 %v698_v39, 0.0  ;;  %v999_v42 = vpop.f32.mrb[24].mxu0  ;;  %v1047_v43 = vpop.f32.mrb[24].mxu1 }
 0x12b   : > { %v1000_v44 = vpop.f32.mrb[25].mxu0  ;;  %v1048_v45 = vpop.f32.mrb[25].mxu1 }
 0x12c   : > { %760 = vst [vmem:[%s1327_s8 + $0x58] sm:$0xff] %v728_v40  ;;  %776 = vst [vmem:[%s1327_s8 + $0xd8] sm:$0xff] %v744_v41  ;;  %v1001_v46 = vadd.f32 %v1000_v44, %v999_v42  ;;  %v1049_v47 = vadd.f32 %v1048_v45, %v1047_v43  ;;  %v1002_v48 = vpop.f32.mrb[26].mxu0  ;;  %v1050_v49 = vpop.f32.mrb[26].mxu1 }
 0x12d   : > { %v1003_v51 = vpop.f32.mrb[27].mxu0  ;;  %v1051_v52 = vpop.f32.mrb[27].mxu1 }
 0x12e   : > { %v639_v53 = vadd.f32 %v1001_v46, %v1318_v50  ;;  %v703_v54 = vadd.f32 %v1049_v47, %v1318_v50  ;;  %v1004_v55 = vadd.f32 %v1003_v51, %v1002_v48  ;;  %v1052_v56 = vadd.f32 %v1051_v52, %v1050_v49 }
 0x130   : > { %v729_v57 = vmax.f32 %v639_v53, 0.0  ;;  %v745_v58 = vmax.f32 %v703_v54, 0.0  ;;  %v642_v59 = vadd.f32 %v1004_v55, %v1318_v50  ;;  %v706_v60 = vadd.f32 %v1052_v56, %v1318_v50 }
 0x132   : > { %761 = vst [vmem:[%s1327_s8 + $0x60] sm:$0xff] %v729_v57  ;;  %777 = vst [vmem:[%s1327_s8 + $0xe0] sm:$0xff] %v745_v58  ;;  %v730_v61 = vmax.f32 %v642_v59, 0.0  ;;  %v746_v62 = vmax.f32 %v706_v60, 0.0  ;;  %v1005_v63 = vpop.f32.mrb[28].mxu0  ;;  %v1053_v0 = vpop.f32.mrb[28].mxu1 }
 0x133   : > { %v1006_v1 = vpop.f32.mrb[29].mxu0  ;;  %v1054_v2 = vpop.f32.mrb[29].mxu1 }
 0x134   : > { %762 = vst [vmem:[%s1327_s8 + $0x68] sm:$0xff] %v730_v61  ;;  %778 = vst [vmem:[%s1327_s8 + $0xe8] sm:$0xff] %v746_v62  ;;  %v1007_v3 = vadd.f32 %v1006_v1, %v1005_v63  ;;  %v1055_v4 = vadd.f32 %v1054_v2, %v1053_v0  ;;  %v1008_v5 = vpop.f32.mrb[30].mxu0  ;;  %v1056_v6 = vpop.f32.mrb[30].mxu1 }
 0x135   : > { %v1009_v7 = vpop.f32.mrb[31].mxu0  ;;  %v1057_v8 = vpop.f32.mrb[31].mxu1 }
 0x136   : > { %v647_v9 = vadd.f32 %v1007_v3, %v1318_v50  ;;  %v711_v10 = vadd.f32 %v1055_v4, %v1318_v50  ;;  %v1010_v11 = vadd.f32 %v1009_v7, %v1008_v5  ;;  %v1058_v12 = vadd.f32 %v1057_v8, %v1056_v6 }
 0x138   : > { %v731_v13 = vmax.f32 %v647_v9, 0.0  ;;  %v747_v14 = vmax.f32 %v711_v10, 0.0  ;;  %v650_v15 = vadd.f32 %v1010_v11, %v1318_v50  ;;  %v714_v16 = vadd.f32 %v1058_v12, %v1318_v50 }
 0x13a   : > { %763 = vst [vmem:[%s1327_s8 + $0x70] sm:$0xff] %v731_v13  ;;  %779 = vst [vmem:[%s1327_s8 + $0xf0] sm:$0xff] %v747_v14  ;;  %v732_v17 = vmax.f32 %v650_v15, 0.0  ;;  %v748_v18 = vmax.f32 %v714_v16, 0.0 }
 0x13c   : > { %764 = vst [vmem:[%s1327_s8 + $0x78] sm:$0xff] %v732_v17  ;;  %780 = vst [vmem:[%s1327_s8 + $0xf8] sm:$0xff] %v748_v18 }
 0x13d PF: > { %s13_s14 = sadd.s32 1, %s1185_s14   ;;  %s1404_s12 = smov %s1181_s13 }
 0x13e   : > { %p10_p5 = scmp.ge.s32.totalorder %s13_s14, 4   ;;  %s1405_s13 = smov %s1407_s15 }
 0x140   :  { %12 = sbr.rel (!%p10_p5) target bundleno = 2 (0x2), region = 68 }

// kernel: forward.11
= control target key start
LH: loop header
LB: loop body
LE: loop exit
PB: predicated region body
PF: predicated region fallthrough
CT: control target
= control target key end

     0   :  { %s3117_s12 = smov 0   ;;  %s3119_s13 = smov 0   ;;  %s3493_s0 = inlined_call_operand.vmem [shape: bf16[8,16384], index: 0, kind: input, shape index: {}]   ;;  %s3494_s1 = inlined_call_operand.vmem [shape: bf16[16384,256], index: 1, kind: input, shape index: {}]   ;;  %s3495_s2 = inlined_call_operand.vmem [shape: f32[1,256], index: 2, kind: input, shape index: {}]   ;;  %s3496_s3 = inlined_call_operand.vmem [shape: f32[8,256], index: 3, kind: output, shape index: {}]  }
   0x1   :  { %s3121_s14 = smov 0  }
   0x2 LB: > { %s25_s15 = sadd.s32 1, %s3090_s13  ;;  %p2362_p0 = scmp.ge.s32.totalorder %s3094_s14, 1  ;;  %s3094_s14 = sphi %s3121_s14, %s13_s14   ;;  %s3090_s13 = sphi %s3119_s13, %s3498_s13   ;;  %s3086_s12 = sphi %s3117_s12, %s3497_s12  }
   0x3   : > { %p26_p1 = scmp.ge.s32.totalorder %s25_s15, 8  ;;  %p194_p2 = scmp.lt.s32.totalorder %s3094_s14, 9 }
   0x5   : > { %s3500_s15 = smov (%p26_p1, %s25_s15), 0  ;;  %p195_p3 = pnand %p2362_p0, %p194_p2 }
   0x6   : > { %s2363_s16 = sshll.u32 (!%p195_p3), %s3086_s12, 4  ;;  %s2365_s17 = sshll.u32 (!%p195_p3), %s3086_s12, 8 }
   0x7   : > { %198 = sbr.rel (%p195_p3) target bundleno = 513 (0x201), region = 32  ;;  %p243_p4 = scmp.lt.s32.totalorder (!%p195_p3), %s2363_s16, 127 }
   0x8   : > { %p252_p5 = scmp.lt.s32.totalorder (!%p195_p3), %s2365_s17, 2047  ;;  %p2368_p6 = scmp.ne.s32.totalorder (!%p195_p3), %s3086_s12, 0 }
   0xe   : > { %s3502_s16 = smov (!%p243_p4, %s2363_s16), 127  ;;  %s3504_s17 = smov (!%p252_p5, %s2365_s17), 2047 }
   0xf   : > { %s2364_s18 = sshll.u32 %s3502_s16, 2  ;;  %s2646_s22 = sshll.u32 %s3504_s17, 3  ;;  %v3096_v0 = vmov (!%p2368_p6), 0.0  }
  0x10   : > { %s3142_s21 = scalar_lea.vmem %s3493_s0, %s2364_s18  ;;  %s3147_s25 = scalar_lea.vmem %s3494_s1, %s2646_s22  ;;  %281 = vst [vmem:[%s3496_s3] sm:$0xff] (!%p2368_p6), %v3096_v0  ;;  %282 = vst [vmem:[%s3496_s3 + $0x8] sm:$0xff] (!%p2368_p6), %v3096_v0 }
  0x11   : > { %280 = sbr.rel (%p2368_p6) target bundleno = 24 (0x18), region = 36 }
  0x18 PF: > { %v2672_v1 = vld [vmem:[%s3147_s25 + $0x4] ss:$8 sps:$4 sm:$0xff]   ;;  %v2676_v3 = vld [vmem:[%s3147_s25] ss:$8 sps:$4 sm:$0xff]   ;;  %v2678_v5 = vld [vmem:[%s3147_s25 + $0x14] ss:$8 sps:$4 sm:$0xff]  }
  0x19   : > { %v2674_v2 = vld [vmem:[%s3147_s25 + $0x104] ss:$8 sps:$4 sm:$0xff]   ;;  %1885 = vmatprep.subr.bf16.mxu0 %v2672_v1  ;;  %v2677_v4 = vld [vmem:[%s3147_s25 + $0x100] ss:$8 sps:$4 sm:$0xff]   ;;  %v2680_v6 = vld [vmem:[%s3147_s25 + $0x114] ss:$8 sps:$4 sm:$0xff]  }
  0x1a   : > { %1926 = vmatprep.subr.bf16.mxu1 %v2674_v2  ;;  %1886 = vmatpush1.bf16.msra.mxu0 %v2676_v3  ;;  %v2682_v7 = vld [vmem:[%s3147_s25 + $0x10] ss:$8 sps:$4 sm:$0xff]   ;;  %v2684_v9 = vld [vmem:[%s3147_s25 + $0x24] ss:$8 sps:$4 sm:$0xff]   ;;  %v2688_v11 = vld [vmem:[%s3147_s25 + $0x20] ss:$8 sps:$4 sm:$0xff]  }
  0x1b   : > { %1927 = vmatpush1.bf16.msra.mxu1 %v2677_v4  ;;  %1887 = vmatprep.subr.bf16.mxu0 %v2678_v5  ;;  %v2683_v8 = vld [vmem:[%s3147_s25 + $0x110] ss:$8 sps:$4 sm:$0xff]   ;;  %v2686_v10 = vld [vmem:[%s3147_s25 + $0x124] ss:$8 sps:$4 sm:$0xff]   ;;  %v2689_v12 = vld [vmem:[%s3147_s25 + $0x120] ss:$8 sps:$4 sm:$0xff]  }
  0x1c   : > { %1928 = vmatprep.subr.bf16.mxu1 %v2680_v6  ;;  %v2690_v13 = vld [vmem:[%s3147_s25 + $0x34] ss:$8 sps:$4 sm:$0xff]   ;;  %v2694_v15 = vld [vmem:[%s3147_s25 + $0x30] ss:$8 sps:$4 sm:$0xff]   ;;  %v2696_v17 = vld [vmem:[%s3147_s25 + $0x44] ss:$8 sps:$4 sm:$0xff]  }
  0x1d   : > { %v2692_v14 = vld [vmem:[%s3147_s25 + $0x134] ss:$8 sps:$4 sm:$0xff]   ;;  %v2695_v16 = vld [vmem:[%s3147_s25 + $0x130] ss:$8 sps:$4 sm:$0xff]   ;;  %v2698_v18 = vld [vmem:[%s3147_s25 + $0x144] ss:$8 sps:$4 sm:$0xff]  }
  0x1e   : > { %1888 = vmatpush1.bf16.msra.mxu0 %v2682_v7  ;;  %v2700_v19 = vld [vmem:[%s3147_s25 + $0x40] ss:$8 sps:$4 sm:$0xff]   ;;  %v2702_v21 = vld [vmem:[%s3147_s25 + $0x54] ss:$8 sps:$4 sm:$0xff]   ;;  %v2706_v23 = vld [vmem:[%s3147_s25 + $0x50] ss:$8 sps:$4 sm:$0xff]  }
  0x1f   : > { %1929 = vmatpush1.bf16.msra.mxu1 %v2683_v8  ;;  %1889 = vmatprep.subr.bf16.mxu0 %v2684_v9  ;;  %v2701_v20 = vld [vmem:[%s3147_s25 + $0x140] ss:$8 sps:$4 sm:$0xff]   ;;  %v2704_v22 = vld [vmem:[%s3147_s25 + $0x154] ss:$8 sps:$4 sm:$0xff]   ;;  %v2707_v24 = vld [vmem:[%s3147_s25 + $0x150] ss:$8 sps:$4 sm:$0xff]  }
  0x20   : > { %1930 = vmatprep.subr.bf16.mxu1 %v2686_v10  ;;  %v2708_v25 = vld [vmem:[%s3147_s25 + $0x64] ss:$8 sps:$4 sm:$0xff]   ;;  %v2712_v27 = vld [vmem:[%s3147_s25 + $0x60] ss:$8 sps:$4 sm:$0xff]   ;;  %v2714_v29 = vld [vmem:[%s3147_s25 + $0x74] ss:$8 sps:$4 sm:$0xff]  }
  0x21   : > { %v2710_v26 = vld [vmem:[%s3147_s25 + $0x164] ss:$8 sps:$4 sm:$0xff]   ;;  %v2713_v28 = vld [vmem:[%s3147_s25 + $0x160] ss:$8 sps:$4 sm:$0xff]   ;;  %v2716_v30 = vld [vmem:[%s3147_s25 + $0x174] ss:$8 sps:$4 sm:$0xff]  }
  0x22   : > { %1890 = vmatpush1.bf16.msra.mxu0 %v2688_v11  ;;  %v2718_v31 = vld [vmem:[%s3147_s25 + $0x70] ss:$8 sps:$4 sm:$0xff]   ;;  %v2720_v33 = vld [vmem:[%s3147_s25 + $0x84] ss:$8 sps:$4 sm:$0xff]   ;;  %v2724_v35 = vld [vmem:[%s3147_s25 + $0x80] ss:$8 sps:$4 sm:$0xff]  }
  0x23   : > { %1931 = vmatpush1.bf16.msra.mxu1 %v2689_v12  ;;  %1891 = vmatprep.subr.bf16.mxu0 %v2690_v13  ;;  %v2719_v32 = vld [vmem:[%s3147_s25 + $0x170] ss:$8 sps:$4 sm:$0xff]   ;;  %v2722_v34 = vld [vmem:[%s3147_s25 + $0x184] ss:$8 sps:$4 sm:$0xff]   ;;  %v2725_v36 = vld [vmem:[%s3147_s25 + $0x180] ss:$8 sps:$4 sm:$0xff]  }
  0x24   : > { %1932 = vmatprep.subr.bf16.mxu1 %v2692_v14  ;;  %v2726_v37 = vld [vmem:[%s3147_s25 + $0x94] ss:$8 sps:$4 sm:$0xff]   ;;  %v2730_v39 = vld [vmem:[%s3147_s25 + $0x90] ss:$8 sps:$4 sm:$0xff]   ;;  %v2732_v41 = vld [vmem:[%s3147_s25 + $0xa4] ss:$8 sps:$4 sm:$0xff]  }
  0x25   : > { %v2728_v38 = vld [vmem:[%s3147_s25 + $0x194] ss:$8 sps:$4 sm:$0xff]   ;;  %v2731_v40 = vld [vmem:[%s3147_s25 + $0x190] ss:$8 sps:$4 sm:$0xff]   ;;  %v2734_v42 = vld [vmem:[%s3147_s25 + $0x1a4] ss:$8 sps:$4 sm:$0xff]  }
  0x26   : > { %1892 = vmatpush1.bf16.msra.mxu0 %v2694_v15  ;;  %v2736_v43 = vld [vmem:[%s3147_s25 + $0xa0] ss:$8 sps:$4 sm:$0xff]   ;;  %v2738_v45 = vld [vmem:[%s3147_s25 + $0xb4] ss:$8 sps:$4 sm:$0xff]   ;;  %v2742_v50 = vld [vmem:[%s3147_s25 + $0xb0] ss:$8 sps:$4 sm:$0xff]  }
  0x27   : > { %1933 = vmatpush1.bf16.msra.mxu1 %v2695_v16  ;;  %1893 = vmatprep.subr.bf16.mxu0 %v2696_v17  ;;  %v2737_v44 = vld [vmem:[%s3147_s25 + $0x1a0] ss:$8 sps:$4 sm:$0xff]   ;;  %v2740_v46 = vld [vmem:[%s3147_s25 + $0x1b4] ss:$8 sps:$4 sm:$0xff]   ;;  %v2743_v51 = vld [vmem:[%s3147_s25 + $0x1b0] ss:$8 sps:$4 sm:$0xff]  }
  0x28   : > { %1934 = vmatprep.subr.bf16.mxu1 %v2698_v18  ;;  %v285_v47 = vld [vmem:[%s3142_s21] sm:$0xff]  ;;  %v286_v49 = vld [vmem:[%s3142_s21 + $0x8] sm:$0xff]  ;;  %v2750_v57 = vld [vmem:[%s3147_s25 + $0xd4] ss:$8 sps:$4 sm:$0xff]   ;;  %p2641_p7 = scmp.ne.s32.totalorder %s3086_s12, 7 }
  0x29   : > { %v2370_v48 = vcombine.high %v285_v47, %v285_v47  ;;  %v2372_v52 = vcombine.high %v286_v49, %v286_v49  ;;  %v2744_v53 = vld [vmem:[%s3147_s25 + $0xc4] ss:$8 sps:$4 sm:$0xff]   ;;  %v2748_v55 = vld [vmem:[%s3147_s25 + $0xc0] ss:$8 sps:$4 sm:$0xff]   ;;  %v2752_v58 = vld [vmem:[%s3147_s25 + $0x1d4] ss:$8 sps:$4 sm:$0xff]   ;;  %v2369_v7 = vcombine.low %v285_v47, %v285_v47  ;;  %v2371_v8 = vcombine.low %v286_v49, %v286_v49 }
  0x2a   : > { %1894 = vmatpush1.bf16.msra.mxu0 %v2700_v19  ;;  %v2746_v54 = vld [vmem:[%s3147_s25 + $0x1c4] ss:$8 sps:$4 sm:$0xff]   ;;  %v2749_v56 = vld [vmem:[%s3147_s25 + $0x1c0] ss:$8 sps:$4 sm:$0xff]   ;;  %v2754_v59 = vld [vmem:[%s3147_s25 + $0xd0] ss:$8 sps:$4 sm:$0xff]  }
  0x2b   : > { %1935 = vmatpush1.bf16.msra.mxu1 %v2701_v20  ;;  %1895 = vmatprep.subr.bf16.mxu0 %v2702_v21  ;;  %v2755_v60 = vld [vmem:[%s3147_s25 + $0x1d0] ss:$8 sps:$4 sm:$0xff]   ;;  %v2756_v61 = vld [vmem:[%s3147_s25 + $0xe4] ss:$8 sps:$4 sm:$0xff]   ;;  %v2760_v63 = vld [vmem:[%s3147_s25 + $0xe0] ss:$8 sps:$4 sm:$0xff]  }
  0x2c   : > { %1936 = vmatprep.subr.bf16.mxu1 %v2704_v22  ;;  %1917 = vmatprep.mubr.bf16.mxu0 %v2370_v48  ;;  %v2758_v62 = vld [vmem:[%s3147_s25 + $0x1e4] ss:$8 sps:$4 sm:$0xff]   ;;  %v2761_v0 = vld [vmem:[%s3147_s25 + $0x1e0] ss:$8 sps:$4 sm:$0xff]   ;;  %v2762_v1 = vld [vmem:[%s3147_s25 + $0xf4] ss:$8 sps:$4 sm:$0xff]  }
  0x2d   : > { %1958 = vmatprep.mubr.bf16.mxu1 %v2372_v52  ;;  %v2764_v2 = vld [vmem:[%s3147_s25 + $0x1f4] ss:$8 sps:$4 sm:$0xff]   ;;  %v2766_v3 = vld [vmem:[%s3147_s25 + $0xf0] ss:$8 sps:$4 sm:$0xff]   ;;  %v2774_v5 = vld [vmem:[%s3147_s25 + $0x204] ss:$8 sps:$4 sm:$0xff]  }
  0x2e   : > { %1896 = vmatpush1.bf16.msra.mxu0 %v2706_v23  ;;  %v2767_v4 = vld [vmem:[%s3147_s25 + $0x1f0] ss:$8 sps:$4 sm:$0xff]   ;;  %v2777_v6 = vld [vmem:[%s3147_s25 + $0x304] ss:$8 sps:$4 sm:$0xff]   ;;  %v2772_v9 = vld [vmem:[%s3147_s25 + $0x200] ss:$8 sps:$4 sm:$0xff]  }
  0x2f   : > { %1937 = vmatpush1.bf16.msra.mxu1 %v2707_v24  ;;  %1897 = vmatprep.subr.bf16.mxu0 %v2708_v25  ;;  %v2775_v10 = vld [vmem:[%s3147_s25 + $0x300] ss:$8 sps:$4 sm:$0xff]   ;;  %v2780_v11 = vld [vmem:[%s3147_s25 + $0x214] ss:$8 sps:$4 sm:$0xff]   ;;  %v2778_v13 = vld [vmem:[%s3147_s25 + $0x210] ss:$8 sps:$4 sm:$0xff]  }
  0x30   : > { %1938 = vmatprep.subr.bf16.mxu1 %v2710_v26  ;;  %v2783_v12 = vld [vmem:[%s3147_s25 + $0x314] ss:$8 sps:$4 sm:$0xff]   ;;  %v2781_v14 = vld [vmem:[%s3147_s25 + $0x310] ss:$8 sps:$4 sm:$0xff]   ;;  %v2786_v15 = vld [vmem:[%s3147_s25 + $0x224] ss:$8 sps:$4 sm:$0xff]  }
  0x31   : > { %v2789_v16 = vld [vmem:[%s3147_s25 + $0x324] ss:$8 sps:$4 sm:$0xff]   ;;  %v2784_v17 = vld [vmem:[%s3147_s25 + $0x220] ss:$8 sps:$4 sm:$0xff]   ;;  %v2792_v19 = vld [vmem:[%s3147_s25 + $0x234] ss:$8 sps:$4 sm:$0xff]  }
  0x32   : > { %1898 = vmatpush1.bf16.msra.mxu0 %v2712_v27  ;;  %v2787_v18 = vld [vmem:[%s3147_s25 + $0x320] ss:$8 sps:$4 sm:$0xff]   ;;  %v2795_v20 = vld [vmem:[%s3147_s25 + $0x334] ss:$8 sps:$4 sm:$0xff]   ;;  %v2790_v21 = vld [vmem:[%s3147_s25 + $0x230] ss:$8 sps:$4 sm:$0xff]  }
  0x33   : > { %1939 = vmatpush1.bf16.msra.mxu1 %v2713_v28  ;;  %1899 = vmatprep.subr.bf16.mxu0 %v2714_v29  ;;  %v2793_v22 = vld [vmem:[%s3147_s25 + $0x330] ss:$8 sps:$4 sm:$0xff]   ;;  %v2798_v23 = vld [vmem:[%s3147_s25 + $0x244] ss:$8 sps:$4 sm:$0xff]   ;;  %v2796_v25 = vld [vmem:[%s3147_s25 + $0x240] ss:$8 sps:$4 sm:$0xff]  }
  0x34   : > { %1940 = vmatprep.subr.bf16.mxu1 %v2716_v30  ;;  %v2801_v24 = vld [vmem:[%s3147_s25 + $0x344] ss:$8 sps:$4 sm:$0xff]   ;;  %v2799_v26 = vld [vmem:[%s3147_s25 + $0x340] ss:$8 sps:$4 sm:$0xff]   ;;  %v2804_v27 = vld [vmem:[%s3147_s25 + $0x254] ss:$8 sps:$4 sm:$0xff]  }
  0x35   : > { %v2807_v28 = vld [vmem:[%s3147_s25 + $0x354] ss:$8 sps:$4 sm:$0xff]   ;;  %v2802_v29 = vld [vmem:[%s3147_s25 + $0x250] ss:$8 sps:$4 sm:$0xff]   ;;  %v2837_v52 = vld [vmem:[%s3147_s25 + $0x3a4] ss:$8 sps:$4 sm:$0xff]  }
  0x36   : > { %1900 = vmatpush1.bf16.msra.mxu0 %v2718_v31  ;;  %v2805_v30 = vld [vmem:[%s3147_s25 + $0x350] ss:$8 sps:$4 sm:$0xff]   ;;  %v2810_v31 = vld [vmem:[%s3147_s25 + $0x264] ss:$8 sps:$4 sm:$0xff]   ;;  %v2828_v47 = vld [vmem:[%s3147_s25 + $0x294] ss:$8 sps:$4 sm:$0xff]  }
  0x37   : > { %1941 = vmatpush1.bf16.msra.mxu1 %v2719_v32  ;;  %1901 = vmatprep.subr.bf16.mxu0 %v2720_v33  ;;  %v2813_v32 = vld [vmem:[%s3147_s25 + $0x364] ss:$8 sps:$4 sm:$0xff]   ;;  %v3249_v33 = vld [vmem:[%s3142_s21 + $0x10] sm:$0xff] }
  0x38   : > { %1942 = vmatprep.subr.bf16.mxu1 %v2722_v34  ;;  %v3252_v34 = vld [vmem:[%s3142_s21 + $0x18] sm:$0xff] }
  0x39   : > { %v2831_v48 = vld [vmem:[%s3147_s25 + $0x394] ss:$8 sps:$4 sm:$0xff]   ;;  %v2826_v49 = vld [vmem:[%s3147_s25 + $0x290] ss:$8 sps:$4 sm:$0xff]  }
  0x3a   : > { %1902 = vmatpush1.bf16.msra.mxu0 %v2724_v35  ;;  %v2808_v35 = vld [vmem:[%s3147_s25 + $0x260] ss:$8 sps:$4 sm:$0xff]  }
  0x3b   : > { %1943 = vmatpush1.bf16.msra.mxu1 %v2725_v36  ;;  %1903 = vmatprep.subr.bf16.mxu0 %v2726_v37  ;;  %v2811_v36 = vld [vmem:[%s3147_s25 + $0x360] ss:$8 sps:$4 sm:$0xff]   ;;  %v2374_v37 = vcombine.high %v3249_v33, %v3249_v33 }
  0x3c   : > { %1944 = vmatprep.subr.bf16.mxu1 %v2728_v38  ;;  %v2376_v38 = vcombine.high %v3252_v34, %v3252_v34 }
  0x3e   : > { %1904 = vmatpush1.bf16.msra.mxu0 %v2730_v39  ;;  %v2816_v39 = vld [vmem:[%s3147_s25 + $0x274] ss:$8 sps:$4 sm:$0xff]  }
  0x3f   : > { %1945 = vmatpush1.bf16.msra.mxu1 %v2731_v40  ;;  %1905 = vmatprep.subr.bf16.mxu0 %v2732_v41  ;;  %v2819_v40 = vld [vmem:[%s3147_s25 + $0x374] ss:$8 sps:$4 sm:$0xff]   ;;  %v2814_v41 = vld [vmem:[%s3147_s25 + $0x270] ss:$8 sps:$4 sm:$0xff]  }
  0x40   : > { %1946 = vmatprep.subr.bf16.mxu1 %v2734_v42  ;;  %v2817_v42 = vld [vmem:[%s3147_s25 + $0x370] ss:$8 sps:$4 sm:$0xff]  }
  0x42   : > { %1906 = vmatpush1.bf16.msra.mxu0 %v2736_v43  ;;  %v2822_v43 = vld [vmem:[%s3147_s25 + $0x284] ss:$8 sps:$4 sm:$0xff]  }
  0x43   : > { %1947 = vmatpush1.bf16.msra.mxu1 %v2737_v44  ;;  %1907 = vmatprep.subr.bf16.mxu0 %v2738_v45  ;;  %v2825_v44 = vld [vmem:[%s3147_s25 + $0x384] ss:$8 sps:$4 sm:$0xff]   ;;  %v2820_v45 = vld [vmem:[%s3147_s25 + $0x280] ss:$8 sps:$4 sm:$0xff]  }
  0x44   : > { %1948 = vmatprep.subr.bf16.mxu1 %v2740_v46  ;;  %v2823_v46 = vld [vmem:[%s3147_s25 + $0x380] ss:$8 sps:$4 sm:$0xff]  }
  0x46   : > { %1908 = vmatpush1.bf16.msra.mxu0 %v2742_v50  ;;  %v2829_v50 = vld [vmem:[%s3147_s25 + $0x390] ss:$8 sps:$4 sm:$0xff]  }
  0x47   : > { %1949 = vmatpush1.bf16.msra.mxu1 %v2743_v51  ;;  %1909 = vmatprep.subr.bf16.mxu0 %v2744_v53  ;;  %v2834_v51 = vld [vmem:[%s3147_s25 + $0x2a4] ss:$8 sps:$4 sm:$0xff]   ;;  %v2832_v53 = vld [vmem:[%s3147_s25 + $0x2a0] ss:$8 sps:$4 sm:$0xff]  }
  0x48   : > { %1950 = vmatprep.subr.bf16.mxu1 %v2746_v54  ;;  %v2835_v54 = vld [vmem:[%s3147_s25 + $0x3a0] ss:$8 sps:$4 sm:$0xff]  }
  0x4a   : > { %1910 = vmatpush1.bf16.msra.mxu0 %v2748_v55  ;;  %v2840_v55 = vld [vmem:[%s3147_s25 + $0x2b4] ss:$8 sps:$4 sm:$0xff]  }
  0x4b   : > { %1951 = vmatpush1.bf16.msra.mxu1 %v2749_v56  ;;  %1911 = vmatprep.subr.bf16.mxu0 %v2750_v57  ;;  %v2843_v56 = vld [vmem:[%s3147_s25 + $0x3b4] ss:$8 sps:$4 sm:$0xff]   ;;  %v2838_v57 = vld [vmem:[%s3147_s25 + $0x2b0] ss:$8 sps:$4 sm:$0xff]  }
  0x4c   : > { %1952 = vmatprep.subr.bf16.mxu1 %v2752_v58  ;;  %v2841_v58 = vld [vmem:[%s3147_s25 + $0x3b0] ss:$8 sps:$4 sm:$0xff]  }
  0x4e   : > { %1912 = vmatpush1.bf16.msra.mxu0 %v2754_v59  ;;  %v2846_v59 = vld [vmem:[%s3147_s25 + $0x2c4] ss:$8 sps:$4 sm:$0xff]  }
  0x4f   : > { %1953 = vmatpush1.bf16.msra.mxu1 %v2755_v60  ;;  %1913 = vmatprep.subr.bf16.mxu0 %v2756_v61  ;;  %v2849_v60 = vld [vmem:[%s3147_s25 + $0x3c4] ss:$8 sps:$4 sm:$0xff]   ;;  %v2844_v61 = vld [vmem:[%s3147_s25 + $0x2c0] ss:$8 sps:$4 sm:$0xff]  }
  0x50   : > { %1954 = vmatprep.subr.bf16.mxu1 %v2758_v62  ;;  %v2847_v62 = vld [vmem:[%s3147_s25 + $0x3c0] ss:$8 sps:$4 sm:$0xff]  }
  0x52   : > { %1914 = vmatpush1.bf16.msra.mxu0 %v2760_v63  ;;  %v2852_v63 = vld [vmem:[%s3147_s25 + $0x2d4] ss:$8 sps:$4 sm:$0xff]  }
  0x53   : > { %1955 = vmatpush1.bf16.msra.mxu1 %v2761_v0  ;;  %1915 = vmatprep.subr.bf16.mxu0 %v2762_v1  ;;  %v2855_v0 = vld [vmem:[%s3147_s25 + $0x3d4] ss:$8 sps:$4 sm:$0xff]   ;;  %v2850_v1 = vld [vmem:[%s3147_s25 + $0x2d0] ss:$8 sps:$4 sm:$0xff]  }
  0x54   : > { %1956 = vmatprep.subr.bf16.mxu1 %v2764_v2  ;;  %v2853_v2 = vld [vmem:[%s3147_s25 + $0x3d0] ss:$8 sps:$4 sm:$0xff]  }
  0x56   : > { %1916 = vmatpush1.bf16.msra.mxu0 %v2766_v3  ;;  %v2858_v3 = vld [vmem:[%s3147_s25 + $0x2e4] ss:$8 sps:$4 sm:$0xff]  }
  0x57   : > { %1957 = vmatpush1.bf16.msra.mxu1 %v2767_v4  ;;  %1967 = vmatprep.subr.bf16.mxu0 %v2774_v5  ;;  %v2861_v4 = vld [vmem:[%s3147_s25 + $0x3e4] ss:$8 sps:$4 sm:$0xff]   ;;  %v2856_v5 = vld [vmem:[%s3147_s25 + $0x2e0] ss:$8 sps:$4 sm:$0xff]  }
  0x58   : > { %2008 = vmatprep.subr.bf16.mxu1 %v2777_v6  ;;  %v2859_v6 = vld [vmem:[%s3147_s25 + $0x3e0] ss:$8 sps:$4 sm:$0xff]  }
  0x59   : > { %1918 = vmatmul.mubr.bf16.vlgmr.msra.gmra.mrb[0].mxu0 %v2369_v7  ;;  %v2864_v7 = vld [vmem:[%s3147_s25 + $0x2f4] ss:$8 sps:$4 sm:$0xff]  }
  0x5a   : > { %1959 = vmatmul.mubr.bf16.vlgmr.msra.gmra.mrb[0].mxu1 %v2371_v8  ;;  %1968 = vmatpush1.bf16.msra.mxu0 %v2772_v9  ;;  %v2867_v8 = vld [vmem:[%s3147_s25 + $0x3f4] ss:$8 sps:$4 sm:$0xff]   ;;  %v2862_v9 = vld [vmem:[%s3147_s25 + $0x2f0] ss:$8 sps:$4 sm:$0xff]  }
  0x5b   : > { %2009 = vmatpush1.bf16.msra.mxu1 %v2775_v10  ;;  %1969 = vmatprep.subr.bf16.mxu0 %v2780_v11  ;;  %v2865_v10 = vld [vmem:[%s3147_s25 + $0x3f0] ss:$8 sps:$4 sm:$0xff]   ;;  %v2874_v11 = vld [vmem:[%s3147_s25 + $0x404] ss:$8 sps:$4 sm:$0xff]  }
  0x5c   : > { %2010 = vmatprep.subr.bf16.mxu1 %v2783_v12  ;;  %1999 = vmatprep.mubr.bf16.mxu0 %v2374_v37  ;;  %v2877_v12 = vld [vmem:[%s3147_s25 + $0x504] ss:$8 sps:$4 sm:$0xff]   ;;  %v2904_v37 = vld [vmem:[%s3147_s25 + $0x454] ss:$8 sps:$4 sm:$0xff]  }
  0x5d   : > { %2040 = vmatprep.mubr.bf16.mxu1 %v2376_v38  ;;  %v2907_v38 = vld [vmem:[%s3147_s25 + $0x554] ss:$8 sps:$4 sm:$0xff]  }
  0x5e   : > { %1970 = vmatpush1.bf16.msra.mxu0 %v2778_v13  ;;  %v2373_v13 = vcombine.low %v3249_v33, %v3249_v33  ;;  %v2898_v33 = vld [vmem:[%s3147_s25 + $0x444] ss:$8 sps:$4 sm:$0xff]  }
  0x5f   : > { %2011 = vmatpush1.bf16.msra.mxu1 %v2781_v14  ;;  %1971 = vmatprep.subr.bf16.mxu0 %v2786_v15  ;;  %v2375_v14 = vcombine.low %v3252_v34, %v3252_v34  ;;  %v2872_v15 = vld [vmem:[%s3147_s25 + $0x400] ss:$8 sps:$4 sm:$0xff]   ;;  %v2901_v34 = vld [vmem:[%s3147_s25 + $0x544] ss:$8 sps:$4 sm:$0xff]  }
  0x60   : > { %2012 = vmatprep.subr.bf16.mxu1 %v2789_v16  ;;  %v2875_v16 = vld [vmem:[%s3147_s25 + $0x500] ss:$8 sps:$4 sm:$0xff]  }
  0x62   : > { %1972 = vmatpush1.bf16.msra.mxu0 %v2784_v17  ;;  %v2880_v17 = vld [vmem:[%s3147_s25 + $0x414] ss:$8 sps:$4 sm:$0xff]  }
  0x63   : > { %2013 = vmatpush1.bf16.msra.mxu1 %v2787_v18  ;;  %1973 = vmatprep.subr.bf16.mxu0 %v2792_v19  ;;  %v2883_v18 = vld [vmem:[%s3147_s25 + $0x514] ss:$8 sps:$4 sm:$0xff]   ;;  %v3307_v19 = vld [vmem:[%s3142_s21 + $0x20] sm:$0xff] }
  0x64   : > { %2014 = vmatprep.subr.bf16.mxu1 %v2795_v20  ;;  %v3310_v20 = vld [vmem:[%s3142_s21 + $0x28] sm:$0xff] }
  0x66   : > { %1974 = vmatpush1.bf16.msra.mxu0 %v2790_v21  ;;  %v2378_v21 = vcombine.high %v3307_v19, %v3307_v19 }
  0x67   : > { %2015 = vmatpush1.bf16.msra.mxu1 %v2793_v22  ;;  %1975 = vmatprep.subr.bf16.mxu0 %v2798_v23  ;;  %v2380_v22 = vcombine.high %v3310_v20, %v3310_v20  ;;  %v2878_v23 = vld [vmem:[%s3147_s25 + $0x410] ss:$8 sps:$4 sm:$0xff]  }
  0x68   : > { %2016 = vmatprep.subr.bf16.mxu1 %v2801_v24  ;;  %v2881_v24 = vld [vmem:[%s3147_s25 + $0x510] ss:$8 sps:$4 sm:$0xff]  }
  0x6a   : > { %1976 = vmatpush1.bf16.msra.mxu0 %v2796_v25  ;;  %v2886_v25 = vld [vmem:[%s3147_s25 + $0x424] ss:$8 sps:$4 sm:$0xff]  }
  0x6b   : > { %2017 = vmatpush1.bf16.msra.mxu1 %v2799_v26  ;;  %1977 = vmatprep.subr.bf16.mxu0 %v2804_v27  ;;  %v2889_v26 = vld [vmem:[%s3147_s25 + $0x524] ss:$8 sps:$4 sm:$0xff]   ;;  %v2884_v27 = vld [vmem:[%s3147_s25 + $0x420] ss:$8 sps:$4 sm:$0xff]  }
  0x6c   : > { %2018 = vmatprep.subr.bf16.mxu1 %v2807_v28  ;;  %v2887_v28 = vld [vmem:[%s3147_s25 + $0x520] ss:$8 sps:$4 sm:$0xff]  }
  0x6e   : > { %1978 = vmatpush1.bf16.msra.mxu0 %v2802_v29  ;;  %v2892_v29 = vld [vmem:[%s3147_s25 + $0x434] ss:$8 sps:$4 sm:$0xff]  }
  0x6f   : > { %2019 = vmatpush1.bf16.msra.mxu1 %v2805_v30  ;;  %1979 = vmatprep.subr.bf16.mxu0 %v2810_v31  ;;  %v2895_v30 = vld [vmem:[%s3147_s25 + $0x534] ss:$8 sps:$4 sm:$0xff]   ;;  %v2890_v31 = vld [vmem:[%s3147_s25 + $0x430] ss:$8 sps:$4 sm:$0xff]  }
  0x70   : > { %2020 = vmatprep.subr.bf16.mxu1 %v2813_v32  ;;  %v2893_v32 = vld [vmem:[%s3147_s25 + $0x530] ss:$8 sps:$4 sm:$0xff]  }
  0x72   : > { %1980 = vmatpush1.bf16.msra.mxu0 %v2808_v35  ;;  %v2896_v35 = vld [vmem:[%s3147_s25 + $0x440] ss:$8 sps:$4 sm:$0xff]  }
  0x73   : > { %2021 = vmatpush1.bf16.msra.mxu1 %v2811_v36  ;;  %1981 = vmatprep.subr.bf16.mxu0 %v2816_v39  ;;  %v2899_v36 = vld [vmem:[%s3147_s25 + $0x540] ss:$8 sps:$4 sm:$0xff]   ;;  %v2902_v39 = vld [vmem:[%s3147_s25 + $0x450] ss:$8 sps:$4 sm:$0xff]  }
  0x74   : > { %2022 = vmatprep.subr.bf16.mxu1 %v2819_v40  ;;  %v2905_v40 = vld [vmem:[%s3147_s25 + $0x550] ss:$8 sps:$4 sm:$0xff]  }
  0x76   : > { %1982 = vmatpush1.bf16.msra.mxu0 %v2814_v41  ;;  %v2910_v41 = vld [vmem:[%s3147_s25 + $0x464] ss:$8 sps:$4 sm:$0xff]  }
  0x77   : > { %2023 = vmatpush1.bf16.msra.mxu1 %v2817_v42  ;;  %1983 = vmatprep.subr.bf16.mxu0 %v2822_v43  ;;  %v2913_v42 = vld [vmem:[%s3147_s25 + $0x564] ss:$8 sps:$4 sm:$0xff]   ;;  %v2908_v43 = vld [vmem:[%s3147_s25 + $0x460] ss:$8 sps:$4 sm:$0xff]  }
  0x78   : > { %2024 = vmatprep.subr.bf16.mxu1 %v2825_v44  ;;  %v2911_v44 = vld [vmem:[%s3147_s25 + $0x560] ss:$8 sps:$4 sm:$0xff]  }
  0x7a   : > { %1984 = vmatpush1.bf16.msra.mxu0 %v2820_v45  ;;  %v2916_v45 = vld [vmem:[%s3147_s25 + $0x474] ss:$8 sps:$4 sm:$0xff]  }
  0x7b   : > { %2025 = vmatpush1.bf16.msra.mxu1 %v2823_v46  ;;  %1985 = vmatprep.subr.bf16.mxu0 %v2828_v47  ;;  %v2919_v46 = vld [vmem:[%s3147_s25 + $0x574] ss:$8 sps:$4 sm:$0xff]   ;;  %v2914_v47 = vld [vmem:[%s3147_s25 + $0x470] ss:$8 sps:$4 sm:$0xff]  }
  0x7c   : > { %2026 = vmatprep.subr.bf16.mxu1 %v2831_v48  ;;  %v2917_v48 = vld [vmem:[%s3147_s25 + $0x570] ss:$8 sps:$4 sm:$0xff]  }
  0x7e   : > { %1986 = vmatpush1.bf16.msra.mxu0 %v2826_v49  ;;  %v2922_v49 = vld [vmem:[%s3147_s25 + $0x484] ss:$8 sps:$4 sm:$0xff]  }
  0x7f   : > { %2027 = vmatpush1.bf16.msra.mxu1 %v2829_v50  ;;  %1987 = vmatprep.subr.bf16.mxu0 %v2834_v51  ;;  %v2925_v50 = vld [vmem:[%s3147_s25 + $0x584] ss:$8 sps:$4 sm:$0xff]   ;;  %v2920_v51 = vld [vmem:[%s3147_s25 + $0x480] ss:$8 sps:$4 sm:$0xff]  }
  0x80   : > { %2028 = vmatprep.subr.bf16.mxu1 %v2837_v52  ;;  %v2923_v52 = vld [vmem:[%s3147_s25 + $0x580] ss:$8 sps:$4 sm:$0xff]  }
  0x82   : > { %1988 = vmatpush1.bf16.msra.mxu0 %v2832_v53  ;;  %v2928_v53 = vld [vmem:[%s3147_s25 + $0x494] ss:$8 sps:$4 sm:$0xff]  }
  0x83   : > { %2029 = vmatpush1.bf16.msra.mxu1 %v2835_v54  ;;  %1989 = vmatprep.subr.bf16.mxu0 %v2840_v55  ;;  %v2931_v54 = vld [vmem:[%s3147_s25 + $0x594] ss:$8 sps:$4 sm:$0xff]   ;;  %v2926_v55 = vld [vmem:[%s3147_s25 + $0x490] ss:$8 sps:$4 sm:$0xff]  }
  0x84   : > { %2030 = vmatprep.subr.bf16.mxu1 %v2843_v56  ;;  %v2929_v56 = vld [vmem:[%s3147_s25 + $0x590] ss:$8 sps:$4 sm:$0xff]  }
  0x86   : > { %1990 = vmatpush1.bf16.msra.mxu0 %v2838_v57  ;;  %v2934_v57 = vld [vmem:[%s3147_s25 + $0x4a4] ss:$8 sps:$4 sm:$0xff]  }
  0x87   : > { %2031 = vmatpush1.bf16.msra.mxu1 %v2841_v58  ;;  %1991 = vmatprep.subr.bf16.mxu0 %v2846_v59  ;;  %v2937_v58 = vld [vmem:[%s3147_s25 + $0x5a4] ss:$8 sps:$4 sm:$0xff]   ;;  %v2932_v59 = vld [vmem:[%s3147_s25 + $0x4a0] ss:$8 sps:$4 sm:$0xff]  }
  0x88   : > { %2032 = vmatprep.subr.bf16.mxu1 %v2849_v60  ;;  %v2935_v60 = vld [vmem:[%s3147_s25 + $0x5a0] ss:$8 sps:$4 sm:$0xff]  }
  0x8a   : > { %1992 = vmatpush1.bf16.msra.mxu0 %v2844_v61  ;;  %v2940_v61 = vld [vmem:[%s3147_s25 + $0x4b4] ss:$8 sps:$4 sm:$0xff]  }
  0x8b   : > { %2033 = vmatpush1.bf16.msra.mxu1 %v2847_v62  ;;  %1993 = vmatprep.subr.bf16.mxu0 %v2852_v63  ;;  %v2943_v62 = vld [vmem:[%s3147_s25 + $0x5b4] ss:$8 sps:$4 sm:$0xff]   ;;  %v2938_v63 = vld [vmem:[%s3147_s25 + $0x4b0] ss:$8 sps:$4 sm:$0xff]  }
  0x8c   : > { %2034 = vmatprep.subr.bf16.mxu1 %v2855_v0  ;;  %v2941_v0 = vld [vmem:[%s3147_s25 + $0x5b0] ss:$8 sps:$4 sm:$0xff]  }
  0x8e   : > { %1994 = vmatpush1.bf16.msra.mxu0 %v2850_v1  ;;  %v2946_v1 = vld [vmem:[%s3147_s25 + $0x4c4] ss:$8 sps:$4 sm:$0xff]  }
  0x8f   : > { %2035 = vmatpush1.bf16.msra.mxu1 %v2853_v2  ;;  %1995 = vmatprep.subr.bf16.mxu0 %v2858_v3  ;;  %v2949_v2 = vld [vmem:[%s3147_s25 + $0x5c4] ss:$8 sps:$4 sm:$0xff]   ;;  %v2944_v3 = vld [vmem:[%s3147_s25 + $0x4c0] ss:$8 sps:$4 sm:$0xff]  }
  0x90   : > { %2036 = vmatprep.subr.bf16.mxu1 %v2861_v4  ;;  %v2947_v4 = vld [vmem:[%s3147_s25 + $0x5c0] ss:$8 sps:$4 sm:$0xff]  }
  0x92   : > { %1996 = vmatpush1.bf16.msra.mxu0 %v2856_v5  ;;  %v2952_v5 = vld [vmem:[%s3147_s25 + $0x4d4] ss:$8 sps:$4 sm:$0xff]  }
  0x93   : > { %2037 = vmatpush1.bf16.msra.mxu1 %v2859_v6  ;;  %1997 = vmatprep.subr.bf16.mxu0 %v2864_v7  ;;  %v2955_v6 = vld [vmem:[%s3147_s25 + $0x5d4] ss:$8 sps:$4 sm:$0xff]   ;;  %v2950_v7 = vld [vmem:[%s3147_s25 + $0x4d0] ss:$8 sps:$4 sm:$0xff]  }
  0x94   : > { %2038 = vmatprep.subr.bf16.mxu1 %v2867_v8  ;;  %v2953_v8 = vld [vmem:[%s3147_s25 + $0x5d0] ss:$8 sps:$4 sm:$0xff]  }
  0x96   : > { %1998 = vmatpush1.bf16.msra.mxu0 %v2862_v9  ;;  %v2958_v9 = vld [vmem:[%s3147_s25 + $0x4e4] ss:$8 sps:$4 sm:$0xff]  }
  0x97   : > { %2039 = vmatpush1.bf16.msra.mxu1 %v2865_v10  ;;  %2049 = vmatprep.subr.bf16.mxu0 %v2874_v11  ;;  %v2961_v10 = vld [vmem:[%s3147_s25 + $0x5e4] ss:$8 sps:$4 sm:$0xff]   ;;  %v2956_v11 = vld [vmem:[%s3147_s25 + $0x4e0] ss:$8 sps:$4 sm:$0xff]  }
  0x98   : > { %2090 = vmatprep.subr.bf16.mxu1 %v2877_v12  ;;  %v2959_v12 = vld [vmem:[%s3147_s25 + $0x5e0] ss:$8 sps:$4 sm:$0xff]  }
  0x99   : > { %2000 = vmatmul.mubr.bf16.vlgmr.msra.gmra.mrb[4].mxu0 %v2373_v13  ;;  %v2964_v13 = vld [vmem:[%s3147_s25 + $0x4f4] ss:$8 sps:$4 sm:$0xff]  }
  0x9a   : > { %2041 = vmatmul.mubr.bf16.vlgmr.msra.gmra.mrb[4].mxu1 %v2375_v14  ;;  %2050 = vmatpush1.bf16.msra.mxu0 %v2872_v15  ;;  %v2967_v14 = vld [vmem:[%s3147_s25 + $0x5f4] ss:$8 sps:$4 sm:$0xff]   ;;  %v2962_v15 = vld [vmem:[%s3147_s25 + $0x4f0] ss:$8 sps:$4 sm:$0xff]  }
  0x9b   : > { %2091 = vmatpush1.bf16.msra.mxu1 %v2875_v16  ;;  %2051 = vmatprep.subr.bf16.mxu0 %v2880_v17  ;;  %v2965_v16 = vld [vmem:[%s3147_s25 + $0x5f0] ss:$8 sps:$4 sm:$0xff]   ;;  %v2974_v17 = vld [vmem:[%s3147_s25 + $0x604] ss:$8 sps:$4 sm:$0xff]  }
  0x9c   : > { %2092 = vmatprep.subr.bf16.mxu1 %v2883_v18  ;;  %2081 = vmatprep.mubr.bf16.mxu0 %v2378_v21  ;;  %v2977_v18 = vld [vmem:[%s3147_s25 + $0x704] ss:$8 sps:$4 sm:$0xff]   ;;  %v2377_v21 = vcombine.low %v3307_v19, %v3307_v19 }
  0x9d   : > { %2122 = vmatprep.mubr.bf16.mxu1 %v2380_v22  ;;  %v2379_v22 = vcombine.low %v3310_v20, %v3310_v20 }
  0x9e   : > { %2052 = vmatpush1.bf16.msra.mxu0 %v2878_v23  ;;  %v3381_v23 = vld [vmem:[%s3142_s21 + $0x30] sm:$0xff] }
  0x9f   : > { %2093 = vmatpush1.bf16.msra.mxu1 %v2881_v24  ;;  %2053 = vmatprep.subr.bf16.mxu0 %v2886_v25  ;;  %v3384_v24 = vld [vmem:[%s3142_s21 + $0x38] sm:$0xff]  ;;  %v2972_v25 = vld [vmem:[%s3147_s25 + $0x600] ss:$8 sps:$4 sm:$0xff]   ;;  %v2382_v19 = vcombine.high %v3381_v23, %v3381_v23 }
  0xa0   : > { %2094 = vmatprep.subr.bf16.mxu1 %v2889_v26  ;;  %v2975_v26 = vld [vmem:[%s3147_s25 + $0x700] ss:$8 sps:$4 sm:$0xff]   ;;  %v2384_v20 = vcombine.high %v3384_v24, %v3384_v24 }
  0xa2   : > { %2054 = vmatpush1.bf16.msra.mxu0 %v2884_v27  ;;  %v2980_v27 = vld [vmem:[%s3147_s25 + $0x614] ss:$8 sps:$4 sm:$0xff]  }
  0xa3   : > { %2095 = vmatpush1.bf16.msra.mxu1 %v2887_v28  ;;  %2055 = vmatprep.subr.bf16.mxu0 %v2892_v29  ;;  %v2983_v28 = vld [vmem:[%s3147_s25 + $0x714] ss:$8 sps:$4 sm:$0xff]   ;;  %v2978_v29 = vld [vmem:[%s3147_s25 + $0x610] ss:$8 sps:$4 sm:$0xff]  }
  0xa4   : > { %2096 = vmatprep.subr.bf16.mxu1 %v2895_v30  ;;  %v2981_v30 = vld [vmem:[%s3147_s25 + $0x710] ss:$8 sps:$4 sm:$0xff]  }
  0xa6   : > { %2056 = vmatpush1.bf16.msra.mxu0 %v2890_v31  ;;  %v2986_v31 = vld [vmem:[%s3147_s25 + $0x624] ss:$8 sps:$4 sm:$0xff]  }
  0xa7   : > { %2097 = vmatpush1.bf16.msra.mxu1 %v2893_v32  ;;  %2057 = vmatprep.subr.bf16.mxu0 %v2898_v33  ;;  %v2989_v32 = vld [vmem:[%s3147_s25 + $0x724] ss:$8 sps:$4 sm:$0xff]   ;;  %v2984_v33 = vld [vmem:[%s3147_s25 + $0x620] ss:$8 sps:$4 sm:$0xff]  }
  0xa8   : > { %2098 = vmatprep.subr.bf16.mxu1 %v2901_v34  ;;  %v2987_v34 = vld [vmem:[%s3147_s25 + $0x720] ss:$8 sps:$4 sm:$0xff]  }
  0xaa   : > { %2058 = vmatpush1.bf16.msra.mxu0 %v2896_v35  ;;  %v2992_v35 = vld [vmem:[%s3147_s25 + $0x634] ss:$8 sps:$4 sm:$0xff]  }
  0xab   : > { %2099 = vmatpush1.bf16.msra.mxu1 %v2899_v36  ;;  %2059 = vmatprep.subr.bf16.mxu0 %v2904_v37  ;;  %v2995_v36 = vld [vmem:[%s3147_s25 + $0x734] ss:$8 sps:$4 sm:$0xff]   ;;  %v2990_v37 = vld [vmem:[%s3147_s25 + $0x630] ss:$8 sps:$4 sm:$0xff]  }
  0xac   : > { %2100 = vmatprep.subr.bf16.mxu1 %v2907_v38  ;;  %v2993_v38 = vld [vmem:[%s3147_s25 + $0x730] ss:$8 sps:$4 sm:$0xff]  }
  0xae   : > { %2060 = vmatpush1.bf16.msra.mxu0 %v2902_v39  ;;  %v2998_v39 = vld [vmem:[%s3147_s25 + $0x644] ss:$8 sps:$4 sm:$0xff]  }
  0xaf   : > { %2101 = vmatpush1.bf16.msra.mxu1 %v2905_v40  ;;  %2061 = vmatprep.subr.bf16.mxu0 %v2910_v41  ;;  %v3001_v40 = vld [vmem:[%s3147_s25 + $0x744] ss:$8 sps:$4 sm:$0xff]   ;;  %v2996_v41 = vld [vmem:[%s3147_s25 + $0x640] ss:$8 sps:$4 sm:$0xff]  }
  0xb0   : > { %2102 = vmatprep.subr.bf16.mxu1 %v2913_v42  ;;  %v2999_v42 = vld [vmem:[%s3147_s25 + $0x740] ss:$8 sps:$4 sm:$0xff]  }
  0xb2   : > { %2062 = vmatpush1.bf16.msra.mxu0 %v2908_v43  ;;  %v3004_v43 = vld [vmem:[%s3147_s25 + $0x654] ss:$8 sps:$4 sm:$0xff]  }
  0xb3   : > { %2103 = vmatpush1.bf16.msra.mxu1 %v2911_v44  ;;  %2063 = vmatprep.subr.bf16.mxu0 %v2916_v45  ;;  %v3007_v44 = vld [vmem:[%s3147_s25 + $0x754] ss:$8 sps:$4 sm:$0xff]   ;;  %v3002_v45 = vld [vmem:[%s3147_s25 + $0x650] ss:$8 sps:$4 sm:$0xff]  }
  0xb4   : > { %2104 = vmatprep.subr.bf16.mxu1 %v2919_v46  ;;  %v3005_v46 = vld [vmem:[%s3147_s25 + $0x750] ss:$8 sps:$4 sm:$0xff]  }
  0xb6   : > { %2064 = vmatpush1.bf16.msra.mxu0 %v2914_v47  ;;  %v3010_v47 = vld [vmem:[%s3147_s25 + $0x664] ss:$8 sps:$4 sm:$0xff]  }
  0xb7   : > { %2105 = vmatpush1.bf16.msra.mxu1 %v2917_v48  ;;  %2065 = vmatprep.subr.bf16.mxu0 %v2922_v49  ;;  %v3013_v48 = vld [vmem:[%s3147_s25 + $0x764] ss:$8 sps:$4 sm:$0xff]   ;;  %v3008_v49 = vld [vmem:[%s3147_s25 + $0x660] ss:$8 sps:$4 sm:$0xff]  }
  0xb8   : > { %2106 = vmatprep.subr.bf16.mxu1 %v2925_v50  ;;  %v3011_v50 = vld [vmem:[%s3147_s25 + $0x760] ss:$8 sps:$4 sm:$0xff]  }
  0xba   : > { %2066 = vmatpush1.bf16.msra.mxu0 %v2920_v51  ;;  %v3016_v51 = vld [vmem:[%s3147_s25 + $0x674] ss:$8 sps:$4 sm:$0xff]  }
  0xbb   : > { %2107 = vmatpush1.bf16.msra.mxu1 %v2923_v52  ;;  %2067 = vmatprep.subr.bf16.mxu0 %v2928_v53  ;;  %v3019_v52 = vld [vmem:[%s3147_s25 + $0x774] ss:$8 sps:$4 sm:$0xff]   ;;  %v3014_v53 = vld [vmem:[%s3147_s25 + $0x670] ss:$8 sps:$4 sm:$0xff]  }
  0xbc   : > { %2108 = vmatprep.subr.bf16.mxu1 %v2931_v54  ;;  %v3017_v54 = vld [vmem:[%s3147_s25 + $0x770] ss:$8 sps:$4 sm:$0xff]  }
  0xbe   : > { %2068 = vmatpush1.bf16.msra.mxu0 %v2926_v55  ;;  %v3022_v55 = vld [vmem:[%s3147_s25 + $0x684] ss:$8 sps:$4 sm:$0xff]  }
  0xbf   : > { %2109 = vmatpush1.bf16.msra.mxu1 %v2929_v56  ;;  %2069 = vmatprep.subr.bf16.mxu0 %v2934_v57  ;;  %v3025_v56 = vld [vmem:[%s3147_s25 + $0x784] ss:$8 sps:$4 sm:$0xff]   ;;  %v3020_v57 = vld [vmem:[%s3147_s25 + $0x680] ss:$8 sps:$4 sm:$0xff]  }
  0xc0   : > { %2110 = vmatprep.subr.bf16.mxu1 %v2937_v58  ;;  %v3023_v58 = vld [vmem:[%s3147_s25 + $0x780] ss:$8 sps:$4 sm:$0xff]  }
  0xc2   : > { %2070 = vmatpush1.bf16.msra.mxu0 %v2932_v59  ;;  %v3028_v59 = vld [vmem:[%s3147_s25 + $0x694] ss:$8 sps:$4 sm:$0xff]  }
  0xc3   : > { %2111 = vmatpush1.bf16.msra.mxu1 %v2935_v60  ;;  %2071 = vmatprep.subr.bf16.mxu0 %v2940_v61  ;;  %v3031_v60 = vld [vmem:[%s3147_s25 + $0x794] ss:$8 sps:$4 sm:$0xff]   ;;  %v3026_v61 = vld [vmem:[%s3147_s25 + $0x690] ss:$8 sps:$4 sm:$0xff]  }
  0xc4   : > { %2112 = vmatprep.subr.bf16.mxu1 %v2943_v62  ;;  %v3029_v62 = vld [vmem:[%s3147_s25 + $0x790] ss:$8 sps:$4 sm:$0xff]  }
  0xc6   : > { %2072 = vmatpush1.bf16.msra.mxu0 %v2938_v63  ;;  %v3034_v63 = vld [vmem:[%s3147_s25 + $0x6a4] ss:$8 sps:$4 sm:$0xff]  }
  0xc7   : > { %2113 = vmatpush1.bf16.msra.mxu1 %v2941_v0  ;;  %2073 = vmatprep.subr.bf16.mxu0 %v2946_v1  ;;  %v3037_v0 = vld [vmem:[%s3147_s25 + $0x7a4] ss:$8 sps:$4 sm:$0xff]   ;;  %v3032_v1 = vld [vmem:[%s3147_s25 + $0x6a0] ss:$8 sps:$4 sm:$0xff]  }
  0xc8   : > { %2114 = vmatprep.subr.bf16.mxu1 %v2949_v2  ;;  %v3035_v2 = vld [vmem:[%s3147_s25 + $0x7a0] ss:$8 sps:$4 sm:$0xff]  }
  0xca   : > { %2074 = vmatpush1.bf16.msra.mxu0 %v2944_v3  ;;  %v3040_v3 = vld [vmem:[%s3147_s25 + $0x6b4] ss:$8 sps:$4 sm:$0xff]  }
  0xcb   : > { %2115 = vmatpush1.bf16.msra.mxu1 %v2947_v4  ;;  %2075 = vmatprep.subr.bf16.mxu0 %v2952_v5  ;;  %v3043_v4 = vld [vmem:[%s3147_s25 + $0x7b4] ss:$8 sps:$4 sm:$0xff]   ;;  %v3038_v5 = vld [vmem:[%s3147_s25 + $0x6b0] ss:$8 sps:$4 sm:$0xff]  }
  0xcc   : > { %2116 = vmatprep.subr.bf16.mxu1 %v2955_v6  ;;  %v3041_v6 = vld [vmem:[%s3147_s25 + $0x7b0] ss:$8 sps:$4 sm:$0xff]  }
  0xce   : > { %2076 = vmatpush1.bf16.msra.mxu0 %v2950_v7  ;;  %v3046_v7 = vld [vmem:[%s3147_s25 + $0x6c4] ss:$8 sps:$4 sm:$0xff]  }
  0xcf   : > { %2117 = vmatpush1.bf16.msra.mxu1 %v2953_v8  ;;  %2077 = vmatprep.subr.bf16.mxu0 %v2958_v9  ;;  %v3049_v8 = vld [vmem:[%s3147_s25 + $0x7c4] ss:$8 sps:$4 sm:$0xff]   ;;  %v3044_v9 = vld [vmem:[%s3147_s25 + $0x6c0] ss:$8 sps:$4 sm:$0xff]  }
  0xd0   : > { %2118 = vmatprep.subr.bf16.mxu1 %v2961_v10  ;;  %v3047_v10 = vld [vmem:[%s3147_s25 + $0x7c0] ss:$8 sps:$4 sm:$0xff]  }
  0xd2   : > { %2078 = vmatpush1.bf16.msra.mxu0 %v2956_v11  ;;  %v3052_v11 = vld [vmem:[%s3147_s25 + $0x6d4] ss:$8 sps:$4 sm:$0xff]  }
  0xd3   : > { %2119 = vmatpush1.bf16.msra.mxu1 %v2959_v12  ;;  %2079 = vmatprep.subr.bf16.mxu0 %v2964_v13  ;;  %v3055_v12 = vld [vmem:[%s3147_s25 + $0x7d4] ss:$8 sps:$4 sm:$0xff]   ;;  %v3050_v13 = vld [vmem:[%s3147_s25 + $0x6d0] ss:$8 sps:$4 sm:$0xff]  }
  0xd4   : > { %2120 = vmatprep.subr.bf16.mxu1 %v2967_v14  ;;  %v3053_v14 = vld [vmem:[%s3147_s25 + $0x7d0] ss:$8 sps:$4 sm:$0xff]  }
  0xd6   : > { %2080 = vmatpush1.bf16.msra.mxu0 %v2962_v15  ;;  %v3058_v15 = vld [vmem:[%s3147_s25 + $0x6e4] ss:$8 sps:$4 sm:$0xff]  }
  0xd7   : > { %2121 = vmatpush1.bf16.msra.mxu1 %v2965_v16  ;;  %2131 = vmatprep.subr.bf16.mxu0 %v2974_v17  ;;  %v3061_v16 = vld [vmem:[%s3147_s25 + $0x7e4] ss:$8 sps:$4 sm:$0xff]   ;;  %v3056_v17 = vld [vmem:[%s3147_s25 + $0x6e0] ss:$8 sps:$4 sm:$0xff]  }
  0xd8   : > { %2172 = vmatprep.subr.bf16.mxu1 %v2977_v18  ;;  %v3059_v18 = vld [vmem:[%s3147_s25 + $0x7e0] ss:$8 sps:$4 sm:$0xff]  }
  0xd9   : > { %2082 = vmatmul.mubr.bf16.vlgmr.msra.gmra.mrb[8].mxu0 %v2377_v21  ;;  %v3064_v21 = vld [vmem:[%s3147_s25 + $0x6f4] ss:$8 sps:$4 sm:$0xff]  }
  0xda   : > { %2123 = vmatmul.mubr.bf16.vlgmr.msra.gmra.mrb[8].mxu1 %v2379_v22  ;;  %2132 = vmatpush1.bf16.msra.mxu0 %v2972_v25  ;;  %v3067_v22 = vld [vmem:[%s3147_s25 + $0x7f4] ss:$8 sps:$4 sm:$0xff]   ;;  %v3062_v25 = vld [vmem:[%s3147_s25 + $0x6f0] ss:$8 sps:$4 sm:$0xff]  }
  0xdb   : > { %2173 = vmatpush1.bf16.msra.mxu1 %v2975_v26  ;;  %2133 = vmatprep.subr.bf16.mxu0 %v2980_v27  ;;  %v3065_v26 = vld [vmem:[%s3147_s25 + $0x7f0] ss:$8 sps:$4 sm:$0xff]   ;;  %v2381_v27 = vcombine.low %v3381_v23, %v3381_v23 }
  0xdc   : > { %2174 = vmatprep.subr.bf16.mxu1 %v2983_v28  ;;  %2163 = vmatprep.mubr.bf16.mxu0 %v2382_v19  ;;  %v2383_v28 = vcombine.low %v3384_v24, %v3384_v24 }
  0xdd   : > { %2204 = vmatprep.mubr.bf16.mxu1 %v2384_v20 }
  0xde   : > { %2134 = vmatpush1.bf16.msra.mxu0 %v2978_v29 }
  0xdf   : > { %2175 = vmatpush1.bf16.msra.mxu1 %v2981_v30  ;;  %2135 = vmatprep.subr.bf16.mxu0 %v2986_v31 }
  0xe0   : > { %2176 = vmatprep.subr.bf16.mxu1 %v2989_v32 }
  0xe2   : > { %2136 = vmatpush1.bf16.msra.mxu0 %v2984_v33 }
  0xe3   : > { %2177 = vmatpush1.bf16.msra.mxu1 %v2987_v34  ;;  %2137 = vmatprep.subr.bf16.mxu0 %v2992_v35 }
  0xe4   : > { %2178 = vmatprep.subr.bf16.mxu1 %v2995_v36 }
  0xe6   : > { %2138 = vmatpush1.bf16.msra.mxu0 %v2990_v37 }
  0xe7   : > { %2179 = vmatpush1.bf16.msra.mxu1 %v2993_v38  ;;  %2139 = vmatprep.subr.bf16.mxu0 %v2998_v39 }
  0xe8   : > { %2180 = vmatprep.subr.bf16.mxu1 %v3001_v40 }
  0xea   : > { %2140 = vmatpush1.bf16.msra.mxu0 %v2996_v41 }
  0xeb   : > { %2181 = vmatpush1.bf16.msra.mxu1 %v2999_v42  ;;  %2141 = vmatprep.subr.bf16.mxu0 %v3004_v43 }
  0xec   : > { %2182 = vmatprep.subr.bf16.mxu1 %v3007_v44 }
  0xee   : > { %2142 = vmatpush1.bf16.msra.mxu0 %v3002_v45 }
  0xef   : > { %2183 = vmatpush1.bf16.msra.mxu1 %v3005_v46  ;;  %2143 = vmatprep.subr.bf16.mxu0 %v3010_v47 }
  0xf0   : > { %2184 = vmatprep.subr.bf16.mxu1 %v3013_v48 }
  0xf2   : > { %2144 = vmatpush1.bf16.msra.mxu0 %v3008_v49 }
  0xf3   : > { %2185 = vmatpush1.bf16.msra.mxu1 %v3011_v50  ;;  %2145 = vmatprep.subr.bf16.mxu0 %v3016_v51 }
  0xf4   : > { %2186 = vmatprep.subr.bf16.mxu1 %v3019_v52 }
  0xf6   : > { %2146 = vmatpush1.bf16.msra.mxu0 %v3014_v53 }
  0xf7   : > { %2187 = vmatpush1.bf16.msra.mxu1 %v3017_v54  ;;  %2147 = vmatprep.subr.bf16.mxu0 %v3022_v55 }
  0xf8   : > { %2188 = vmatprep.subr.bf16.mxu1 %v3025_v56 }
  0xfa   : > { %2148 = vmatpush1.bf16.msra.mxu0 %v3020_v57 }
  0xfb   : > { %2189 = vmatpush1.bf16.msra.mxu1 %v3023_v58  ;;  %2149 = vmatprep.subr.bf16.mxu0 %v3028_v59 }
  0xfc   : > { %2190 = vmatprep.subr.bf16.mxu1 %v3031_v60 }
  0xfe   : > { %2150 = vmatpush1.bf16.msra.mxu0 %v3026_v61 }
  0xff   : > { %2191 = vmatpush1.bf16.msra.mxu1 %v3029_v62  ;;  %2151 = vmatprep.subr.bf16.mxu0 %v3034_v63 }
 0x100   : > { %2192 = vmatprep.subr.bf16.mxu1 %v3037_v0  ;;  %v283_v0 = vld [vmem:[%s3496_s3] sm:$0xff] }
 0x102   : > { %2152 = vmatpush1.bf16.msra.mxu0 %v3032_v1 }
 0x103   : > { %2193 = vmatpush1.bf16.msra.mxu1 %v3035_v2  ;;  %2153 = vmatprep.subr.bf16.mxu0 %v3040_v3 }
 0x104   : > { %2194 = vmatprep.subr.bf16.mxu1 %v3043_v4 }
 0x106   : > { %2154 = vmatpush1.bf16.msra.mxu0 %v3038_v5  ;;  %v284_v5 = vld [vmem:[%s3496_s3 + $0x8] sm:$0xff] }
 0x107   : > { %2195 = vmatpush1.bf16.msra.mxu1 %v3041_v6  ;;  %2155 = vmatprep.subr.bf16.mxu0 %v3046_v7 }
 0x108   : > { %2196 = vmatprep.subr.bf16.mxu1 %v3049_v8 }
 0x10a   : > { %2156 = vmatpush1.bf16.msra.mxu0 %v3044_v9 }
 0x10b   : > { %2197 = vmatpush1.bf16.msra.mxu1 %v3047_v10  ;;  %2157 = vmatprep.subr.bf16.mxu0 %v3052_v11  ;;  %v2225_v11 = vlaneseq (!%p2641_p7) }
 0x10c   : > { %2198 = vmatprep.subr.bf16.mxu1 %v3055_v12 }
 0x10d   : > { %v2226_v12 = vshrl.u32 (!%p2641_p7), %v2225_v11, 7 }
 0x10e   : > { %2158 = vmatpush1.bf16.msra.mxu0 %v3050_v13  ;;  %v2223_v13 = vld [vmem:[%s3495_s2] sm:$0x3] (!%p2641_p7) }
 0x10f   : > { %2199 = vmatpush1.bf16.msra.mxu1 %v3053_v14  ;;  %2159 = vmatprep.subr.bf16.mxu0 %v3058_v15  ;;  %v2227_v14 = vsub.s32 (!%p2641_p7), 0, %v2226_v12  ;;  %v2231_v15 = vsub.s32 (!%p2641_p7), 1, %v2226_v12 }
 0x110   : > { %2200 = vmatprep.subr.bf16.mxu1 %v3061_v16 }
 0x112   : > { %2160 = vmatpush1.bf16.msra.mxu0 %v3056_v17 }
 0x113   : > { %2201 = vmatpush1.bf16.msra.mxu1 %v3059_v18  ;;  %2161 = vmatprep.subr.bf16.mxu0 %v3064_v21  ;;  %v2228_v18 = vrot.slane (!%p2641_p7), %v2223_v13, %v2227_v14  ;;  %v2232_v21 = vrot.slane (!%p2641_p7), %v2223_v13, %v2231_v15 }
 0x114   : > { %2202 = vmatprep.subr.bf16.mxu1 %v3067_v22 }
 0x116   : > { %2162 = vmatpush1.bf16.msra.mxu0 %v3062_v25 }
 0x117   : > { %2203 = vmatpush1.bf16.msra.mxu1 %v3065_v26 }
 0x119   : > { %2164 = vmatmul.mubr.bf16.vlgmr.msra.gmra.mrb[12].mxu0 %v2381_v27 }
 0x11a   : > { %2205 = vmatmul.mubr.bf16.vlgmr.msra.gmra.mrb[12].mxu1 %v2383_v28 }
 0x12c   : > { %v1919_v19 = vpop.f32.mrb[0].mxu0 }
 0x12d   : > { %v1960_v20 = vpop.f32.mrb[0].mxu1  ;;  %v1921_v30 = vpop.f32.mrb[1].mxu0 }
 0x12e   : > { %v1961_v29 = vadd.f32 %v1960_v20, %v1919_v19  ;;  %v1962_v31 = vpop.f32.mrb[1].mxu1  ;;  %v1923_v33 = vpop.f32.mrb[2].mxu0 }
 0x12f   : > { %v1963_v32 = vadd.f32 %v1962_v31, %v1921_v30  ;;  %v1964_v34 = vpop.f32.mrb[2].mxu1  ;;  %v1924_v35 = vpop.f32.mrb[3].mxu0 }
 0x130   : > { %v1965_v36 = vpop.f32.mrb[3].mxu1 }
 0x16c   : > { %v2001_v37 = vpop.f32.mrb[4].mxu0 }
 0x16d   : > { %v2042_v38 = vpop.f32.mrb[4].mxu1  ;;  %v2002_v23 = vadd.f32 %v2001_v37, %v1961_v29  ;;  %v2003_v39 = vpop.f32.mrb[5].mxu0 }
 0x16e   : > { %v2044_v40 = vpop.f32.mrb[5].mxu1  ;;  %v2004_v24 = vadd.f32 %v2003_v39, %v1963_v32  ;;  %v2005_v41 = vpop.f32.mrb[6].mxu0 }
 0x16f   : > { %v2046_v42 = vpop.f32.mrb[6].mxu1  ;;  %v2043_v43 = vadd.f32 %v2042_v38, %v2002_v23  ;;  %v2006_v44 = vpop.f32.mrb[7].mxu0 }
 0x170   : > { %v2047_v45 = vpop.f32.mrb[7].mxu1  ;;  %v2045_v46 = vadd.f32 %v2044_v40, %v2004_v24 }
 0x1ac   : > { %v2083_v47 = vpop.f32.mrb[8].mxu0 }
 0x1ad   : > { %v2124_v48 = vpop.f32.mrb[8].mxu1  ;;  %v2084_v49 = vadd.f32 %v2083_v47, %v2043_v43  ;;  %v2085_v50 = vpop.f32.mrb[9].mxu0 }
 0x1ae   : > { %v2126_v51 = vpop.f32.mrb[9].mxu1  ;;  %v2086_v52 = vadd.f32 %v2085_v50, %v2045_v46  ;;  %v2087_v53 = vpop.f32.mrb[10].mxu0 }
 0x1af   : > { %v2128_v54 = vpop.f32.mrb[10].mxu1  ;;  %v2125_v55 = vadd.f32 %v2124_v48, %v2084_v49  ;;  %v2088_v56 = vpop.f32.mrb[11].mxu0 }
 0x1b0   : > { %v2129_v57 = vpop.f32.mrb[11].mxu1  ;;  %v2127_v58 = vadd.f32 %v2126_v51, %v2086_v52 }
 0x1ec   : > { %v2165_v59 = vpop.f32.mrb[12].mxu0 }
 0x1ed   : > { %v2206_v60 = vpop.f32.mrb[12].mxu1  ;;  %v2166_v61 = vadd.f32 %v2165_v59, %v2125_v55  ;;  %v2167_v62 = vpop.f32.mrb[13].mxu0 }
 0x1ee   : > { %v2208_v63 = vpop.f32.mrb[13].mxu1  ;;  %v2168_v1 = vadd.f32 %v2167_v62, %v2127_v58  ;;  %v2169_v2 = vpop.f32.mrb[14].mxu0  ;;  %2220 = sbr.rel (%p2641_p7) target bundleno = 513 (0x201), region = 40 }
 0x1ef   : > { %v2210_v3 = vpop.f32.mrb[14].mxu1  ;;  %v2207_v4 = vadd.f32 %v2206_v60, %v2166_v61  ;;  %v2170_v6 = vpop.f32.mrb[15].mxu0 }
 0x1f0   : > { %v2211_v7 = vpop.f32.mrb[15].mxu1  ;;  %v2209_v8 = vadd.f32 %v2208_v63, %v2168_v1 }
 0x1f1   : > { %v2213_v9 = vadd.f32 %v2207_v4, %v283_v0 }
 0x1f2   : > { %v2214_v10 = vadd.f32 %v2209_v8, %v284_v5 }
 0x1f3   : > { %2215 = vst [vmem:[%s3496_s3] sm:$0xff] %v2213_v9 }
 0x1f4   : > { %2216 = vst [vmem:[%s3496_s3 + $0x8] sm:$0xff] %v2214_v10 }
 0x1fa   : > { %v2221_v16 = vld [vmem:[%s3496_s3] sm:$0xff] }
 0x1fb   : > { %v2222_v17 = vld [vmem:[%s3496_s3 + $0x8] sm:$0xff]  ;;  %v2235_v22 = vadd.f32 %v2228_v18, %v2221_v16 }
 0x1fc   : > { %v2236_v25 = vadd.f32 %v2232_v21, %v2222_v17 }
 0x1fd   : > { %v2237_v26 = vmax.f32 %v2235_v22, 0.0 }
 0x1fe   : > { %v2238_v27 = vmax.f32 %v2236_v25, 0.0 }
 0x1ff   : > { %2239 = vst [vmem:[%s3496_s3] sm:$0xff] %v2237_v26 }
 0x200   : > { %2240 = vst [vmem:[%s3496_s3 + $0x8] sm:$0xff] %v2238_v27 }
 0x201 PF: > { %s13_s14 = sadd.s32 1, %s3094_s14   ;;  %s3497_s12 = smov %s3090_s13 }
 0x202   : > { %p10_p8 = scmp.ge.s32.totalorder %s13_s14, 10   ;;  %s3498_s13 = smov %s3500_s15 }
 0x204   :  { %12 = sbr.rel (!%p10_p8) target bundleno = 2 (0x2), region = 76 }

// kernel: forward.12
= control target key start
LH: loop header
LB: loop body
LE: loop exit
PB: predicated region body
PF: predicated region fallthrough
CT: control target
= control target key end

     0   :  { %s339_s1 = inlined_call_operand.vmem [shape: bf16[256,128], index: 1, kind: input, shape index: {}]   ;;  %s340_s0 = inlined_call_operand.vmem [shape: bf16[8,256], index: 0, kind: input, shape index: {}]   ;;  %s341_s2 = inlined_call_operand.vmem [shape: f32[1,128], index: 2, kind: input, shape index: {}]   ;;  %s342_s3 = inlined_call_operand.vmem [shape: f32[8,128], index: 3, kind: output, shape index: {}]  }
   0x1   :  { %v244_v0 = vld [vmem:[%s339_s1 + $0x40] sm:$0xff]   ;;  %v246_v2 = vld [vmem:[%s339_s1 + $0x48] sm:$0xff]   ;;  %v248_v4 = vld [vmem:[%s339_s1 + $0x50] sm:$0xff]  }
   0x2   :  { %v245_v1 = vld [vmem:[%s339_s1] sm:$0xff]   ;;  %222 = vmatprep.subr.bf16.mxu0 %v244_v0  ;;  %v247_v3 = vld [vmem:[%s339_s1 + $0x8] sm:$0xff]   ;;  %v249_v5 = vld [vmem:[%s339_s1 + $0x10] sm:$0xff]  }
   0x3   :  { %223 = vmatpush3.bf16.msra.mxu0 %v245_v1  ;;  %v250_v6 = vld [vmem:[%s339_s1 + $0x58] sm:$0xff]   ;;  %v252_v8 = vld [vmem:[%s339_s1 + $0x60] sm:$0xff]   ;;  %v254_v10 = vld [vmem:[%s339_s1 + $0x68] sm:$0xff]  }
   0x4   :  { %224 = vmatprep.subr.bf16.mxu0 %v246_v2  ;;  %v251_v7 = vld [vmem:[%s339_s1 + $0x18] sm:$0xff]   ;;  %v253_v9 = vld [vmem:[%s339_s1 + $0x20] sm:$0xff]   ;;  %v255_v13 = vld [vmem:[%s339_s1 + $0x28] sm:$0xff]  }
   0x5   :  { %v15_v11 = vld [vmem:[%s340_s0] sm:$0xff]  ;;  %v256_v14 = vld [vmem:[%s339_s1 + $0x70] sm:$0xff]   ;;  %v258_v16 = vld [vmem:[%s339_s1 + $0x78] sm:$0xff]  }
   0x6   :  { %v205_v12 = vcombine.high %v15_v11, %v15_v11  ;;  %v257_v15 = vld [vmem:[%s339_s1 + $0x30] sm:$0xff]   ;;  %v259_v17 = vld [vmem:[%s339_s1 + $0x38] sm:$0xff]   ;;  %v204_v18 = vcombine.low %v15_v11, %v15_v11  ;;  %v203_v20 = vld [vmem:[%s341_s2] ss:$0 sm:$0xff] }
   0x7   :  { %225 = vmatpush3.bf16.msra.mxu0 %v247_v3 }
   0x8   :  { %226 = vmatprep.subr.bf16.mxu0 %v248_v4  ;;  %190 = vmatprep.mubr.bf16.mxu0 %v205_v12 }
   0xb   :  { %227 = vmatpush3.bf16.msra.mxu0 %v249_v5 }
   0xc   :  { %228 = vmatprep.subr.bf16.mxu0 %v250_v6 }
   0xf   :  { %229 = vmatpush3.bf16.msra.mxu0 %v251_v7 }
  0x10   :  { %230 = vmatprep.subr.bf16.mxu0 %v252_v8 }
  0x13   :  { %231 = vmatpush3.bf16.msra.mxu0 %v253_v9 }
  0x14   :  { %232 = vmatprep.subr.bf16.mxu0 %v254_v10 }
  0x17   :  { %233 = vmatpush3.bf16.msra.mxu0 %v255_v13 }
  0x18   :  { %234 = vmatprep.subr.bf16.mxu0 %v256_v14 }
  0x1b   :  { %235 = vmatpush3.bf16.msra.mxu0 %v257_v15 }
  0x1c   :  { %236 = vmatprep.subr.bf16.mxu0 %v258_v16 }
  0x1f   :  { %237 = vmatpush3.bf16.msra.mxu0 %v259_v17 }
  0x22   :  { %191 = vmatmul.mubr.bf16.vlgmr.msra.gmra.mrb[0].mxu0 %v204_v18 }
  0xf5   :  { %v238_v19 = vpop.f32.mrb[0].mxu0 }
  0xf6   :  { %v239_v21 = vpop.f32.mrb[1].mxu0 }
  0xf7   :  { %v240_v22 = vadd.f32 %v239_v21, %v238_v19  ;;  %v241_v23 = vpop.f32.mrb[2].mxu0 }
  0xf8   :  { %v242_v24 = vpop.f32.mrb[3].mxu0 }
  0xf9   :  { %v193_v25 = vadd.f32 %v240_v22, %v203_v20 }
  0xfb   :  { %198 = vst [vmem:[%s342_s3] sm:$0xff] %v193_v25 }

// kernel: squeeze.2
= control target key start
LH: loop header
LB: loop body
LE: loop exit
PB: predicated region body
PF: predicated region fallthrough
CT: control target
= control target key end

     0   :  { %s9_s6 = smov 3  ;;  %s12_s7 = smov 12  ;;  %vm14_vm0 = vcmask 1043458   ;;  %s255_s0 = inlined_call_operand.vmem [shape: f32[2,16,16], index: 0, kind: input, shape index: {}]   ;;  %s256_s1 = inlined_call_operand.hbm [shape: f32[2,256], index: 1, kind: output, shape index: {}]  }
   0x1   :  { %v127_v0 = vld [vmem:[%s255_s0 + $0x7] ss:$16 sm:%s9_s6]   ;;  %v128_v1 = vld [vmem:[%s255_s0 - $0x11] ss:$16 sm:%s12_s7]   ;;  %s37_s12 = smov 3  ;;  %s40_s15 = smov 12 }
   0x2   :  { %v15_v2 = vsel %vm14_vm0, %v128_v1, %v127_v0  ;;  %v131_v3 = vld [vmem:[%s255_s0 + $0x5] ss:$16 sm:%s37_s12]   ;;  %s173_s16 = smov 112   ;;  %v132_v4 = vld [vmem:[%s255_s0 - $0x13] ss:$16 sm:%s40_s15]   ;;  %s23_s19 = smov 3 }
   0x3   :  { %16 = vrot.lane.b32.xlu0 %v15_v2, %s173_s16  ;;  %s26_s20 = smov 12  ;;  %v43_v5 = vsel %vm14_vm0, %v132_v4, %v131_v3  ;;  %v129_v6 = vld [vmem:[%s255_s0 + $0x6] ss:$16 sm:%s23_s19]   ;;  %s51_s25 = smov 3 }
   0x4   :  { %v130_v7 = vld [vmem:[%s255_s0 - $0x12] ss:$16 sm:%s26_s20]   ;;  %s174_s26 = smov 80   ;;  %v133_v9 = vld [vmem:[%s255_s0 + $0x4] ss:$16 sm:%s51_s25]   ;;  %s54_s29 = smov 12 }
   0x5   :  { %44 = vrot.lane.b32.xlu1 %v43_v5, %s174_s26  ;;  %v29_v8 = vsel %vm14_vm0, %v130_v7, %v129_v6  ;;  %v134_v10 = vld [vmem:[%s255_s0 - $0x14] ss:$16 sm:%s54_s29]   ;;  %s65_s3 = smov 3  ;;  %s68_s4 = smov 12 }
   0x6   :  { %2 = vsyncpa [#allocation1], 0  ;;  %s175_s5 = smov 96   ;;  %v57_v11 = vsel %vm14_vm0, %v134_v10, %v133_v9  ;;  %v135_v12 = vld [vmem:[%s255_s0 + $0x3] ss:$16 sm:%s65_s3]   ;;  %s79_s8 = smov 3 }
   0x7   :  { %30 = vrot.lane.b32.xlu0 %v29_v8, %s175_s5  ;;  %v136_v13 = vld [vmem:[%s255_s0 - $0x15] ss:$16 sm:%s68_s4]   ;;  %s82_s13 = smov 12  ;;  %s176_s14 = smov 64   ;;  %vm4_vm1 = vcmask 130048   ;;  %vm18_vm2 = vcmask 1048448  }
   0x8   :  { %v137_v14 = vld [vmem:[%s255_s0 + $0x2] ss:$16 sm:%s79_s8]   ;;  %v71_v15 = vsel %vm14_vm0, %v136_v13, %v135_v12  ;;  %v138_v16 = vld [vmem:[%s255_s0 - $0x16] ss:$16 sm:%s82_s13]   ;;  %s93_s17 = smov 3  ;;  %s96_s18 = smov 12 }
   0x9   :  { %58 = vrot.lane.b32.xlu1 %v57_v11, %s176_s14  ;;  %v85_v17 = vsel %vm14_vm0, %v138_v16, %v137_v14  ;;  %v139_v18 = vld [vmem:[%s255_s0 + $0x1] ss:$16 sm:%s93_s17]   ;;  %s177_s23 = smov 48   ;;  %v3_v20 = vld [vmem:[%s255_s0] ss:$8 sm:$0xf]  }
   0xa   :  { %v140_v19 = vld [vmem:[%s255_s0 - $0x17] ss:$16 sm:%s96_s18]   ;;  %5 = vst.msk [vmem:[#allocation2] ss:$8 sm:$0x3] %vm4_vm1, %v3_v20   ;;  %s178_s0 = smov 32  }
   0xb   :  { %72 = vrot.lane.b32.xlu0 %v71_v15, %s177_s23  ;;  %v99_v21 = vsel %vm14_vm0, %v140_v19, %v139_v18  ;;  %7 = vst.msk [vmem:[#allocation2 - $0xf] ss:$8 sm:$0xc] %vm4_vm1, %v3_v20   ;;  %s179_s26 = smov 16   ;;  %vm32_vm3 = vcmask 917248   ;;  %vm46_vm4 = vcmask 786048  }
   0xc   :  { %vm60_vm5 = vcmask 654848   ;;  %vm74_vm6 = vcmask 523648   ;;  %vm88_vm7 = vcmask 392448   ;;  %vm102_vm8 = vcmask 261248   ;;  %s180_s27 = smov [#allocation0]  }
   0xd   :  { %86 = vrot.lane.b32.xlu1 %v85_v17, %s178_s0  ;;  %s121_s28 = sshll.u32 %s180_s27, 4  ;;  %s122_s28 = int_to_ptr.vmem [resolvable:$true] %s121_s28 }
   0xe   :  { %s149_s29 = scalar_lea.vmem %s122_s28, 64  ;;  %p154_p1 = scmp.lt.s32.totalorder %s122_s28, %s122_s28 }
   0xf   :  { %100 = vrot.lane.b32.xlu0 %v99_v21, %s179_s26  ;;  %p150_p0 = scmp.ne.s32.totalorder %s122_s28, %s149_s29  ;;  %p155_p2 = scmp.lt.s32.totalorder %s149_s29, %s149_s29 }
  0x11   :  { %p156_p3 = por %p155_p2, %p154_p1 }
  0x13   :  { %p157_p4 = pnand %p156_p3, %p150_p0 }
  0x75   :  { %v17_v22 = vpop.permute.xlu0 %16  }
  0x76   :  { %19 = vst.msk [vmem:[#allocation2] sm:$0x3] %vm18_vm2, %v17_v22   ;;  %21 = vst.msk [vmem:[#allocation2 + $0x6] sm:$0xc] %vm18_vm2, %v17_v22  }
  0x77   :  { %v45_v23 = vpop.permute.xlu1 %44  }
  0x79   :  { %v31_v24 = vpop.permute.xlu0 %30  }
  0x7a   :  { %33 = vst.msk [vmem:[#allocation2] sm:$0x3] %vm32_vm3, %v31_v24   ;;  %35 = vst.msk [vmem:[#allocation2 + $0x6] sm:$0xc] %vm32_vm3, %v31_v24  }
  0x7b   :  { %47 = vst.msk [vmem:[#allocation2] sm:$0x3] %vm46_vm4, %v45_v23   ;;  %49 = vst.msk [vmem:[#allocation2 + $0x6] sm:$0xc] %vm46_vm4, %v45_v23   ;;  %v59_v25 = vpop.permute.xlu1 %58  }
  0x7c   :  { %61 = vst.msk [vmem:[#allocation2] sm:$0x3] %vm60_vm5, %v59_v25   ;;  %63 = vst.msk [vmem:[#allocation2 + $0x6] sm:$0xc] %vm60_vm5, %v59_v25  }
  0x7d   :  { %v73_v26 = vpop.permute.xlu0 %72  }
  0x7e   :  { %75 = vst.msk [vmem:[#allocation2] sm:$0x3] %vm74_vm6, %v73_v26   ;;  %77 = vst.msk [vmem:[#allocation2 + $0x6] sm:$0xc] %vm74_vm6, %v73_v26  }
  0x7f   :  { %v87_v27 = vpop.permute.xlu1 %86  }
  0x80   :  { %89 = vst.msk [vmem:[#allocation2] sm:$0x3] %vm88_vm7, %v87_v27   ;;  %91 = vst.msk [vmem:[#allocation2 + $0x6] sm:$0xc] %vm88_vm7, %v87_v27  }
  0x81   :  { %v101_v28 = vpop.permute.xlu0 %100  }
  0x82   :  { %103 = vst.msk [vmem:[#allocation2] sm:$0x3] %vm102_vm8, %v101_v28   ;;  %105 = vst.msk [vmem:[#allocation2 + $0x6] sm:$0xc] %vm102_vm8, %v101_v28  }
  0x89   :  { %v109_v29 = vld [vmem:[#allocation2] sm:$0x3]  ;;  %v113_v30 = vld [vmem:[#allocation2 + $0x8] sm:$0x3] }
  0x8a   :  { %111 = vst [vmem:[#allocation0] sm:$0x3] %v109_v29  ;;  %116 = vst [vmem:[#allocation0 + $0x2] sm:$0x3] %v113_v30 }
  0x8b   :  { %160 = shalt.err (!%p157_p4)
}
  0x8c   :  { %s161_s3 = scalar_lea.hbm %s256_s1, 64 }
  0x8d   :  { %p162_p5 = scmp.ne.s32.totalorder %s256_s1, %s161_s3  ;;  %p165_p6 = scmp.lt.u32.totalorder %s161_s3, %s256_s1 }
  0x8f   :  { %p167_p7 = pnand %p165_p6, %p162_p5 }
  0x91   :  { %170 = shalt.err (!%p167_p7)
}
  0x92   :  { %124 = dma.vmem_to_hbm [thread:$0]  %s122_s28, 64, %s256_s1, [#allocation1]  }
  0x93   :  { %171 = dma.done.wait [#allocation1], 64  }
  0x94   :  { %172 = vsyncadd [#allocation1], 4294967232 }
  0x95   :  { %126 = vsyncpa [#allocation1], 1 }

// kernel: forward.13
= control target key start
LH: loop header
LB: loop body
LE: loop exit
PB: predicated region body
PF: predicated region fallthrough
CT: control target
= control target key end

     0   :  { %s938_s12 = smov 0   ;;  %s940_s13 = smov 0   ;;  %s1088_s0 = inlined_call_operand.vmem [shape: bf16[512,128], index: 0, kind: input, shape index: {}]   ;;  %s1089_s1 = inlined_call_operand.vmem [shape: bf16[128,128], index: 1, kind: input, shape index: {}]   ;;  %s1090_s2 = inlined_call_operand.vmem [shape: f32[1,128], index: 2, kind: input, shape index: {}]   ;;  %s1091_s3 = inlined_call_operand.vmem [shape: f32[512,128], index: 3, kind: output, shape index: {}]  }
   0x1   :  { %s942_s14 = smov 0  }
   0x2 LB: > { %s25_s15 = sadd.s32 1, %s912_s13  ;;  %p726_p0 = scmp.ge.s32.totalorder %s916_s14, 1  ;;  %s916_s14 = sphi %s942_s14, %s13_s14   ;;  %s912_s13 = sphi %s940_s13, %s1093_s13   ;;  %s908_s12 = sphi %s938_s12, %s1092_s12  }
   0x3   : > { %p27_p1 = scmp.ge.s32.totalorder %s25_s15, 2  ;;  %p169_p2 = scmp.lt.s32.totalorder %s916_s14, 3 }
   0x5   : > { %s1095_s15 = smov (%p27_p1, %s25_s15), 0  ;;  %p170_p3 = pnand %p726_p0, %p169_p2 }
   0x6   : > { %v870_v0 = vld [vmem:[%s1089_s1] sm:$0xff] (!%p170_p3)   ;;  %s727_s18 = sshll.u32 (!%p170_p3), %s908_s12, 5  ;;  %v871_v1 = vld [vmem:[%s1089_s1 + $0x8] sm:$0xff] (!%p170_p3)   ;;  %v872_v2 = vld [vmem:[%s1089_s1 + $0x10] sm:$0xff] (!%p170_p3)  }
   0x7   : > { %173 = sbr.rel (%p170_p3) target bundleno = 281 (0x119), region = 32  ;;  %p204_p4 = scmp.lt.s32.totalorder (!%p170_p3), %s727_s18, 63  ;;  %782 = vmatprep.subr.bf16.mxu0 (!%p170_p3), %v870_v0  ;;  %830 = vmatprep.subr.bf16.mxu1 (!%p170_p3), %v870_v0  ;;  %v873_v3 = vld [vmem:[%s1089_s1 + $0x18] sm:$0xff] (!%p170_p3)   ;;  %v874_v6 = vld [vmem:[%s1089_s1 + $0x20] sm:$0xff] (!%p170_p3)   ;;  %v875_v7 = vld [vmem:[%s1089_s1 + $0x28] sm:$0xff] (!%p170_p3)  }
   0x8   : > { %783 = vmatpush3.bf16.msra.mxu0 (!%p170_p3), %v870_v0  ;;  %838 = vmatpush3.bf16.msra.mxu1 (!%p170_p3), %v870_v0  ;;  %v876_v8 = vld [vmem:[%s1089_s1 + $0x30] sm:$0xff] (!%p170_p3)   ;;  %v877_v9 = vld [vmem:[%s1089_s1 + $0x38] sm:$0xff] (!%p170_p3)   ;;  %v1008_v24 = vld [vmem:[%s1090_s2] ss:$0 sm:$0xff] (!%p170_p3) }
   0x9   : > { %784 = vmatprep.subr.bf16.mxu0 (!%p170_p3), %v871_v1  ;;  %831 = vmatprep.subr.bf16.mxu1 (!%p170_p3), %v871_v1 }
   0xc   : > { %785 = vmatpush3.bf16.msra.mxu0 (!%p170_p3), %v871_v1  ;;  %839 = vmatpush3.bf16.msra.mxu1 (!%p170_p3), %v871_v1 }
   0xd   : > { %786 = vmatprep.subr.bf16.mxu0 (!%p170_p3), %v872_v2  ;;  %832 = vmatprep.subr.bf16.mxu1 (!%p170_p3), %v872_v2 }
   0xe   : > { %s1097_s18 = smov (!%p204_p4, %s727_s18), 63 }
   0xf   : > { %s728_s23 = sshll.u32 %s1097_s18, 2  ;;  %s730_s10 = sshll.u32 %s1097_s18, 3 }
  0x10   : > { %s971_s26 = scalar_lea.vmem %s1088_s0, %s728_s23  ;;  %787 = vmatpush3.bf16.msra.mxu0 %v872_v2  ;;  %840 = vmatpush3.bf16.msra.mxu1 %v872_v2  ;;  %s1013_s19 = scalar_lea.vmem %s1091_s3, %s730_s10 }
  0x11   : > { %v878_v4 = vld [vmem:[%s971_s26] sm:$0xff]   ;;  %788 = vmatprep.subr.bf16.mxu0 %v873_v3  ;;  %833 = vmatprep.subr.bf16.mxu1 %v873_v3  ;;  %v880_v10 = vld [vmem:[%s971_s26 + $0x8] sm:$0xff]   ;;  %v882_v12 = vld [vmem:[%s971_s26 + $0x10] sm:$0xff]  }
  0x12   : > { %v879_v5 = vld [vmem:[%s971_s26 + $0x40] sm:$0xff]   ;;  %798 = vmatprep.mubr.bf16.mxu0 %v878_v4  ;;  %v881_v11 = vld [vmem:[%s971_s26 + $0x48] sm:$0xff]   ;;  %v883_v13 = vld [vmem:[%s971_s26 + $0x50] sm:$0xff]  }
  0x13   : > { %814 = vmatprep.mubr.bf16.mxu1 %v879_v5  ;;  %v884_v14 = vld [vmem:[%s971_s26 + $0x18] sm:$0xff]   ;;  %v886_v16 = vld [vmem:[%s971_s26 + $0x20] sm:$0xff]   ;;  %v888_v18 = vld [vmem:[%s971_s26 + $0x28] sm:$0xff]  }
  0x14   : > { %789 = vmatpush3.bf16.msra.mxu0 %v873_v3  ;;  %841 = vmatpush3.bf16.msra.mxu1 %v873_v3  ;;  %v885_v15 = vld [vmem:[%s971_s26 + $0x58] sm:$0xff]   ;;  %v887_v17 = vld [vmem:[%s971_s26 + $0x60] sm:$0xff]   ;;  %v889_v19 = vld [vmem:[%s971_s26 + $0x68] sm:$0xff]  }
  0x15   : > { %790 = vmatprep.subr.bf16.mxu0 %v874_v6  ;;  %834 = vmatprep.subr.bf16.mxu1 %v874_v6  ;;  %v890_v20 = vld [vmem:[%s971_s26 + $0x30] sm:$0xff]   ;;  %v892_v22 = vld [vmem:[%s971_s26 + $0x38] sm:$0xff]  }
  0x16   : > { %v891_v21 = vld [vmem:[%s971_s26 + $0x70] sm:$0xff]   ;;  %v893_v23 = vld [vmem:[%s971_s26 + $0x78] sm:$0xff]  }
  0x18   : > { %791 = vmatpush3.bf16.msra.mxu0 %v874_v6  ;;  %842 = vmatpush3.bf16.msra.mxu1 %v874_v6 }
  0x19   : > { %792 = vmatprep.subr.bf16.mxu0 %v875_v7  ;;  %835 = vmatprep.subr.bf16.mxu1 %v875_v7 }
  0x1c   : > { %793 = vmatpush3.bf16.msra.mxu0 %v875_v7  ;;  %843 = vmatpush3.bf16.msra.mxu1 %v875_v7 }
  0x1d   : > { %794 = vmatprep.subr.bf16.mxu0 %v876_v8  ;;  %836 = vmatprep.subr.bf16.mxu1 %v876_v8 }
  0x20   : > { %795 = vmatpush3.bf16.msra.mxu0 %v876_v8  ;;  %844 = vmatpush3.bf16.msra.mxu1 %v876_v8 }
  0x21   : > { %796 = vmatprep.subr.bf16.mxu0 %v877_v9  ;;  %837 = vmatprep.subr.bf16.mxu1 %v877_v9 }
  0x24   : > { %797 = vmatpush3.bf16.msra.mxu0 %v877_v9  ;;  %845 = vmatpush3.bf16.msra.mxu1 %v877_v9 }
  0x27   : > { %799 = vmatmul.mubr.bf16.vlgmr.msra.gmra.mrb[0].mxu0 %v880_v10  ;;  %815 = vmatmul.mubr.bf16.vlgmr.msra.gmra.mrb[0].mxu1 %v881_v11 }
  0x28   : > { %802 = vmatprep.mubr.bf16.mxu0 %v882_v12  ;;  %818 = vmatprep.mubr.bf16.mxu1 %v883_v13 }
  0x2f   : > { %803 = vmatmul.mubr.bf16.gmra.mrb[4].mxu0 %v884_v14  ;;  %819 = vmatmul.mubr.bf16.gmra.mrb[4].mxu1 %v885_v15 }
  0x30   : > { %806 = vmatprep.mubr.bf16.mxu0 %v886_v16  ;;  %822 = vmatprep.mubr.bf16.mxu1 %v887_v17 }
  0x37   : > { %807 = vmatmul.mubr.bf16.gmra.mrb[8].mxu0 %v888_v18  ;;  %823 = vmatmul.mubr.bf16.gmra.mrb[8].mxu1 %v889_v19 }
  0x38   : > { %810 = vmatprep.mubr.bf16.mxu0 %v890_v20  ;;  %826 = vmatprep.mubr.bf16.mxu1 %v891_v21 }
  0x3f   : > { %811 = vmatmul.mubr.bf16.gmra.mrb[12].mxu0 %v892_v22  ;;  %827 = vmatmul.mubr.bf16.gmra.mrb[12].mxu1 %v893_v23 }
  0xfa   : > { %v800_v25 = vpop.f32.mrb[0].mxu0  ;;  %v816_v26 = vpop.f32.mrb[0].mxu1 }
  0xfb   : > { %v468_v27 = vadd.f32 %v800_v25, %v1008_v24  ;;  %v532_v28 = vadd.f32 %v816_v26, %v1008_v24  ;;  %v459_v29 = vpop.f32.mrb[1].mxu0  ;;  %v523_v30 = vpop.f32.mrb[1].mxu1 }
  0xfc   : > { %v460_v31 = vadd.f32 %v1008_v24, %v459_v29  ;;  %v524_v32 = vadd.f32 %v1008_v24, %v523_v30  ;;  %v801_v33 = vpop.f32.mrb[2].mxu0  ;;  %v817_v34 = vpop.f32.mrb[2].mxu1 }
  0xfd   : > { %588 = vst [vmem:[%s1013_s19 + $0x10] sm:$0xff] %v468_v27  ;;  %604 = vst [vmem:[%s1013_s19 + $0x90] sm:$0xff] %v532_v28  ;;  %v471_v35 = vadd.f32 %v801_v33, %v1008_v24  ;;  %v535_v36 = vadd.f32 %v817_v34, %v1008_v24  ;;  %v462_v37 = vpop.f32.mrb[3].mxu0  ;;  %v526_v38 = vpop.f32.mrb[3].mxu1 }
  0xfe   : > { %586 = vst [vmem:[%s1013_s19] sm:$0xff] %v460_v31  ;;  %602 = vst [vmem:[%s1013_s19 + $0x80] sm:$0xff] %v524_v32  ;;  %v463_v39 = vadd.f32 %v1008_v24, %v462_v37  ;;  %v527_v40 = vadd.f32 %v1008_v24, %v526_v38 }
  0xff   : > { %589 = vst [vmem:[%s1013_s19 + $0x18] sm:$0xff] %v471_v35  ;;  %605 = vst [vmem:[%s1013_s19 + $0x98] sm:$0xff] %v535_v36 }
 0x100   : > { %587 = vst [vmem:[%s1013_s19 + $0x8] sm:$0xff] %v463_v39  ;;  %603 = vst [vmem:[%s1013_s19 + $0x88] sm:$0xff] %v527_v40 }
 0x102   : > { %v804_v41 = vpop.f32.mrb[4].mxu0  ;;  %v820_v42 = vpop.f32.mrb[4].mxu1 }
 0x103   : > { %v484_v43 = vadd.f32 %v804_v41, %v1008_v24  ;;  %v548_v44 = vadd.f32 %v820_v42, %v1008_v24  ;;  %v475_v45 = vpop.f32.mrb[5].mxu0  ;;  %v539_v46 = vpop.f32.mrb[5].mxu1 }
 0x104   : > { %v476_v47 = vadd.f32 %v1008_v24, %v475_v45  ;;  %v540_v48 = vadd.f32 %v1008_v24, %v539_v46  ;;  %v805_v49 = vpop.f32.mrb[6].mxu0  ;;  %v821_v50 = vpop.f32.mrb[6].mxu1 }
 0x105   : > { %592 = vst [vmem:[%s1013_s19 + $0x30] sm:$0xff] %v484_v43  ;;  %608 = vst [vmem:[%s1013_s19 + $0xb0] sm:$0xff] %v548_v44  ;;  %v487_v51 = vadd.f32 %v805_v49, %v1008_v24  ;;  %v551_v52 = vadd.f32 %v821_v50, %v1008_v24  ;;  %v478_v53 = vpop.f32.mrb[7].mxu0  ;;  %v542_v54 = vpop.f32.mrb[7].mxu1 }
 0x106   : > { %590 = vst [vmem:[%s1013_s19 + $0x20] sm:$0xff] %v476_v47  ;;  %606 = vst [vmem:[%s1013_s19 + $0xa0] sm:$0xff] %v540_v48  ;;  %v479_v55 = vadd.f32 %v1008_v24, %v478_v53  ;;  %v543_v56 = vadd.f32 %v1008_v24, %v542_v54 }
 0x107   : > { %593 = vst [vmem:[%s1013_s19 + $0x38] sm:$0xff] %v487_v51  ;;  %609 = vst [vmem:[%s1013_s19 + $0xb8] sm:$0xff] %v551_v52 }
 0x108   : > { %591 = vst [vmem:[%s1013_s19 + $0x28] sm:$0xff] %v479_v55  ;;  %607 = vst [vmem:[%s1013_s19 + $0xa8] sm:$0xff] %v543_v56 }
 0x10a   : > { %v808_v57 = vpop.f32.mrb[8].mxu0  ;;  %v824_v58 = vpop.f32.mrb[8].mxu1 }
 0x10b   : > { %v500_v59 = vadd.f32 %v808_v57, %v1008_v24  ;;  %v564_v60 = vadd.f32 %v824_v58, %v1008_v24  ;;  %v491_v61 = vpop.f32.mrb[9].mxu0  ;;  %v555_v62 = vpop.f32.mrb[9].mxu1 }
 0x10c   : > { %v492_v63 = vadd.f32 %v1008_v24, %v491_v61  ;;  %v556_v0 = vadd.f32 %v1008_v24, %v555_v62  ;;  %v809_v1 = vpop.f32.mrb[10].mxu0  ;;  %v825_v2 = vpop.f32.mrb[10].mxu1 }
 0x10d   : > { %596 = vst [vmem:[%s1013_s19 + $0x50] sm:$0xff] %v500_v59  ;;  %612 = vst [vmem:[%s1013_s19 + $0xd0] sm:$0xff] %v564_v60  ;;  %v503_v3 = vadd.f32 %v809_v1, %v1008_v24  ;;  %v567_v4 = vadd.f32 %v825_v2, %v1008_v24  ;;  %v494_v5 = vpop.f32.mrb[11].mxu0  ;;  %v558_v6 = vpop.f32.mrb[11].mxu1 }
 0x10e   : > { %594 = vst [vmem:[%s1013_s19 + $0x40] sm:$0xff] %v492_v63  ;;  %610 = vst [vmem:[%s1013_s19 + $0xc0] sm:$0xff] %v556_v0  ;;  %v495_v7 = vadd.f32 %v1008_v24, %v494_v5  ;;  %v559_v8 = vadd.f32 %v1008_v24, %v558_v6 }
 0x10f   : > { %597 = vst [vmem:[%s1013_s19 + $0x58] sm:$0xff] %v503_v3  ;;  %613 = vst [vmem:[%s1013_s19 + $0xd8] sm:$0xff] %v567_v4 }
 0x110   : > { %595 = vst [vmem:[%s1013_s19 + $0x48] sm:$0xff] %v495_v7  ;;  %611 = vst [vmem:[%s1013_s19 + $0xc8] sm:$0xff] %v559_v8 }
 0x112   : > { %v812_v9 = vpop.f32.mrb[12].mxu0  ;;  %v828_v10 = vpop.f32.mrb[12].mxu1 }
 0x113   : > { %v516_v11 = vadd.f32 %v812_v9, %v1008_v24  ;;  %v580_v12 = vadd.f32 %v828_v10, %v1008_v24  ;;  %v507_v13 = vpop.f32.mrb[13].mxu0  ;;  %v571_v14 = vpop.f32.mrb[13].mxu1 }
 0x114   : > { %v508_v15 = vadd.f32 %v1008_v24, %v507_v13  ;;  %v572_v16 = vadd.f32 %v1008_v24, %v571_v14  ;;  %v813_v17 = vpop.f32.mrb[14].mxu0  ;;  %v829_v18 = vpop.f32.mrb[14].mxu1 }
 0x115   : > { %600 = vst [vmem:[%s1013_s19 + $0x70] sm:$0xff] %v516_v11  ;;  %616 = vst [vmem:[%s1013_s19 + $0xf0] sm:$0xff] %v580_v12  ;;  %v519_v19 = vadd.f32 %v813_v17, %v1008_v24  ;;  %v583_v20 = vadd.f32 %v829_v18, %v1008_v24  ;;  %v510_v21 = vpop.f32.mrb[15].mxu0  ;;  %v574_v22 = vpop.f32.mrb[15].mxu1 }
 0x116   : > { %598 = vst [vmem:[%s1013_s19 + $0x60] sm:$0xff] %v508_v15  ;;  %614 = vst [vmem:[%s1013_s19 + $0xe0] sm:$0xff] %v572_v16  ;;  %v511_v23 = vadd.f32 %v1008_v24, %v510_v21  ;;  %v575_v25 = vadd.f32 %v1008_v24, %v574_v22 }
 0x117   : > { %601 = vst [vmem:[%s1013_s19 + $0x78] sm:$0xff] %v519_v19  ;;  %617 = vst [vmem:[%s1013_s19 + $0xf8] sm:$0xff] %v583_v20 }
 0x118   : > { %599 = vst [vmem:[%s1013_s19 + $0x68] sm:$0xff] %v511_v23  ;;  %615 = vst [vmem:[%s1013_s19 + $0xe8] sm:$0xff] %v575_v25 }
 0x119 PF: > { %s13_s14 = sadd.s32 1, %s916_s14   ;;  %s1092_s12 = smov %s912_s13 }
 0x11a   : > { %p10_p5 = scmp.ge.s32.totalorder %s13_s14, 4   ;;  %s1093_s13 = smov %s1095_s15 }
 0x11c   :  { %12 = sbr.rel (!%p10_p5) target bundleno = 2 (0x2), region = 68 }

</bundles_post_ra>
